<compile_context>
chip_gen: v5e
topology: v5e:2x2
jax: 0.10.0
libtpu: 0.0.40
codegen_flags: <defaults>
</compile_context>

<pallas_src>
import jax
import jax.numpy as jnp
from jax.experimental import pallas as pl
from jax.experimental.pallas import tpu as pltpu


IN_DIM = 7
K_PAD = 8          # contraction dim of layer 1 padded to a sublane multiple
H1 = 512
H2 = 256
OUT_DIM = 1


def _leaky_relu(x, slope=0.2):
    return jnp.where(x > 0, x, slope * x)


def discriminator_kernel(x_ref, w1_ref, b1_ref, w2_ref, b2_ref, w3_ref, b3_ref,
                         o_ref):
    # x tile: (tb, 8) f32 -> bf16 for the MXU; accumulate in f32.
    x = x_ref[...].astype(jnp.bfloat16)

    h1 = jnp.dot(x, w1_ref[...], preferred_element_type=jnp.float32)
    h1 = _leaky_relu(h1 + b1_ref[...])                 # (tb, 512) f32
    h1 = h1.astype(jnp.bfloat16)                       # bf16 into the big matmul

    h2 = jnp.dot(h1, w2_ref[...], preferred_element_type=jnp.float32)
    h2 = _leaky_relu(h2 + b2_ref[...])                 # (tb, 256) f32

    # Final 256 -> 1 layer on the VPU/XLU (an N=1 MXU matmul would waste a
    # whole systolic pass); keep it in f32 and write a lane-dense row.
    h3 = jnp.sum(h2 * w3_ref[...], axis=1)             # (tb,) f32
    logits = h3[None, :] + b3_ref[...]                 # (1, tb)
    o_ref[...] = jax.nn.sigmoid(logits)[None]          # (1, 1, tb)


def discriminator_forward(x, params, *, batch_tile=None):
    """x: (B, 7) float32. params: dict of weights/biases. Returns (B, 1) f32."""
    B = x.shape[0]
    assert x.shape[1] == IN_DIM

    if batch_tile is None:
        # MXU-aligned tile: multiple of 256 (full M pass on v6e/v7x, 2x128 on
        # v5e); 512 amortizes the per-grid-step overhead for larger batches.
        batch_tile = 512 if B >= 512 else 256
    tb = batch_tile
    assert tb % 8 == 0, "batch tile must be sublane aligned"

    n_tiles = pl.cdiv(B, tb)
    b_pad = n_tiles * tb

    # Pad the batch to a tile multiple and the contraction dim 7 -> 8.
    x_pad = jnp.pad(x.astype(jnp.float32),
                    ((0, b_pad - B), (0, K_PAD - IN_DIM)))

    # Weights stored as (in, out); big matmul operands cast to bf16 once here.
    w1 = jnp.pad(params["w1"], ((0, K_PAD - IN_DIM), (0, 0))).astype(jnp.bfloat16)
    w2 = params["w2"].astype(jnp.bfloat16)
    b1 = params["b1"].reshape(1, H1).astype(jnp.float32)
    b2 = params["b2"].reshape(1, H2).astype(jnp.float32)
    w3 = params["w3"].reshape(1, H2).astype(jnp.float32)   # row vec for VPU reduce
    b3 = params["b3"].reshape(1, 1).astype(jnp.float32)

    # Constant block index -> weights stay resident in VMEM across grid steps.
    wspec = lambda s: pl.BlockSpec(s, lambda i: (0, 0))

    out = pl.pallas_call(
        discriminator_kernel,
        out_shape=jax.ShapeDtypeStruct((n_tiles, 1, tb), jnp.float32),
        grid_spec=pltpu.PrefetchScalarGridSpec(
            num_scalar_prefetch=0,
            grid=(n_tiles,),
            in_specs=[
                pl.BlockSpec((tb, K_PAD), lambda i: (i, 0)),   # x tile
                wspec((K_PAD, H1)),                            # w1 (bf16)
                wspec((1, H1)),                                # b1
                wspec((H1, H2)),                               # w2 (bf16)
                wspec((1, H2)),                                # b2
                wspec((1, H2)),                                # w3 row
                wspec((1, 1)),                                 # b3
            ],
            out_specs=pl.BlockSpec((1, 1, tb), lambda i: (i, 0, 0)),
        ),
        compiler_params=pltpu.CompilerParams(
            dimension_semantics=("parallel",)),
    )(x_pad, w1, b1, w2, b2, w3, b3)

    return out.reshape(b_pad, 1)[:B]


def init_params(key):
    """Deterministic init matching PyTorch nn.Linear default:
    U(-1/sqrt(fan_in), 1/sqrt(fan_in)) for both weight and bias."""
    def linear(k, fan_in, fan_out):
        kw, kb = jax.random.split(k)
        bound = 1.0 / jnp.sqrt(jnp.float32(fan_in))
        w = jax.random.uniform(kw, (fan_in, fan_out), jnp.float32, -bound, bound)
        b = jax.random.uniform(kb, (fan_out,), jnp.float32, -bound, bound)
        return w, b

    k1, k2, k3 = jax.random.split(key, 3)
    w1, b1 = linear(k1, IN_DIM, H1)
    w2, b2 = linear(k2, H1, H2)
    w3, b3 = linear(k3, H2, OUT_DIM)
    return {"w1": w1, "b1": b1, "w2": w2, "b2": b2, "w3": w3, "b3": b3}


def reference_forward(x, p):
    h = x @ p["w1"] + p["b1"]
    h = jnp.where(h > 0, h, 0.2 * h)
    h = h @ p["w2"] + p["b2"]
    h = jnp.where(h > 0, h, 0.2 * h)
    h = h @ p["w3"] + p["b3"]
    return jax.nn.sigmoid(h)


if __name__ == "__main__":
    key = jax.random.PRNGKey(0)
    kp, kx = jax.random.split(key)
    params = init_params(kp)

    B = 32   # small demo batch; the wrapper pads it up to one 256-row MXU tile
    x = jax.random.normal(kx, (B, IN_DIM), dtype=jnp.float32)

    out = jax.block_until_ready(discriminator_forward(x, params))

    ref = reference_forward(x, params)
    assert out.shape == (B, OUT_DIM), out.shape
    err = float(jnp.max(jnp.abs(out - ref)))
    # bf16 matmul inputs with f32 accumulation -> small error after sigmoid.
    assert err < 1e-2, f"max abs error {err}"

    print("KERNEL_OK")
</pallas_src>

<mosaic_0001>
module attributes {stable_mosaic.version = 11 : i64} {
  func.func @discriminator_kernel(%arg0: i32, %arg1: memref<256x8xf32, #tpu.memory_space<vmem>>, %arg2: memref<8x512xbf16, #tpu.memory_space<vmem>>, %arg3: memref<1x512xf32, #tpu.memory_space<vmem>>, %arg4: memref<512x256xbf16, #tpu.memory_space<vmem>>, %arg5: memref<1x256xf32, #tpu.memory_space<vmem>>, %arg6: memref<1x256xf32, #tpu.memory_space<vmem>>, %arg7: memref<1x1xf32, #tpu.memory_space<vmem>>, %arg8: memref<1x1x256xf32, #tpu.memory_space<vmem>>) attributes {dimension_semantics = [#tpu.dimension_semantics<parallel>], iteration_bounds = array<i64: 1>, scalar_prefetch = 0 : i64, scratch_operands = 0 : i64, tpu.core_type = #tpu.core_type<tc>, window_params = [{transform_indices = @transform_0, window_bounds = array<i64: 256, 8>}, {pipeline_mode = #tpu.pipeline_mode<synchronous>, transform_indices = @transform_1, window_bounds = array<i64: 8, 512>}, {pipeline_mode = #tpu.pipeline_mode<synchronous>, transform_indices = @transform_2, window_bounds = array<i64: 1, 512>}, {pipeline_mode = #tpu.pipeline_mode<synchronous>, transform_indices = @transform_3, window_bounds = array<i64: 512, 256>}, {pipeline_mode = #tpu.pipeline_mode<synchronous>, transform_indices = @transform_4, window_bounds = array<i64: 1, 256>}, {pipeline_mode = #tpu.pipeline_mode<synchronous>, transform_indices = @transform_5, window_bounds = array<i64: 1, 256>}, {pipeline_mode = #tpu.pipeline_mode<synchronous>, transform_indices = @transform_6, window_bounds = array<i64: 1, 1>}, {transform_indices = @transform_7, window_bounds = array<i64: 1, 1, 256>}]} {
    %c0 = arith.constant 0 : index
    %c0_0 = arith.constant 0 : index
    %0 = vector.load %arg1[%c0, %c0_0] : memref<256x8xf32, #tpu.memory_space<vmem>>, vector<256x8xf32>
    %1 = arith.truncf %0 : vector<256x8xf32> to vector<256x8xbf16>
    %c0_1 = arith.constant 0 : index
    %c0_2 = arith.constant 0 : index
    %2 = vector.load %arg2[%c0_1, %c0_2] : memref<8x512xbf16, #tpu.memory_space<vmem>>, vector<8x512xbf16>
    %cst = arith.constant dense<0.000000e+00> : vector<256x512xf32>
    %3 = tpu.matmul %1, %2, %cst {dimension_numbers = #tpu.dot_dimension_numbers<[1], [0], [0], [1], [0, 0, 1, 1], [], []>} : vector<256x8xbf16>, vector<8x512xbf16>, vector<256x512xf32> -> vector<256x512xf32>
    %c0_3 = arith.constant 0 : index
    %c0_4 = arith.constant 0 : index
    %4 = vector.load %arg3[%c0_3, %c0_4] : memref<1x512xf32, #tpu.memory_space<vmem>>, vector<1x512xf32>
    %5 = vector.broadcast %4 : vector<1x512xf32> to vector<256x512xf32>
    %6 = arith.addf %3, %5 : vector<256x512xf32>
    %cst_5 = arith.constant 0.000000e+00 : f32
    %7 = vector.broadcast %cst_5 : f32 to vector<256x512xf32>
    %8 = arith.cmpf ogt, %6, %7 : vector<256x512xf32>
    %cst_6 = arith.constant 2.000000e-01 : f32
    %9 = vector.broadcast %cst_6 : f32 to vector<256x512xf32>
    %10 = arith.mulf %9, %6 : vector<256x512xf32>
    %11 = arith.select %8, %6, %10 : vector<256x512xi1>, vector<256x512xf32>
    %12 = arith.truncf %11 : vector<256x512xf32> to vector<256x512xbf16>
    %c0_7 = arith.constant 0 : index
    %c0_8 = arith.constant 0 : index
    %13 = vector.load %arg4[%c0_7, %c0_8] : memref<512x256xbf16, #tpu.memory_space<vmem>>, vector<512x256xbf16>
    %cst_9 = arith.constant dense<0.000000e+00> : vector<256x256xf32>
    %14 = tpu.matmul %12, %13, %cst_9 {dimension_numbers = #tpu.dot_dimension_numbers<[1], [0], [0], [1], [0, 0, 1, 1], [], []>} : vector<256x512xbf16>, vector<512x256xbf16>, vector<256x256xf32> -> vector<256x256xf32>
    %c0_10 = arith.constant 0 : index
    %c0_11 = arith.constant 0 : index
    %15 = vector.load %arg5[%c0_10, %c0_11] : memref<1x256xf32, #tpu.memory_space<vmem>>, vector<1x256xf32>
    %16 = vector.broadcast %15 : vector<1x256xf32> to vector<256x256xf32>
    %17 = arith.addf %14, %16 : vector<256x256xf32>
    %cst_12 = arith.constant 0.000000e+00 : f32
    %18 = vector.broadcast %cst_12 : f32 to vector<256x256xf32>
    %19 = arith.cmpf ogt, %17, %18 : vector<256x256xf32>
    %cst_13 = arith.constant 2.000000e-01 : f32
    %20 = vector.broadcast %cst_13 : f32 to vector<256x256xf32>
    %21 = arith.mulf %20, %17 : vector<256x256xf32>
    %22 = arith.select %19, %17, %21 : vector<256x256xi1>, vector<256x256xf32>
    %c0_14 = arith.constant 0 : index
    %c0_15 = arith.constant 0 : index
    %23 = vector.load %arg6[%c0_14, %c0_15] : memref<1x256xf32, #tpu.memory_space<vmem>>, vector<1x256xf32>
    %24 = vector.broadcast %23 : vector<1x256xf32> to vector<256x256xf32>
    %25 = arith.mulf %22, %24 : vector<256x256xf32>
    %cst_16 = arith.constant dense<0.000000e+00> : vector<256xf32>
    %26 = vector.multi_reduction <add>, %25, %cst_16 [1] : vector<256x256xf32> to vector<256xf32>
    %27 = vector.shape_cast %26 : vector<256xf32> to vector<1x256xf32>
    %c0_17 = arith.constant 0 : index
    %c0_18 = arith.constant 0 : index
    %28 = vector.load %arg7[%c0_17, %c0_18] : memref<1x1xf32, #tpu.memory_space<vmem>>, vector<1x1xf32>
    %29 = vector.broadcast %28 : vector<1x1xf32> to vector<1x256xf32>
    %30 = arith.addf %27, %29 : vector<1x256xf32>
    %31 = arith.negf %30 : vector<1x256xf32>
    %32 = math.exp %31 : vector<1x256xf32>
    %cst_19 = arith.constant 1.000000e+00 : f32
    %33 = vector.broadcast %cst_19 : f32 to vector<1x256xf32>
    %34 = arith.addf %33, %32 : vector<1x256xf32>
    %35 = arith.divf %33, %34 : vector<1x256xf32>
    %36 = vector.shape_cast %35 : vector<1x256xf32> to vector<1x1x256xf32>
    %c0_20 = arith.constant 0 : index
    %c0_21 = arith.constant 0 : index
    %c0_22 = arith.constant 0 : index
    %37 = vector.load %arg8[%c0_20, %c0_21, %c0_22] : memref<1x1x256xf32, #tpu.memory_space<vmem>>, vector<1x1x256xf32>
    tpu.vector_store %arg8[%c0_20, %c0_21, %c0_22], %36 {strides = array<i32>} : memref<1x1x256xf32, #tpu.memory_space<vmem>>, vector<1x1x256xf32>,
    return
  }
  func.func @transform_0(%arg0: i32) -> (i32, i32) {
    %c0_i32 = arith.constant 0 : i32
    %c0_i32_0 = arith.constant 0 : i32
    return %arg0, %c0_i32 : i32, i32
  }
  func.func @transform_1(%arg0: i32) -> (i32, i32) {
    %c0_i32 = arith.constant 0 : i32
    %c0_i32_0 = arith.constant 0 : i32
    %c0_i32_1 = arith.constant 0 : i32
    return %c0_i32, %c0_i32_0 : i32, i32
  }
  func.func @transform_2(%arg0: i32) -> (i32, i32) {
    %c0_i32 = arith.constant 0 : i32
    %c0_i32_0 = arith.constant 0 : i32
    %c0_i32_1 = arith.constant 0 : i32
    return %c0_i32, %c0_i32_0 : i32, i32
  }
  func.func @transform_3(%arg0: i32) -> (i32, i32) {
    %c0_i32 = arith.constant 0 : i32
    %c0_i32_0 = arith.constant 0 : i32
    %c0_i32_1 = arith.constant 0 : i32
    return %c0_i32, %c0_i32_0 : i32, i32
  }
  func.func @transform_4(%arg0: i32) -> (i32, i32) {
    %c0_i32 = arith.constant 0 : i32
    %c0_i32_0 = arith.constant 0 : i32
    %c0_i32_1 = arith.constant 0 : i32
    return %c0_i32, %c0_i32_0 : i32, i32
  }
  func.func @transform_5(%arg0: i32) -> (i32, i32) {
    %c0_i32 = arith.constant 0 : i32
    %c0_i32_0 = arith.constant 0 : i32
    %c0_i32_1 = arith.constant 0 : i32
    return %c0_i32, %c0_i32_0 : i32, i32
  }
  func.func @transform_6(%arg0: i32) -> (i32, i32) {
    %c0_i32 = arith.constant 0 : i32
    %c0_i32_0 = arith.constant 0 : i32
    %c0_i32_1 = arith.constant 0 : i32
    return %c0_i32, %c0_i32_0 : i32, i32
  }
  func.func @transform_7(%arg0: i32) -> (i32, i32, i32) {
    %c0_i32 = arith.constant 0 : i32
    %c0_i32_0 = arith.constant 0 : i32
    %c0_i32_1 = arith.constant 0 : i32
    return %arg0, %c0_i32, %c0_i32_0 : i32, i32, i32
  }
}

</mosaic_0001>

<bundles_post_ra>
// kernel: tpu_custom_call.1
= control target key start
LH: loop header
LB: loop body
LE: loop exit
PB: predicated region body
PF: predicated region fallthrough
CT: control target
= control target key end

     0   :  { %s6023_s0 = inlined_call_operand.vmem [shape: f32[256,8], index: 0, kind: input, shape index: {}]   ;;  %s6024_s1 = inlined_call_operand.vmem [shape: bf16[8,512], index: 1, kind: input, shape index: {}]   ;;  %s6025_s2 = inlined_call_operand.vmem [shape: f32[1,512], index: 2, kind: input, shape index: {}]   ;;  %s6026_s3 = inlined_call_operand.hbm [shape: bf16[512,256], index: 3, kind: input, shape index: {}]   ;;  %s6027_s4 = inlined_call_operand.vmem [shape: f32[1,256], index: 4, kind: input, shape index: {}]   ;;  %s6028_s5 = inlined_call_operand.vmem [shape: f32[1,256], index: 5, kind: input, shape index: {}]   ;;  %s6029_s6 = inlined_call_operand.<no memory space> [shape: f32[1,1], index: 6, kind: input, shape index: {}]   ;;  %s6030_s7 = inlined_call_operand.hbm [shape: f32[1,1,256], index: 7, kind: output, shape index: {}]  }
   0x1   :  { %v12_v0 = vstv %s6029_s6 }
   0x2   :  { %13 = vst [vmem:[#allocation2] sm:$0x1] %v12_v0 }
   0x3   :  { %14 = vsyncpa [#allocation4], 0 }
   0x4   :  { %15 = vsyncpa [#allocation5], 0  ;;  %s26_s28 = sshll.u32 %s6026_s3, 4  ;;  %s4492_s29 = smov [#allocation3]   ;;  %s27_s28 = int_to_ptr.hbm [resolvable:$true] %s26_s28 }
   0x5   :  { %s28_s30 = sshll.u32 %s4492_s29, 4  ;;  %s4493_s8 = smov 128   ;;  %s29_s30 = int_to_ptr.vmem [resolvable:$true] %s28_s30 }
   0x6   :  { %s4494_s9 = smov 8  }
   0x7   :  { %34 = dma.hbm_to_vmem [thread:$0]  %s27_s28, 8192, %s29_s30, [#allocation4], %s4493_s8, %s4493_s8, %s4494_s9  }
   0x8   :  { %4488 = dma.done.wait [#allocation4], 8192  }
   0x9   :  { %4489 = vsyncadd [#allocation4], 4294959104  ;;  %v94_v1 = vld [vmem:[%s6024_s1] sm:$0xff]  ;;  %v95_v2 = vld [vmem:[%s6024_s1 + $0x8] sm:$0xff]  ;;  %vm165_vm0 = vcmask 1043456   ;;  %vm116_vm1 = vcmask 64512  }
   0xa   :  { %v46_v3 = vld [vmem:[%s6023_s0] sm:$0xff]  ;;  %v108_v4 = vunpack.c.l.b16 %v94_v1  ;;  %v109_v5 = vunpack.c.h.b16 %v94_v1  ;;  %v110_v6 = vunpack.c.l.b16 %v95_v2  ;;  %v111_v7 = vunpack.c.h.b16 %v95_v2  ;;  %v47_v8 = vld [vmem:[%s6023_s0 + $0x8] sm:$0xff]  ;;  %v4138_v9 = vld [vmem:[#allocation3 + $0x170] sm:$0xf]  ;;  %s3878_s28 = sshll.u32 %s6030_s7, 4  ;;  %s3879_s28 = int_to_ptr.hbm [resolvable:$true] %s3878_s28 }
   0xb   :  { %v4287_v10 = vld [vmem:[#allocation3 + $0x174] sm:$0xf0]  ;;  %v4010_v11 = vld [vmem:[#allocation3 + $0x70] sm:$0xf]  ;;  %v78_v18 = vpack.c.bf16 %v47_v8, %v46_v3  ;;  %v4130_v30 = vld [vmem:[#allocation3 + $0x160] sm:$0xf] }
   0xc   :  { %v4255_v12 = vld [vmem:[#allocation3 + $0x74] sm:$0xf0]  ;;  %v112_v13 = vpack.c.b16 %v108_v4, %v108_v4  ;;  %v113_v14 = vpack.c.b16 %v109_v5, %v109_v5  ;;  %v114_v15 = vpack.c.b16 %v110_v6, %v110_v6  ;;  %v115_v16 = vpack.c.b16 %v111_v7, %v111_v7  ;;  %v4202_v17 = vld [vmem:[#allocation3 + $0x1f0] sm:$0xf]  ;;  %v4285_v31 = vld [vmem:[#allocation3 + $0x164] sm:$0xf0] }
   0xd   :  { %v4139_v19 = vor.u32 %v4287_v10, %v4138_v9  ;;  %v4011_v20 = vor.u32 %v4255_v12, %v4010_v11  ;;  %v4303_v21 = vld [vmem:[#allocation3 + $0x1f4] sm:$0xf0]  ;;  %v4074_v22 = vld [vmem:[#allocation3 + $0xf0] sm:$0xf]  ;;  %v4002_v32 = vld [vmem:[#allocation3 + $0x60] sm:$0xf]  ;;  %v4131_v33 = vor.u32 %v4285_v31, %v4130_v30 }
   0xe   :  { %v4271_v23 = vld [vmem:[#allocation3 + $0xf4] sm:$0xf0]  ;;  %v167_v24 = vsel %vm165_vm0, %v112_v13, 0  ;;  %v170_v25 = vsel %vm165_vm0, %v113_v14, 0  ;;  %v173_v26 = vsel %vm165_vm0, %v114_v15, 0  ;;  %v176_v27 = vsel %vm165_vm0, %v115_v16, 0 }
   0xf   :  { %185 = vmatpush.bf16.msra.mxu0 %v167_v24  ;;  %274 = vmatpush.bf16.msra.mxu1 %v170_v25  ;;  %v4203_v28 = vor.u32 %v4303_v21, %v4202_v17  ;;  %v4075_v29 = vor.u32 %v4271_v23, %v4074_v22  ;;  %v4253_v34 = vld [vmem:[#allocation3 + $0x64] sm:$0xf0]  ;;  %v4194_v35 = vld [vmem:[#allocation3 + $0x1e0] sm:$0xf]  ;;  %v49_v43 = vld [vmem:[%s6023_s0 + $0x18] sm:$0xff] }
  0x10   :  { %363 = vmatpush.bf16.msra.mxu2 %v173_v26  ;;  %452 = vmatpush.bf16.msra.mxu3 %v176_v27  ;;  %v4301_v36 = vld [vmem:[#allocation3 + $0x1e4] sm:$0xf0]  ;;  %v4003_v37 = vor.u32 %v4253_v34, %v4002_v32  ;;  %v4066_v39 = vld [vmem:[#allocation3 + $0xe0] sm:$0xf]  ;;  %v50_v45 = vld [vmem:[%s6023_s0 + $0x20] sm:$0xff] }
  0x11   :  { %v4195_v38 = vor.u32 %v4301_v36, %v4194_v35  ;;  %v4269_v40 = vld [vmem:[#allocation3 + $0xe4] sm:$0xf0]  ;;  %v51_v46 = vld [vmem:[%s6023_s0 + $0x28] sm:$0xff]  ;;  %v4122_v48 = vld [vmem:[#allocation3 + $0x150] sm:$0xf] }
  0x12   :  { %3888 = vmatmul.msk.bf16.vlgmr.msra.gmra.mxu0 %vm116_vm1, %v78_v18  ;;  %3904 = vmatmul.msk.bf16.vlgmr.msra.gmra.mxu1 %vm116_vm1, %v78_v18  ;;  %v4067_v41 = vor.u32 %v4269_v40, %v4066_v39  ;;  %v48_v42 = vld [vmem:[%s6023_s0 + $0x10] sm:$0xff]  ;;  %v80_v47 = vpack.c.bf16 %v51_v46, %v50_v45  ;;  %v4283_v49 = vld [vmem:[#allocation3 + $0x154] sm:$0xf0]  ;;  %v3994_v50 = vld [vmem:[#allocation3 + $0x50] sm:$0xf] }
  0x13   :  { %1372 = vmatpush.bf16.msrb.mxu0 %v4011_v20  ;;  %3920 = vmatmul.msk.bf16.vlgmr.msra.gmra.mxu2 %vm116_vm1, %v78_v18  ;;  %v79_v44 = vpack.c.bf16 %v49_v43, %v48_v42  ;;  %v4123_v51 = vor.u32 %v4283_v49, %v4122_v48  ;;  %v4251_v52 = vld [vmem:[#allocation3 + $0x54] sm:$0xf0]  ;;  %v4186_v53 = vld [vmem:[#allocation3 + $0x1d0] sm:$0xf]  ;;  %v52_v60 = vld [vmem:[%s6023_s0 + $0x30] sm:$0xff] }
  0x14   :  { %1550 = vmatpush.bf16.msrb.mxu2 %v4139_v19  ;;  %3936 = vmatmul.msk.bf16.vlgmr.msra.gmra.mxu3 %vm116_vm1, %v78_v18  ;;  %v4299_v54 = vld [vmem:[#allocation3 + $0x1d4] sm:$0xf0]  ;;  %v3995_v55 = vor.u32 %v4251_v52, %v3994_v50  ;;  %v4058_v57 = vld [vmem:[#allocation3 + $0xd0] sm:$0xf]  ;;  %v55_v0 = vld [vmem:[%s6023_s0 + $0x48] sm:$0xff] }
  0x15   :  { %1639 = vmatpush.bf16.msrb.mxu3 %v4203_v28  ;;  %1461 = vmatpush.bf16.msrb.mxu1 %v4075_v29  ;;  %v4187_v56 = vor.u32 %v4299_v54, %v4186_v53  ;;  %v4267_v58 = vld [vmem:[#allocation3 + $0xd4] sm:$0xf0]  ;;  %v53_v61 = vld [vmem:[%s6023_s0 + $0x38] sm:$0xff]  ;;  %v4114_v2 = vld [vmem:[#allocation3 + $0x140] sm:$0xf] }
  0x16   :  { %v4059_v59 = vor.u32 %v4267_v58, %v4058_v57  ;;  %v81_v62 = vpack.c.bf16 %v53_v61, %v52_v60  ;;  %v54_v63 = vld [vmem:[%s6023_s0 + $0x40] sm:$0xff]  ;;  %v4281_v3 = vld [vmem:[#allocation3 + $0x144] sm:$0xf0]  ;;  %v3986_v4 = vld [vmem:[#allocation3 + $0x40] sm:$0xf] }
  0x17   :  { %1373 = vmatpush.bf16.msrb.mxu0 %v4003_v37  ;;  %v82_v1 = vpack.c.bf16 %v55_v0, %v54_v63  ;;  %v4115_v5 = vor.u32 %v4281_v3, %v4114_v2  ;;  %v4249_v6 = vld [vmem:[#allocation3 + $0x44] sm:$0xf0]  ;;  %v4178_v7 = vld [vmem:[#allocation3 + $0x1c0] sm:$0xf]  ;;  %v57_v15 = vld [vmem:[%s6023_s0 + $0x58] sm:$0xff] }
  0x18   :  { %1551 = vmatpush.bf16.msrb.mxu2 %v4131_v33  ;;  %v4297_v8 = vld [vmem:[#allocation3 + $0x1c4] sm:$0xf0]  ;;  %v3987_v9 = vor.u32 %v4249_v6, %v3986_v4  ;;  %v4050_v11 = vld [vmem:[#allocation3 + $0xc0] sm:$0xf]  ;;  %v58_v17 = vld [vmem:[%s6023_s0 + $0x60] sm:$0xff] }
  0x19   :  { %1640 = vmatpush.bf16.msrb.mxu3 %v4195_v38  ;;  %1462 = vmatpush.bf16.msrb.mxu1 %v4067_v41  ;;  %v4179_v10 = vor.u32 %v4297_v8, %v4178_v7  ;;  %v4265_v12 = vld [vmem:[#allocation3 + $0xc4] sm:$0xf0]  ;;  %v59_v18 = vld [vmem:[%s6023_s0 + $0x68] sm:$0xff]  ;;  %v4106_v20 = vld [vmem:[#allocation3 + $0x130] sm:$0xf] }
  0x1a   :  { %v4051_v13 = vor.u32 %v4265_v12, %v4050_v11  ;;  %v56_v14 = vld [vmem:[%s6023_s0 + $0x50] sm:$0xff]  ;;  %v84_v19 = vpack.c.bf16 %v59_v18, %v58_v17  ;;  %v4279_v21 = vld [vmem:[#allocation3 + $0x134] sm:$0xf0]  ;;  %v3978_v22 = vld [vmem:[#allocation3 + $0x30] sm:$0xf] }
  0x1b   :  { %1374 = vmatpush.bf16.msrb.mxu0 %v3995_v55  ;;  %v83_v16 = vpack.c.bf16 %v57_v15, %v56_v14  ;;  %v4107_v23 = vor.u32 %v4279_v21, %v4106_v20  ;;  %v4247_v24 = vld [vmem:[#allocation3 + $0x34] sm:$0xf0]  ;;  %v4170_v25 = vld [vmem:[#allocation3 + $0x1b0] sm:$0xf]  ;;  %v60_v29 = vld [vmem:[%s6023_s0 + $0x70] sm:$0xff] }
  0x1c   :  { %1552 = vmatpush.bf16.msrb.mxu2 %v4123_v51  ;;  %v4295_v26 = vld [vmem:[#allocation3 + $0x1b4] sm:$0xf0]  ;;  %v3979_v27 = vor.u32 %v4247_v24, %v3978_v22  ;;  %v61_v30 = vld [vmem:[%s6023_s0 + $0x78] sm:$0xff]  ;;  %v63_v36 = vld [vmem:[%s6023_s0 + $0x88] sm:$0xff] }
  0x1d   :  { %1641 = vmatpush.bf16.msrb.mxu3 %v4187_v56  ;;  %1463 = vmatpush.bf16.msrb.mxu1 %v4059_v59  ;;  %v4171_v28 = vor.u32 %v4295_v26, %v4170_v25  ;;  %v4042_v31 = vld [vmem:[#allocation3 + $0xb0] sm:$0xf]  ;;  %v4263_v32 = vld [vmem:[#allocation3 + $0xb4] sm:$0xf0]  ;;  %v85_v34 = vpack.c.bf16 %v61_v30, %v60_v29  ;;  %v4277_v45 = vld [vmem:[#allocation3 + $0x124] sm:$0xf0] }
  0x1e   :  { %v4043_v33 = vor.u32 %v4263_v32, %v4042_v31  ;;  %v62_v35 = vld [vmem:[%s6023_s0 + $0x80] sm:$0xff]  ;;  %v3970_v46 = vld [vmem:[#allocation3 + $0x20] sm:$0xf]  ;;  %v4245_v49 = vld [vmem:[#allocation3 + $0x24] sm:$0xf0] }
  0x1f   :  { %1375 = vmatpush.bf16.msrb.mxu0 %v3987_v9  ;;  %v96_v37 = vld [vmem:[%s6025_s2] sm:$0xf]  ;;  %v86_v38 = vpack.c.bf16 %v63_v36, %v62_v35  ;;  %v4162_v50 = vld [vmem:[#allocation3 + $0x1a0] sm:$0xf]  ;;  %v4293_v51 = vld [vmem:[#allocation3 + $0x1a4] sm:$0xf0]  ;;  %v3971_v53 = vor.u32 %v4245_v49, %v3970_v46 }
  0x20   :  { %1553 = vmatpush.bf16.msrb.mxu2 %v4115_v5  ;;  %v4642_v39 = vperm.slane %v96_v37, 0  ;;  %v4644_v42 = vperm.slane %v96_v37, 1  ;;  %v4652_v52 = vperm.slane %v96_v37, 2  ;;  %v4163_v54 = vor.u32 %v4293_v51, %v4162_v50  ;;  %v65_v6 = vld [vmem:[%s6023_s0 + $0x98] sm:$0xff]  ;;  %v4034_v7 = vld [vmem:[#allocation3 + $0xa0] sm:$0xf] }
  0x21   :  { %1642 = vmatpush.bf16.msrb.mxu3 %v4179_v10  ;;  %1464 = vmatpush.bf16.msrb.mxu1 %v4051_v13  ;;  %v4654_v58 = vperm.slane %v96_v37, 3  ;;  %v4261_v8 = vld [vmem:[#allocation3 + $0xa4] sm:$0xf0]  ;;  %v67_v49 = vld [vmem:[%s6023_s0 + $0xa8] sm:$0xff] }
  0x22   :  { %3889 = vmatmul.msk.bf16.gmra.mxu0 %vm116_vm1, %v79_v44  ;;  %3905 = vmatmul.msk.bf16.gmra.mxu1 %vm116_vm1, %v79_v44  ;;  %v4035_v12 = vor.u32 %v4261_v8, %v4034_v7  ;;  %v4090_v8 = vld [vmem:[#allocation3 + $0x110] sm:$0xf] }
  0x23   :  { %3921 = vmatmul.msk.bf16.gmra.mxu2 %vm116_vm1, %v79_v44  ;;  %1376 = vmatpush.bf16.msrb.mxu0 %v3979_v27 }
  0x24   :  { %3937 = vmatmul.msk.bf16.gmra.mxu3 %vm116_vm1, %v79_v44  ;;  %1554 = vmatpush.bf16.msrb.mxu2 %v4107_v23  ;;  %v4098_v44 = vld [vmem:[#allocation3 + $0x120] sm:$0xf] }
  0x25   :  { %1643 = vmatpush.bf16.msrb.mxu3 %v4171_v28  ;;  %1465 = vmatpush.bf16.msrb.mxu1 %v4043_v33  ;;  %v4099_v48 = vor.u32 %v4277_v45, %v4098_v44 }
  0x27   :  { %1377 = vmatpush.bf16.msrb.mxu0 %v3971_v53 }
  0x28   :  { %1555 = vmatpush.bf16.msrb.mxu2 %v4099_v48  ;;  %v66_v48 = vld [vmem:[%s6023_s0 + $0xa0] sm:$0xff] }
  0x29   :  { %1644 = vmatpush.bf16.msrb.mxu3 %v4163_v54  ;;  %1466 = vmatpush.bf16.msrb.mxu1 %v4035_v12 }
  0x32   :  { %3890 = vmatmul.msk.bf16.gmra.mxu0 %vm116_vm1, %v80_v47  ;;  %3906 = vmatmul.msk.bf16.gmra.mxu1 %vm116_vm1, %v80_v47 }
  0x33   :  { %3922 = vmatmul.msk.bf16.gmra.mxu2 %vm116_vm1, %v80_v47 }
  0x34   :  { %3938 = vmatmul.msk.bf16.gmra.mxu3 %vm116_vm1, %v80_v47 }
  0x42   :  { %3891 = vmatmul.msk.bf16.gmra.mxu0 %vm116_vm1, %v81_v62  ;;  %3907 = vmatmul.msk.bf16.gmra.mxu1 %vm116_vm1, %v81_v62 }
  0x43   :  { %3923 = vmatmul.msk.bf16.gmra.mxu2 %vm116_vm1, %v81_v62 }
  0x44   :  { %3939 = vmatmul.msk.bf16.gmra.mxu3 %vm116_vm1, %v81_v62 }
  0x52   :  { %3892 = vmatmul.msk.bf16.gmra.mxu0 %vm116_vm1, %v82_v1  ;;  %3908 = vmatmul.msk.bf16.gmra.mxu1 %vm116_vm1, %v82_v1 }
  0x53   :  { %3924 = vmatmul.msk.bf16.gmra.mxu2 %vm116_vm1, %v82_v1 }
  0x54   :  { %3940 = vmatmul.msk.bf16.gmra.mxu3 %vm116_vm1, %v82_v1  ;;  %v64_v1 = vld [vmem:[%s6023_s0 + $0x90] sm:$0xff] }
  0x55   :  { %v87_v18 = vpack.c.bf16 %v65_v6, %v64_v1 }
  0x62   :  { %3893 = vmatmul.msk.bf16.gmra.mxu0 %vm116_vm1, %v83_v16  ;;  %3909 = vmatmul.msk.bf16.gmra.mxu1 %vm116_vm1, %v83_v16 }
  0x63   :  { %3925 = vmatmul.msk.bf16.gmra.mxu2 %vm116_vm1, %v83_v16 }
  0x64   :  { %3941 = vmatmul.msk.bf16.gmra.mxu3 %vm116_vm1, %v83_v16 }
  0x72   :  { %3894 = vmatmul.msk.bf16.gmra.mxu0 %vm116_vm1, %v84_v19  ;;  %3910 = vmatmul.msk.bf16.gmra.mxu1 %vm116_vm1, %v84_v19 }
  0x73   :  { %3926 = vmatmul.msk.bf16.gmra.mxu2 %vm116_vm1, %v84_v19 }
  0x74   :  { %3942 = vmatmul.msk.bf16.gmra.mxu3 %vm116_vm1, %v84_v19 }
  0x82   :  { %3895 = vmatmul.msk.bf16.gmra.mxu0 %vm116_vm1, %v85_v34  ;;  %3911 = vmatmul.msk.bf16.gmra.mxu1 %vm116_vm1, %v85_v34 }
  0x83   :  { %3927 = vmatmul.msk.bf16.gmra.mxu2 %vm116_vm1, %v85_v34 }
  0x84   :  { %3943 = vmatmul.msk.bf16.gmra.mxu3 %vm116_vm1, %v85_v34 }
  0x8f   :  { %v187_v40 = vpop.f32.mrf.mxu0  ;;  %v276_v41 = vpop.f32.mrf.mxu1 }
  0x90   :  { %v188_v43 = vadd.f32 %v187_v40, %v4642_v39  ;;  %v277_v47 = vadd.f32 %v276_v41, %v4644_v42 }
  0x92   :  { %3896 = vmatmul.msk.bf16.gmra.mxu0 %vm116_vm1, %v86_v38  ;;  %3912 = vmatmul.msk.bf16.gmra.mxu1 %vm116_vm1, %v86_v38  ;;  %v662_v57 = vmul.f32 0.2, %v188_v43  ;;  %vm534_vm2 = vcmp.gt.f32.partialorder %v188_v43, 0.0  ;;  %v663_v61 = vmul.f32 0.2, %v277_v47  ;;  %vm535_vm3 = vcmp.gt.f32.partialorder %v277_v47, 0.0 }
  0x93   :  { %3928 = vmatmul.msk.bf16.gmra.mxu2 %vm116_vm1, %v86_v38 }
  0x94   :  { %3944 = vmatmul.msk.bf16.gmra.mxu3 %vm116_vm1, %v86_v38  ;;  %v790_v4 = vsel %vm534_vm2, %v188_v43, %v662_v57  ;;  %v791_v9 = vsel %vm535_vm3, %v277_v47, %v663_v61 }
  0x96   :  { %v365_v55 = vpop.f32.mrf.mxu2 }
  0x97   :  { %v454_v56 = vpop.f32.mrf.mxu3  ;;  %v189_v59 = vpop.f32.mrf.mxu0  ;;  %v366_v0 = vadd.f32 %v365_v55, %v4652_v52 }
  0x98   :  { %v278_v60 = vpop.f32.mrf.mxu1  ;;  %v190_v62 = vadd.f32 %v189_v59, %v4642_v39  ;;  %v455_v5 = vadd.f32 %v454_v56, %v4654_v58 }
  0x99   :  { %v279_v63 = vadd.f32 %v278_v60, %v4644_v42  ;;  %v664_v15 = vmul.f32 0.2, %v366_v0  ;;  %vm536_vm6 = vcmp.gt.f32.partialorder %v366_v0, 0.0 }
  0x9a   :  { %vm538_vm4 = vcmp.gt.f32.partialorder %v190_v62, 0.0  ;;  %v666_v2 = vmul.f32 0.2, %v190_v62  ;;  %v665_v19 = vmul.f32 0.2, %v455_v5  ;;  %vm537_vm7 = vcmp.gt.f32.partialorder %v455_v5, 0.0 }
  0x9b   :  { %vm539_vm5 = vcmp.gt.f32.partialorder %v279_v63, 0.0  ;;  %v667_v3 = vmul.f32 0.2, %v279_v63  ;;  %v792_v26 = vsel %vm536_vm6, %v366_v0, %v664_v15 }
  0x9c   :  { %v794_v10 = vsel %vm538_vm4, %v190_v62, %v666_v2  ;;  %v793_v27 = vsel %vm537_vm7, %v455_v5, %v665_v19  ;;  %v88_v62 = vpack.c.bf16 %v67_v49, %v66_v48  ;;  %v4291_v19 = vld [vmem:[#allocation3 + $0x194] sm:$0xf0] }
  0x9d   :  { %v795_v11 = vsel %vm539_vm5, %v279_v63, %v667_v3  ;;  %v4666_v13 = vpack.c.bf16 %v794_v10, %v790_v4  ;;  %v3962_v10 = vld [vmem:[#allocation3 + $0x10] sm:$0xf] }
  0x9e   :  { %v4668_v14 = vpack.c.bf16 %v795_v11, %v791_v9  ;;  %v367_v16 = vpop.f32.mrf.mxu2  ;;  %v4275_v9 = vld [vmem:[#allocation3 + $0x114] sm:$0xf0] }
  0x9f   :  { %v456_v17 = vpop.f32.mrf.mxu3  ;;  %v368_v20 = vadd.f32 %v367_v16, %v4652_v52  ;;  %v192_v22 = vpop.f32.mrf.mxu0  ;;  %v4091_v16 = vor.u32 %v4275_v9, %v4090_v8 }
  0xa0   :  { %v457_v21 = vadd.f32 %v456_v17, %v4654_v58  ;;  %v281_v23 = vpop.f32.mrf.mxu1  ;;  %v193_v32 = vadd.f32 %v192_v22, %v4642_v39  ;;  %v4243_v17 = vld [vmem:[#allocation3 + $0x14] sm:$0xf0] }
  0xa1   :  { %vm540_vm8 = vcmp.gt.f32.partialorder %v368_v20, 0.0  ;;  %v668_v24 = vmul.f32 0.2, %v368_v20  ;;  %v282_v33 = vadd.f32 %v281_v23, %v4644_v42  ;;  %v3963_v22 = vor.u32 %v4243_v17, %v3962_v10  ;;  %1556 = vmatpush.bf16.msrb.mxu2 %v4091_v16 }
  0xa2   :  { %vm541_vm9 = vcmp.gt.f32.partialorder %v457_v21, 0.0  ;;  %v669_v25 = vmul.f32 0.2, %v457_v21  ;;  %3897 = vmatmul.msk.bf16.gmra.mxu0 %vm116_vm1, %v87_v18  ;;  %3913 = vmatmul.msk.bf16.gmra.mxu1 %vm116_vm1, %v87_v18  ;;  %v670_v38 = vmul.f32 0.2, %v193_v32  ;;  %vm542_vm10 = vcmp.gt.f32.partialorder %v193_v32, 0.0 }
  0xa3   :  { %v796_v28 = vsel %vm540_vm8, %v368_v20, %v668_v24  ;;  %3929 = vmatmul.msk.bf16.gmra.mxu2 %vm116_vm1, %v87_v18  ;;  %v671_v40 = vmul.f32 0.2, %v282_v33  ;;  %vm543_vm11 = vcmp.gt.f32.partialorder %v282_v33, 0.0  ;;  %1378 = vmatpush.bf16.msrb.mxu0 %v3963_v22 }
  0xa4   :  { %v797_v29 = vsel %vm541_vm9, %v457_v21, %v669_v25  ;;  %3945 = vmatmul.msk.bf16.gmra.mxu3 %vm116_vm1, %v87_v18  ;;  %v4676_v30 = vpack.c.bf16 %v796_v28, %v792_v26  ;;  %v798_v50 = vsel %vm542_vm10, %v193_v32, %v670_v38  ;;  %v4154_v18 = vld [vmem:[#allocation3 + $0x190] sm:$0xf] }
  0xa5   :  { %v4678_v31 = vpack.c.bf16 %v797_v29, %v793_v27  ;;  %v799_v53 = vsel %vm543_vm11, %v282_v33, %v671_v40  ;;  %v4155_v23 = vor.u32 %v4291_v19, %v4154_v18  ;;  %v69_v40 = vld [vmem:[%s6023_s0 + $0xb8] sm:$0xff] }
  0xa6   :  { %v370_v34 = vpop.f32.mrf.mxu2 }
  0xa7   :  { %v459_v35 = vpop.f32.mrf.mxu3  ;;  %v194_v36 = vpop.f32.mrf.mxu0  ;;  %v371_v44 = vadd.f32 %v370_v34, %v4652_v52  ;;  %1645 = vmatpush.bf16.msrb.mxu3 %v4155_v23 }
  0xa8   :  { %v283_v37 = vpop.f32.mrf.mxu1  ;;  %v195_v41 = vadd.f32 %v194_v36, %v4642_v39  ;;  %v460_v45 = vadd.f32 %v459_v35, %v4654_v58  ;;  %v68_v35 = vld [vmem:[%s6023_s0 + $0xb0] sm:$0xff] }
  0xa9   :  { %v284_v43 = vadd.f32 %v283_v37, %v4644_v42  ;;  %v672_v57 = vmul.f32 0.2, %v371_v44  ;;  %vm544_vm14 = vcmp.gt.f32.partialorder %v371_v44, 0.0 }
  0xaa   :  { %vm546_vm12 = vcmp.gt.f32.partialorder %v195_v41, 0.0  ;;  %v674_v46 = vmul.f32 0.2, %v195_v41  ;;  %v673_v59 = vmul.f32 0.2, %v460_v45  ;;  %vm545_vm15 = vcmp.gt.f32.partialorder %v460_v45, 0.0 }
  0xab   :  { %vm547_vm13 = vcmp.gt.f32.partialorder %v284_v43, 0.0  ;;  %v675_v47 = vmul.f32 0.2, %v284_v43  ;;  %v800_v5 = vsel %vm544_vm14, %v371_v44, %v672_v57  ;;  %v89_v57 = vpack.c.bf16 %v69_v40, %v68_v35 }
  0xac   :  { %v802_v51 = vsel %vm546_vm12, %v195_v41, %v674_v46  ;;  %v801_v6 = vsel %vm545_vm15, %v460_v45, %v673_v59  ;;  %v4026_v41 = vld [vmem:[#allocation3 + $0x90] sm:$0xf] }
  0xad   :  { %v803_v54 = vsel %vm547_vm13, %v284_v43, %v675_v47  ;;  %v4692_v55 = vpack.c.bf16 %v802_v51, %v798_v50  ;;  %v4259_v43 = vld [vmem:[#allocation3 + $0x94] sm:$0xf0] }
  0xae   :  { %v4694_v56 = vpack.c.bf16 %v803_v54, %v799_v53  ;;  %v372_v60 = vpop.f32.mrf.mxu2  ;;  %v4027_v45 = vor.u32 %v4259_v43, %v4026_v41 }
  0xaf   :  { %v461_v61 = vpop.f32.mrf.mxu3  ;;  %v373_v63 = vadd.f32 %v372_v60, %v4652_v52  ;;  %v197_v1 = vpop.f32.mrf.mxu0 }
  0xb0   :  { %v462_v0 = vadd.f32 %v461_v61, %v4654_v58  ;;  %v286_v2 = vpop.f32.mrf.mxu1  ;;  %v198_v7 = vadd.f32 %v197_v1, %v4642_v39  ;;  %1467 = vmatpush.bf16.msrb.mxu1 %v4027_v45 }
  0xb1   :  { %vm548_vm0 = vcmp.gt.f32.partialorder %v373_v63, 0.0  ;;  %v676_v3 = vmul.f32 0.2, %v373_v63  ;;  %v287_v15 = vadd.f32 %v286_v2, %v4644_v42 }
  0xb2   :  { %vm549_vm2 = vcmp.gt.f32.partialorder %v462_v0, 0.0  ;;  %v677_v4 = vmul.f32 0.2, %v462_v0  ;;  %3898 = vmatmul.msk.bf16.gmra.mxu0 %vm116_vm1, %v88_v62  ;;  %3914 = vmatmul.msk.bf16.gmra.mxu1 %vm116_vm1, %v88_v62  ;;  %v678_v26 = vmul.f32 0.2, %v198_v7  ;;  %vm550_vm3 = vcmp.gt.f32.partialorder %v198_v7, 0.0 }
  0xb3   :  { %3930 = vmatmul.msk.bf16.gmra.mxu2 %vm116_vm1, %v88_v62  ;;  %v804_v11 = vsel %vm548_vm0, %v373_v63, %v676_v3  ;;  %v679_v29 = vmul.f32 0.2, %v287_v15  ;;  %vm551_vm4 = vcmp.gt.f32.partialorder %v287_v15, 0.0 }
  0xb4   :  { %3946 = vmatmul.msk.bf16.gmra.mxu3 %vm116_vm1, %v88_v62  ;;  %v805_v12 = vsel %vm549_vm2, %v462_v0, %v677_v4  ;;  %v4704_v20 = vpack.c.bf16 %v804_v11, %v800_v5  ;;  %v806_v44 = vsel %vm550_vm3, %v198_v7, %v678_v26  ;;  %v70_v26 = vld [vmem:[%s6023_s0 + $0xc0] sm:$0xff] }
  0xb5   :  { %v4706_v21 = vpack.c.bf16 %v805_v12, %v801_v6  ;;  %v807_v47 = vsel %vm551_vm4, %v287_v15, %v679_v29 }
  0xb6   :  { %6076 = vst [vmem:[#allocation9_spill] sm:$0xff] %v4704_v20  ;;  %v375_v24 = vpop.f32.mrf.mxu2 }
  0xb7   :  { %6077 = vst [vmem:[#allocation10_spill] sm:$0xff] %v4706_v21  ;;  %v464_v25 = vpop.f32.mrf.mxu3  ;;  %v199_v27 = vpop.f32.mrf.mxu0  ;;  %v376_v34 = vadd.f32 %v375_v24, %v4652_v52 }
  0xb8   :  { %v288_v28 = vpop.f32.mrf.mxu1  ;;  %v200_v32 = vadd.f32 %v199_v27, %v4642_v39  ;;  %v465_v38 = vadd.f32 %v464_v25, %v4654_v58  ;;  %v71_v27 = vld [vmem:[%s6023_s0 + $0xc8] sm:$0xff] }
  0xb9   :  { %v289_v33 = vadd.f32 %v288_v28, %v4644_v42  ;;  %v680_v51 = vmul.f32 0.2, %v376_v34  ;;  %vm552_vm7 = vcmp.gt.f32.partialorder %v376_v34, 0.0  ;;  %v90_v41 = vpack.c.bf16 %v71_v27, %v70_v26  ;;  %v73_v27 = vld [vmem:[%s6023_s0 + $0xd8] sm:$0xff] }
  0xba   :  { %vm554_vm5 = vcmp.gt.f32.partialorder %v200_v32, 0.0  ;;  %v682_v36 = vmul.f32 0.2, %v200_v32  ;;  %v681_v59 = vmul.f32 0.2, %v465_v38  ;;  %vm553_vm8 = vcmp.gt.f32.partialorder %v465_v38, 0.0 }
  0xbb   :  { %vm555_vm6 = vcmp.gt.f32.partialorder %v289_v33, 0.0  ;;  %v683_v37 = vmul.f32 0.2, %v289_v33  ;;  %v808_v2 = vsel %vm552_vm7, %v376_v34, %v680_v51 }
  0xbc   :  { %v810_v46 = vsel %vm554_vm5, %v200_v32, %v682_v36  ;;  %v809_v4 = vsel %vm553_vm8, %v465_v38, %v681_v59  ;;  %v4273_v59 = vld [vmem:[#allocation3 + $0x104] sm:$0xf0] }
  0xbd   :  { %v811_v48 = vsel %vm555_vm6, %v289_v33, %v683_v37  ;;  %v4718_v49 = vpack.c.bf16 %v810_v46, %v806_v44 }
  0xbe   :  { %v4720_v50 = vpack.c.bf16 %v811_v48, %v807_v47  ;;  %v377_v53 = vpop.f32.mrf.mxu2 }
  0xbf   :  { %6078 = vst [vmem:[#allocation11_spill] sm:$0xff] %v4718_v49  ;;  %v466_v54 = vpop.f32.mrf.mxu3  ;;  %v378_v60 = vadd.f32 %v377_v53, %v4652_v52  ;;  %v202_v62 = vpop.f32.mrf.mxu0 }
  0xc0   :  { %6079 = vst [vmem:[#allocation12_spill] sm:$0xff] %v4720_v50  ;;  %v467_v61 = vadd.f32 %v466_v54, %v4654_v58  ;;  %v291_v63 = vpop.f32.mrf.mxu1  ;;  %v203_v6 = vadd.f32 %v202_v62, %v4642_v39 }
  0xc1   :  { %vm556_vm9 = vcmp.gt.f32.partialorder %v378_v60, 0.0  ;;  %v684_v0 = vmul.f32 0.2, %v378_v60  ;;  %v292_v7 = vadd.f32 %v291_v63, %v4644_v42 }
  0xc2   :  { %vm557_vm10 = vcmp.gt.f32.partialorder %v467_v61, 0.0  ;;  %v685_v1 = vmul.f32 0.2, %v467_v61  ;;  %3899 = vmatmul.msk.bf16.gmra.mxu0 %vm116_vm1, %v89_v57  ;;  %3915 = vmatmul.msk.bf16.gmra.mxu1 %vm116_vm1, %v89_v57  ;;  %v686_v16 = vmul.f32 0.2, %v203_v6  ;;  %vm558_vm11 = vcmp.gt.f32.partialorder %v203_v6, 0.0 }
  0xc3   :  { %3931 = vmatmul.msk.bf16.gmra.mxu2 %vm116_vm1, %v89_v57  ;;  %v812_v3 = vsel %vm556_vm9, %v378_v60, %v684_v0  ;;  %v687_v17 = vmul.f32 0.2, %v292_v7  ;;  %vm559_vm12 = vcmp.gt.f32.partialorder %v292_v7, 0.0  ;;  %v3954_v60 = vld [vmem:[#allocation3] sm:$0xf] }
  0xc4   :  { %3947 = vmatmul.msk.bf16.gmra.mxu3 %vm116_vm1, %v89_v57  ;;  %v813_v5 = vsel %vm557_vm10, %v467_v61, %v685_v1  ;;  %v4730_v8 = vpack.c.bf16 %v812_v3, %v808_v2  ;;  %v814_v28 = vsel %vm558_vm11, %v203_v6, %v686_v16  ;;  %v4082_v57 = vld [vmem:[#allocation3 + $0x100] sm:$0xf]  ;;  %v4241_v1 = vld [vmem:[#allocation3 + $0x4] sm:$0xf0] }
  0xc5   :  { %v4732_v9 = vpack.c.bf16 %v813_v5, %v809_v4  ;;  %v815_v32 = vsel %vm559_vm12, %v292_v7, %v687_v17  ;;  %v4083_v0 = vor.u32 %v4273_v59, %v4082_v57  ;;  %v4146_v2 = vld [vmem:[#allocation3 + $0x180] sm:$0xf]  ;;  %v4289_v3 = vld [vmem:[#allocation3 + $0x184] sm:$0xf0]  ;;  %v3955_v6 = vor.u32 %v4241_v1, %v3954_v60 }
  0xc6   :  { %6080 = vst [vmem:[#allocation13_spill] sm:$0xff] %v4730_v8  ;;  %v380_v10 = vpop.f32.mrf.mxu2  ;;  %v4147_v7 = vor.u32 %v4289_v3, %v4146_v2 }
  0xc7   :  { %6081 = vst [vmem:[#allocation14_spill] sm:$0xff] %v4732_v9  ;;  %v469_v11 = vpop.f32.mrf.mxu3  ;;  %v204_v12 = vpop.f32.mrf.mxu0  ;;  %v381_v22 = vadd.f32 %v380_v10, %v4652_v52  ;;  %1557 = vmatpush.bf16.msrb.mxu2 %v4083_v0  ;;  %1379 = vmatpush.bf16.msrb.mxu0 %v3955_v6 }
  0xc8   :  { %v293_v15 = vpop.f32.mrf.mxu1  ;;  %v205_v18 = vadd.f32 %v204_v12, %v4642_v39  ;;  %v470_v23 = vadd.f32 %v469_v11, %v4654_v58  ;;  %1646 = vmatpush.bf16.msrb.mxu3 %v4147_v7 }
  0xc9   :  { %v294_v19 = vadd.f32 %v293_v15, %v4644_v42  ;;  %v688_v36 = vmul.f32 0.2, %v381_v22  ;;  %vm560_vm15 = vcmp.gt.f32.partialorder %v381_v22, 0.0 }
  0xca   :  { %vm562_vm13 = vcmp.gt.f32.partialorder %v205_v18, 0.0  ;;  %v690_v24 = vmul.f32 0.2, %v205_v18  ;;  %v689_v37 = vmul.f32 0.2, %v470_v23  ;;  %vm561_vm0 = vcmp.gt.f32.partialorder %v470_v23, 0.0 }
  0xcb   :  { %vm563_vm14 = vcmp.gt.f32.partialorder %v294_v19, 0.0  ;;  %v691_v25 = vmul.f32 0.2, %v294_v19  ;;  %v816_v51 = vsel %vm560_vm15, %v381_v22, %v688_v36 }
  0xcc   :  { %v818_v29 = vsel %vm562_vm13, %v205_v18, %v690_v24  ;;  %v817_v53 = vsel %vm561_vm0, %v470_v23, %v689_v37  ;;  %v72_v23 = vld [vmem:[%s6023_s0 + $0xd0] sm:$0xff] }
  0xcd   :  { %v819_v33 = vsel %vm563_vm14, %v294_v19, %v691_v25  ;;  %v4744_v34 = vpack.c.bf16 %v818_v29, %v814_v28  ;;  %v4018_v28 = vld [vmem:[#allocation3 + $0x80] sm:$0xf]  ;;  %v4257_v29 = vld [vmem:[#allocation3 + $0x84] sm:$0xf0] }
  0xce   :  { %v4746_v35 = vpack.c.bf16 %v819_v33, %v815_v32  ;;  %v382_v38 = vpop.f32.mrf.mxu2  ;;  %v4019_v33 = vor.u32 %v4257_v29, %v4018_v28 }
  0xcf   :  { %6082 = vst [vmem:[#allocation15_spill] sm:$0xff] %v4744_v34  ;;  %v471_v40 = vpop.f32.mrf.mxu3  ;;  %v383_v43 = vadd.f32 %v382_v38, %v4652_v52  ;;  %v207_v45 = vpop.f32.mrf.mxu0 }
  0xd0   :  { %6083 = vst [vmem:[#allocation16_spill] sm:$0xff] %v4746_v35  ;;  %v472_v44 = vadd.f32 %v471_v40, %v4654_v58  ;;  %v296_v46 = vpop.f32.mrf.mxu1  ;;  %v208_v54 = vadd.f32 %v207_v45, %v4642_v39  ;;  %1468 = vmatpush.bf16.msrb.mxu1 %v4019_v33 }
  0xd1   :  { %vm564_vm2 = vcmp.gt.f32.partialorder %v383_v43, 0.0  ;;  %v692_v47 = vmul.f32 0.2, %v383_v43  ;;  %v297_v63 = vadd.f32 %v296_v46, %v4644_v42  ;;  %v91_v46 = vpack.c.bf16 %v73_v27, %v72_v23 }
  0xd2   :  { %vm565_vm3 = vcmp.gt.f32.partialorder %v472_v44, 0.0  ;;  %v693_v48 = vmul.f32 0.2, %v472_v44  ;;  %3900 = vmatmul.msk.bf16.gmra.mxu0 %vm116_vm1, %v90_v41  ;;  %3916 = vmatmul.msk.bf16.gmra.mxu1 %vm116_vm1, %v90_v41  ;;  %v694_v12 = vmul.f32 0.2, %v208_v54  ;;  %vm566_vm4 = vcmp.gt.f32.partialorder %v208_v54, 0.0 }
  0xd3   :  { %3932 = vmatmul.msk.bf16.gmra.mxu2 %vm116_vm1, %v90_v41  ;;  %v820_v61 = vsel %vm564_vm2, %v383_v43, %v692_v47  ;;  %v695_v17 = vmul.f32 0.2, %v297_v63  ;;  %vm567_vm5 = vcmp.gt.f32.partialorder %v297_v63, 0.0 }
  0xd4   :  { %3948 = vmatmul.msk.bf16.gmra.mxu3 %vm116_vm1, %v90_v41  ;;  %v821_v62 = vsel %vm565_vm3, %v472_v44, %v693_v48  ;;  %v4756_v4 = vpack.c.bf16 %v820_v61, %v816_v51  ;;  %v822_v32 = vsel %vm566_vm4, %v208_v54, %v694_v12 }
  0xd5   :  { %v4758_v5 = vpack.c.bf16 %v821_v62, %v817_v53  ;;  %v823_v37 = vsel %vm567_vm5, %v297_v63, %v695_v17 }
  0xd6   :  { %6084 = vst [vmem:[#allocation17_spill] sm:$0xff] %v4756_v4  ;;  %v385_v10 = vpop.f32.mrf.mxu2 }
  0xd7   :  { %6085 = vst [vmem:[#allocation18_spill] sm:$0xff] %v4758_v5  ;;  %v474_v11 = vpop.f32.mrf.mxu3  ;;  %v209_v15 = vpop.f32.mrf.mxu0  ;;  %v386_v22 = vadd.f32 %v385_v10, %v4652_v52 }
  0xd8   :  { %v298_v16 = vpop.f32.mrf.mxu1  ;;  %v210_v18 = vadd.f32 %v209_v15, %v4642_v39  ;;  %v475_v26 = vadd.f32 %v474_v11, %v4654_v58 }
  0xd9   :  { %v299_v19 = vadd.f32 %v298_v16, %v4644_v42  ;;  %v696_v43 = vmul.f32 0.2, %v386_v22  ;;  %vm568_vm8 = vcmp.gt.f32.partialorder %v386_v22, 0.0 }
  0xda   :  { %vm570_vm6 = vcmp.gt.f32.partialorder %v210_v18, 0.0  ;;  %v698_v24 = vmul.f32 0.2, %v210_v18  ;;  %v697_v47 = vmul.f32 0.2, %v475_v26  ;;  %vm569_vm9 = vcmp.gt.f32.partialorder %v475_v26, 0.0 }
  0xdb   :  { %vm571_vm7 = vcmp.gt.f32.partialorder %v299_v19, 0.0  ;;  %v699_v25 = vmul.f32 0.2, %v299_v19  ;;  %v824_v60 = vsel %vm568_vm8, %v386_v22, %v696_v43 }
  0xdc   :  { %v826_v36 = vsel %vm570_vm6, %v210_v18, %v698_v24  ;;  %v825_v62 = vsel %vm569_vm9, %v475_v26, %v697_v47  ;;  %v74_v24 = vld [vmem:[%s6023_s0 + $0xe0] sm:$0xff] }
  0xdd   :  { %v827_v38 = vsel %vm571_vm7, %v299_v19, %v699_v25  ;;  %v4770_v40 = vpack.c.bf16 %v826_v36, %v822_v32  ;;  %v75_v25 = vld [vmem:[%s6023_s0 + $0xe8] sm:$0xff] }
  0xde   :  { %v4772_v41 = vpack.c.bf16 %v827_v38, %v823_v37  ;;  %v387_v44 = vpop.f32.mrf.mxu2 }
  0xdf   :  { %6086 = vst [vmem:[#allocation19_spill] sm:$0xff] %v4770_v40  ;;  %v476_v45 = vpop.f32.mrf.mxu3  ;;  %v388_v48 = vadd.f32 %v387_v44, %v4652_v52  ;;  %v212_v53 = vpop.f32.mrf.mxu0  ;;  %v92_v44 = vpack.c.bf16 %v75_v25, %v74_v24 }
  0xe0   :  { %6087 = vst [vmem:[#allocation20_spill] sm:$0xff] %v4772_v41  ;;  %v477_v51 = vadd.f32 %v476_v45, %v4654_v58  ;;  %v301_v54 = vpop.f32.mrf.mxu1  ;;  %v213_v0 = vadd.f32 %v212_v53, %v4642_v39 }
  0xe1   :  { %vm572_vm10 = vcmp.gt.f32.partialorder %v388_v48, 0.0  ;;  %v700_v57 = vmul.f32 0.2, %v388_v48  ;;  %v302_v1 = vadd.f32 %v301_v54, %v4644_v42 }
  0xe2   :  { %vm573_vm11 = vcmp.gt.f32.partialorder %v477_v51, 0.0  ;;  %v701_v59 = vmul.f32 0.2, %v477_v51  ;;  %3901 = vmatmul.msk.bf16.gmra.mxu0 %vm116_vm1, %v91_v46  ;;  %3917 = vmatmul.msk.bf16.gmra.mxu1 %vm116_vm1, %v91_v46  ;;  %v702_v12 = vmul.f32 0.2, %v213_v0  ;;  %vm574_vm12 = vcmp.gt.f32.partialorder %v213_v0, 0.0 }
  0xe3   :  { %3933 = vmatmul.msk.bf16.gmra.mxu2 %vm116_vm1, %v91_v46  ;;  %v828_v61 = vsel %vm572_vm10, %v388_v48, %v700_v57  ;;  %v703_v15 = vmul.f32 0.2, %v302_v1  ;;  %vm575_vm13 = vcmp.gt.f32.partialorder %v302_v1, 0.0 }
  0xe4   :  { %3949 = vmatmul.msk.bf16.gmra.mxu3 %vm116_vm1, %v91_v46  ;;  %v829_v63 = vsel %vm573_vm11, %v477_v51, %v701_v59  ;;  %v4782_v2 = vpack.c.bf16 %v828_v61, %v824_v60  ;;  %v830_v26 = vsel %vm574_vm12, %v213_v0, %v702_v12  ;;  %v4286_v60 = vld [vmem:[#allocation3 + $0x174] sm:$0xf]  ;;  %v4140_v61 = vld [vmem:[#allocation3 + $0x178] sm:$0xf0] }
  0xe5   :  { %v4784_v3 = vpack.c.bf16 %v829_v63, %v825_v62  ;;  %v831_v28 = vsel %vm575_vm13, %v302_v1, %v703_v15  ;;  %v4254_v62 = vld [vmem:[#allocation3 + $0x74] sm:$0xf] }
  0xe6   :  { %6088 = vst [vmem:[#allocation21_spill] sm:$0xff] %v4782_v2  ;;  %v390_v6 = vpop.f32.mrf.mxu2 }
  0xe7   :  { %6089 = vst [vmem:[#allocation22_spill] sm:$0xff] %v4784_v3  ;;  %v479_v7 = vpop.f32.mrf.mxu3  ;;  %v214_v10 = vpop.f32.mrf.mxu0  ;;  %v391_v18 = vadd.f32 %v390_v6, %v4652_v52  ;;  %v4143_v6 = vor.u32 %v4286_v60, %v4140_v61 }
  0xe8   :  { %v303_v11 = vpop.f32.mrf.mxu1  ;;  %v215_v16 = vadd.f32 %v214_v10, %v4642_v39  ;;  %v480_v19 = vadd.f32 %v479_v7, %v4654_v58  ;;  %v4012_v7 = vld [vmem:[#allocation3 + $0x78] sm:$0xf0]  ;;  %v4302_v10 = vld [vmem:[#allocation3 + $0x1f4] sm:$0xf] }
  0xe9   :  { %v304_v17 = vadd.f32 %v303_v11, %v4644_v42  ;;  %v704_v36 = vmul.f32 0.2, %v391_v18  ;;  %vm576_vm0 = vcmp.gt.f32.partialorder %v391_v18, 0.0  ;;  %v4204_v11 = vld [vmem:[#allocation3 + $0x1f8] sm:$0xf0]  ;;  %1906 = vmatpush.bf16.msra.mxu2 %v4143_v6 }
  0xea   :  { %vm578_vm14 = vcmp.gt.f32.partialorder %v215_v16, 0.0  ;;  %v706_v22 = vmul.f32 0.2, %v215_v16  ;;  %v705_v37 = vmul.f32 0.2, %v480_v19  ;;  %vm577_vm2 = vcmp.gt.f32.partialorder %v480_v19, 0.0 }
  0xeb   :  { %vm579_vm15 = vcmp.gt.f32.partialorder %v304_v17, 0.0  ;;  %v707_v23 = vmul.f32 0.2, %v304_v17  ;;  %v832_v54 = vsel %vm576_vm0, %v391_v18, %v704_v36 }
  0xec   :  { %v834_v27 = vsel %vm578_vm14, %v215_v16, %v706_v22  ;;  %v833_v57 = vsel %vm577_vm2, %v480_v19, %v705_v37  ;;  %v4015_v16 = vor.u32 %v4254_v62, %v4012_v7 }
  0xed   :  { %v835_v29 = vsel %vm579_vm15, %v304_v17, %v707_v23  ;;  %v4796_v32 = vpack.c.bf16 %v834_v27, %v830_v26  ;;  %v4207_v17 = vor.u32 %v4302_v10, %v4204_v11 }
  0xee   :  { %v4798_v33 = vpack.c.bf16 %v835_v29, %v831_v28  ;;  %v392_v38 = vpop.f32.mrf.mxu2  ;;  %1728 = vmatpush.bf16.msra.mxu0 %v4015_v16  ;;  %v76_v29 = vld [vmem:[%s6023_s0 + $0xf0] sm:$0xff] }
  0xef   :  { %6090 = vst [vmem:[#allocation23_spill] sm:$0xff] %v4796_v32  ;;  %v481_v43 = vpop.f32.mrf.mxu3  ;;  %v393_v45 = vadd.f32 %v392_v38, %v4652_v52  ;;  %v217_v47 = vpop.f32.mrf.mxu0  ;;  %1995 = vmatpush.bf16.msra.mxu3 %v4207_v17 }
  0xf0   :  { %6091 = vst [vmem:[#allocation24_spill] sm:$0xff] %v4798_v33  ;;  %v482_v46 = vadd.f32 %v481_v43, %v4654_v58  ;;  %v306_v48 = vpop.f32.mrf.mxu1  ;;  %v218_v59 = vadd.f32 %v217_v47, %v4642_v39  ;;  %v77_v43 = vld [vmem:[%s6023_s0 + $0xf8] sm:$0xff] }
  0xf1   :  { %vm580_vm3 = vcmp.gt.f32.partialorder %v393_v45, 0.0  ;;  %v708_v51 = vmul.f32 0.2, %v393_v45  ;;  %v307_v1 = vadd.f32 %v306_v48, %v4644_v42 }
  0xf2   :  { %vm581_vm4 = vcmp.gt.f32.partialorder %v482_v46, 0.0  ;;  %v709_v53 = vmul.f32 0.2, %v482_v46  ;;  %3902 = vmatmul.msk.bf16.gmra.mxu0 %vm116_vm1, %v92_v44  ;;  %3918 = vmatmul.msk.bf16.gmra.mxu1 %vm116_vm1, %v92_v44  ;;  %v710_v22 = vmul.f32 0.2, %v218_v59  ;;  %vm582_vm5 = vcmp.gt.f32.partialorder %v218_v59, 0.0 }
  0xf3   :  { %3934 = vmatmul.msk.bf16.gmra.mxu2 %vm116_vm1, %v92_v44  ;;  %v836_v63 = vsel %vm580_vm3, %v393_v45, %v708_v51  ;;  %v711_v25 = vmul.f32 0.2, %v307_v1  ;;  %vm583_vm6 = vcmp.gt.f32.partialorder %v307_v1, 0.0  ;;  %v4076_v45 = vld [vmem:[#allocation3 + $0xf8] sm:$0xf0] }
  0xf4   :  { %3950 = vmatmul.msk.bf16.gmra.mxu3 %vm116_vm1, %v92_v44  ;;  %v837_v0 = vsel %vm581_vm4, %v482_v46, %v709_v53  ;;  %v4808_v12 = vpack.c.bf16 %v836_v63, %v832_v54  ;;  %v4270_v44 = vld [vmem:[#allocation3 + $0xf4] sm:$0xf]  ;;  %v838_v46 = vsel %vm582_vm5, %v218_v59, %v710_v22  ;;  %v93_v63 = vpack.c.bf16 %v77_v43, %v76_v29 }
  0xf5   :  { %v4810_v15 = vpack.c.bf16 %v837_v0, %v833_v57  ;;  %v4079_v47 = vor.u32 %v4270_v44, %v4076_v45  ;;  %v839_v51 = vsel %vm583_vm6, %v307_v1, %v711_v25 }
  0xf6   :  { %6092 = vst [vmem:[#allocation25_spill] sm:$0xff] %v4808_v12  ;;  %v395_v18 = vpop.f32.mrf.mxu2 }
  0xf7   :  { %6093 = vst [vmem:[#allocation26_spill] sm:$0xff] %v4810_v15  ;;  %v484_v19 = vpop.f32.mrf.mxu3  ;;  %v219_v23 = vpop.f32.mrf.mxu0  ;;  %v396_v28 = vadd.f32 %v395_v18, %v4652_v52  ;;  %1817 = vmatpush.bf16.msra.mxu1 %v4079_v47 }
  0xf8   :  { %v308_v24 = vpop.f32.mrf.mxu1  ;;  %v220_v26 = vadd.f32 %v219_v23, %v4642_v39  ;;  %v485_v38 = vadd.f32 %v484_v19, %v4654_v58 }
  0xf9   :  { %v309_v27 = vadd.f32 %v308_v24, %v4644_v42  ;;  %v712_v60 = vmul.f32 0.2, %v396_v28  ;;  %vm584_vm9 = vcmp.gt.f32.partialorder %v396_v28, 0.0 }
  0xfa   :  { %vm586_vm7 = vcmp.gt.f32.partialorder %v220_v26, 0.0  ;;  %v714_v36 = vmul.f32 0.2, %v220_v26  ;;  %v713_v0 = vmul.f32 0.2, %v485_v38  ;;  %vm585_vm10 = vcmp.gt.f32.partialorder %v485_v38, 0.0 }
  0xfb   :  { %vm587_vm8 = vcmp.gt.f32.partialorder %v309_v27, 0.0  ;;  %v715_v37 = vmul.f32 0.2, %v309_v27  ;;  %v840_v16 = vsel %vm584_vm9, %v396_v28, %v712_v60 }
  0xfc   :  { %v842_v48 = vsel %vm586_vm7, %v220_v26, %v714_v36  ;;  %v841_v18 = vsel %vm585_vm10, %v485_v38, %v713_v0 }
  0xfd   :  { %v843_v53 = vsel %vm587_vm8, %v309_v27, %v715_v37  ;;  %v4822_v54 = vpack.c.bf16 %v842_v48, %v838_v46 }
  0xfe   :  { %v4824_v57 = vpack.c.bf16 %v843_v53, %v839_v51  ;;  %v397_v61 = vpop.f32.mrf.mxu2 }
  0xff   :  { %6094 = vst [vmem:[#allocation27_spill] sm:$0xff] %v4822_v54  ;;  %v486_v62 = vpop.f32.mrf.mxu3  ;;  %v398_v6 = vadd.f32 %v397_v61, %v4652_v52  ;;  %v222_v59 = vpop.f32.mrf.mxu0 }
 0x100   :  { %6095 = vst [vmem:[#allocation28_spill] sm:$0xff] %v4824_v57  ;;  %v487_v7 = vadd.f32 %v486_v62, %v4654_v58  ;;  %v311_v10 = vpop.f32.mrf.mxu1  ;;  %v223_v22 = vadd.f32 %v222_v59, %v4642_v39 }
 0x101   :  { %vm588_vm11 = vcmp.gt.f32.partialorder %v398_v6, 0.0  ;;  %v716_v1 = vmul.f32 0.2, %v398_v6  ;;  %v312_v23 = vadd.f32 %v311_v10, %v4644_v42 }
 0x102   :  { %vm589_vm12 = vcmp.gt.f32.partialorder %v487_v7, 0.0  ;;  %v717_v11 = vmul.f32 0.2, %v487_v7  ;;  %3903 = vmatmul.msk.bf16.gmra.mxu0 %vm116_vm1, %v93_v63  ;;  %3919 = vmatmul.msk.bf16.gmra.mxu1 %vm116_vm1, %v93_v63  ;;  %v718_v28 = vmul.f32 0.2, %v223_v22 }
 0x103   :  { %3935 = vmatmul.msk.bf16.gmra.mxu2 %vm116_vm1, %v93_v63  ;;  %v844_v17 = vsel %vm588_vm11, %v398_v6, %v716_v1  ;;  %v719_v37 = vmul.f32 0.2, %v312_v23  ;;  %vm591_vm13 = vcmp.gt.f32.partialorder %v312_v23, 0.0 }
 0x104   :  { %3951 = vmatmul.msk.bf16.gmra.mxu3 %vm116_vm1, %v93_v63  ;;  %v845_v19 = vsel %vm589_vm12, %v487_v7, %v717_v11  ;;  %v4834_v24 = vpack.c.bf16 %v844_v17, %v840_v16  ;;  %vm590_vm1 = vcmp.gt.f32.partialorder %v223_v22, 0.0 }
 0x105   :  { %v4836_v25 = vpack.c.bf16 %v845_v19, %v841_v18  ;;  %v846_v48 = vsel %vm590_vm1, %v223_v22, %v718_v28  ;;  %v847_v53 = vsel %vm591_vm13, %v312_v23, %v719_v37  ;;  %v4284_v23 = vld [vmem:[#allocation3 + $0x164] sm:$0xf] }
 0x106   :  { %6096 = vst [vmem:[#allocation29_spill] sm:$0xff] %v4834_v24  ;;  %v400_v26 = vpop.f32.mrf.mxu2 }
 0x107   :  { %6097 = vst [vmem:[#allocation30_spill] sm:$0xff] %v4836_v25  ;;  %v489_v27 = vpop.f32.mrf.mxu3  ;;  %v224_v29 = vpop.f32.mrf.mxu0  ;;  %v401_v38 = vadd.f32 %v400_v26, %v4652_v52  ;;  %v4132_v26 = vld [vmem:[#allocation3 + $0x168] sm:$0xf0] }
 0x108   :  { %v313_v36 = vpop.f32.mrf.mxu1  ;;  %v225_v43 = vadd.f32 %v224_v29, %v4642_v39  ;;  %v490_v45 = vadd.f32 %v489_v27, %v4654_v58  ;;  %v4252_v27 = vld [vmem:[#allocation3 + $0x64] sm:$0xf]  ;;  %v4135_v37 = vor.u32 %v4284_v23, %v4132_v26 }
 0x109   :  { %v314_v44 = vadd.f32 %v313_v36, %v4644_v42  ;;  %v720_v63 = vmul.f32 0.2, %v401_v38  ;;  %vm592_vm0 = vcmp.gt.f32.partialorder %v401_v38, 0.0 }
 0x10a   :  { %vm594_vm14 = vcmp.gt.f32.partialorder %v225_v43, 0.0  ;;  %v722_v46 = vmul.f32 0.2, %v225_v43  ;;  %v721_v0 = vmul.f32 0.2, %v490_v45  ;;  %vm593_vm2 = vcmp.gt.f32.partialorder %v490_v45, 0.0  ;;  %1907 = vmatpush.bf16.msra.mxu2 %v4135_v37 }
 0x10b   :  { %vm595_vm15 = vcmp.gt.f32.partialorder %v314_v44, 0.0  ;;  %v723_v47 = vmul.f32 0.2, %v314_v44  ;;  %v848_v18 = vsel %vm592_vm0, %v401_v38, %v720_v63 }
 0x10c   :  { %v850_v51 = vsel %vm594_vm14, %v225_v43, %v722_v46  ;;  %v849_v19 = vsel %vm593_vm2, %v490_v45, %v721_v0  ;;  %v4004_v43 = vld [vmem:[#allocation3 + $0x68] sm:$0xf0] }
 0x10d   :  { %v851_v60 = vsel %vm595_vm15, %v314_v44, %v723_v47  ;;  %v4842_v61 = vpack.c.bf16 %v850_v51, %v846_v48  ;;  %v4300_v44 = vld [vmem:[#allocation3 + $0x1e4] sm:$0xf]  ;;  %v4196_v46 = vld [vmem:[#allocation3 + $0x1e8] sm:$0xf0]  ;;  %v4007_v45 = vor.u32 %v4252_v27, %v4004_v43 }
 0x10e   :  { %v4844_v62 = vpack.c.bf16 %v851_v60, %v847_v53  ;;  %v402_v6 = vpop.f32.mrf.mxu2  ;;  %v4199_v48 = vor.u32 %v4300_v44, %v4196_v46 }
 0x10f   :  { %v491_v7 = vpop.f32.mrf.mxu3  ;;  %v403_v59 = vadd.f32 %v402_v6, %v4652_v52  ;;  %v227_v1 = vpop.f32.mrf.mxu0  ;;  %1729 = vmatpush.bf16.msra.mxu0 %v4007_v45 }
 0x110   :  { %v492_v10 = vadd.f32 %v491_v7, %v4654_v58  ;;  %v316_v11 = vpop.f32.mrf.mxu1  ;;  %v228_v22 = vadd.f32 %v227_v1, %v4642_v39  ;;  %1996 = vmatpush.bf16.msra.mxu3 %v4199_v48 }
 0x111   :  { %vm596_vm3 = vcmp.gt.f32.partialorder %v403_v59, 0.0  ;;  %v724_v16 = vmul.f32 0.2, %v403_v59  ;;  %v317_v28 = vadd.f32 %v316_v11, %v4644_v42 }
 0x112   :  { %vm597_vm4 = vcmp.gt.f32.partialorder %v492_v10, 0.0  ;;  %v725_v17 = vmul.f32 0.2, %v492_v10  ;;  %1380 = vmatmul.bf16.vlgmr.msrb.gmra.mxu0 %v4666_v13  ;;  %1469 = vmatmul.bf16.vlgmr.msrb.gmra.mxu1 %v4668_v14  ;;  %v726_v60 = vmul.f32 0.2, %v228_v22  ;;  %vm598_vm5 = vcmp.gt.f32.partialorder %v228_v22, 0.0 }
 0x113   :  { %1558 = vmatmul.bf16.vlgmr.msrb.gmra.mxu2 %v4676_v30  ;;  %v852_v29 = vsel %vm596_vm3, %v403_v59, %v724_v16  ;;  %v727_v6 = vmul.f32 0.2, %v317_v28  ;;  %vm599_vm6 = vcmp.gt.f32.partialorder %v317_v28, 0.0 }
 0x114   :  { %1647 = vmatmul.bf16.vlgmr.msrb.gmra.mxu3 %v4678_v31  ;;  %v853_v36 = vsel %vm597_vm4, %v492_v10, %v725_v17  ;;  %v4854_v47 = vpack.c.bf16 %v852_v29, %v848_v18  ;;  %v4268_v17 = vld [vmem:[#allocation3 + $0xe4] sm:$0xf]  ;;  %v4068_v18 = vld [vmem:[#allocation3 + $0xe8] sm:$0xf0] }
 0x115   :  { %v4856_v38 = vpack.c.bf16 %v853_v36, %v849_v19  ;;  %v854_v19 = vsel %vm598_vm5, %v228_v22, %v726_v60  ;;  %v4071_v23 = vor.u32 %v4268_v17, %v4068_v18  ;;  %v855_v27 = vsel %vm599_vm6, %v317_v28, %v727_v6 }
 0x116   :  { %v405_v51 = vpop.f32.mrf.mxu2 }
 0x117   :  { %6098 = vst [vmem:[#allocation31_spill] sm:$0xff] %v4856_v38  ;;  %v494_v53 = vpop.f32.mrf.mxu3  ;;  %v229_v63 = vpop.f32.mrf.mxu0  ;;  %v406_v10 = vadd.f32 %v405_v51, %v4652_v52  ;;  %1818 = vmatpush.bf16.msra.mxu1 %v4071_v23 }
 0x118   :  { %v318_v0 = vpop.f32.mrf.mxu1  ;;  %v230_v7 = vadd.f32 %v229_v63, %v4642_v39  ;;  %v495_v16 = vadd.f32 %v494_v53, %v4654_v58 }
 0x119   :  { %v319_v59 = vadd.f32 %v318_v0, %v4644_v42  ;;  %v728_v43 = vmul.f32 0.2, %v406_v10  ;;  %vm600_vm9 = vcmp.gt.f32.partialorder %v406_v10, 0.0 }
 0x11a   :  { %vm602_vm7 = vcmp.gt.f32.partialorder %v230_v7, 0.0  ;;  %v730_v1 = vmul.f32 0.2, %v230_v7  ;;  %v729_v45 = vmul.f32 0.2, %v495_v16  ;;  %vm601_vm10 = vcmp.gt.f32.partialorder %v495_v16, 0.0 }
 0x11b   :  { %vm603_vm8 = vcmp.gt.f32.partialorder %v319_v59, 0.0  ;;  %v731_v11 = vmul.f32 0.2, %v319_v59  ;;  %v856_v63 = vsel %vm600_vm9, %v406_v10, %v728_v43 }
 0x11c   :  { %v858_v26 = vsel %vm602_vm7, %v230_v7, %v730_v1  ;;  %v857_v6 = vsel %vm601_vm10, %v495_v16, %v729_v45 }
 0x11d   :  { %v859_v29 = vsel %vm603_vm8, %v319_v59, %v731_v11  ;;  %v4862_v36 = vpack.c.bf16 %v858_v26, %v854_v19 }
 0x11e   :  { %v4864_v37 = vpack.c.bf16 %v859_v29, %v855_v27  ;;  %v407_v44 = vpop.f32.mrf.mxu2 }
 0x11f   :  { %v496_v46 = vpop.f32.mrf.mxu3  ;;  %v408_v48 = vadd.f32 %v407_v44, %v4652_v52  ;;  %v232_v53 = vpop.f32.mrf.mxu0 }
 0x120   :  { %6099 = vst [vmem:[#allocation32_spill] sm:$0xff] %v4864_v37  ;;  %v497_v51 = vadd.f32 %v496_v46, %v4654_v58  ;;  %v321_v22 = vpop.f32.mrf.mxu1  ;;  %v233_v59 = vadd.f32 %v232_v53, %v4642_v39 }
 0x121   :  { %vm604_vm11 = vcmp.gt.f32.partialorder %v408_v48, 0.0  ;;  %v732_v28 = vmul.f32 0.2, %v408_v48  ;;  %v322_v1 = vadd.f32 %v321_v22, %v4644_v42 }
 0x122   :  { %vm605_vm12 = vcmp.gt.f32.partialorder %v497_v51, 0.0  ;;  %v733_v60 = vmul.f32 0.2, %v497_v51  ;;  %1385 = vmatmul.bf16.gmra.mxu0 %v4692_v55  ;;  %1474 = vmatmul.bf16.gmra.mxu1 %v4694_v56  ;;  %v734_v10 = vmul.f32 0.2, %v233_v59  ;;  %vm606_vm1 = vcmp.gt.f32.partialorder %v233_v59, 0.0 }
 0x123   :  { %1563 = vmatmul.bf16.gmra.mxu2 %v4704_v20  ;;  %v860_v0 = vsel %vm604_vm11, %v408_v48, %v732_v28  ;;  %v735_v27 = vmul.f32 0.2, %v322_v1  ;;  %vm607_vm13 = vcmp.gt.f32.partialorder %v322_v1, 0.0 }
 0x124   :  { %1652 = vmatmul.bf16.gmra.mxu3 %v4706_v21  ;;  %v861_v7 = vsel %vm605_vm12, %v497_v51, %v733_v60  ;;  %v4874_v11 = vpack.c.bf16 %v860_v0, %v856_v63  ;;  %v862_v48 = vsel %vm606_vm1, %v233_v59, %v734_v10 }
 0x125   :  { %v4876_v17 = vpack.c.bf16 %v861_v7, %v857_v6  ;;  %v863_v53 = vsel %vm607_vm13, %v322_v1, %v735_v27 }
 0x126   :  { %6100 = vst [vmem:[#allocation33_spill] sm:$0xff] %v4874_v11  ;;  %v410_v18 = vpop.f32.mrf.mxu2 }
 0x127   :  { %6101 = vst [vmem:[#allocation34_spill] sm:$0xff] %v4876_v17  ;;  %v499_v19 = vpop.f32.mrf.mxu3  ;;  %v234_v23 = vpop.f32.mrf.mxu0  ;;  %v411_v16 = vadd.f32 %v410_v18, %v4652_v52 }
 0x128   :  { %v323_v26 = vpop.f32.mrf.mxu1  ;;  %v235_v29 = vadd.f32 %v234_v23, %v4642_v39  ;;  %v500_v44 = vadd.f32 %v499_v19, %v4654_v58 }
 0x129   :  { %v324_v43 = vadd.f32 %v323_v26, %v4644_v42  ;;  %v736_v63 = vmul.f32 0.2, %v411_v16  ;;  %vm608_vm0 = vcmp.gt.f32.partialorder %v411_v16, 0.0 }
 0x12a   :  { %vm610_vm14 = vcmp.gt.f32.partialorder %v235_v29, 0.0  ;;  %v738_v46 = vmul.f32 0.2, %v235_v29  ;;  %v737_v0 = vmul.f32 0.2, %v500_v44  ;;  %vm609_vm2 = vcmp.gt.f32.partialorder %v500_v44, 0.0 }
 0x12b   :  { %vm611_vm15 = vcmp.gt.f32.partialorder %v324_v43, 0.0  ;;  %v739_v45 = vmul.f32 0.2, %v324_v43  ;;  %v864_v10 = vsel %vm608_vm0, %v411_v16, %v736_v63 }
 0x12c   :  { %v866_v51 = vsel %vm610_vm14, %v235_v29, %v738_v46  ;;  %v865_v27 = vsel %vm609_vm2, %v500_v44, %v737_v0  ;;  %v4124_v46 = vld [vmem:[#allocation3 + $0x158] sm:$0xf0] }
 0x12d   :  { %v867_v22 = vsel %vm611_vm15, %v324_v43, %v739_v45  ;;  %v4882_v28 = vpack.c.bf16 %v866_v51, %v862_v48  ;;  %v4282_v43 = vld [vmem:[#allocation3 + $0x154] sm:$0xf] }
 0x12e   :  { %v4884_v60 = vpack.c.bf16 %v867_v22, %v863_v53  ;;  %v412_v6 = vpop.f32.mrf.mxu2  ;;  %v4250_v45 = vld [vmem:[#allocation3 + $0x54] sm:$0xf]  ;;  %v4127_v22 = vor.u32 %v4282_v43, %v4124_v46  ;;  %v4060_v43 = vld [vmem:[#allocation3 + $0xd8] sm:$0xf0] }
 0x12f   :  { %v501_v7 = vpop.f32.mrf.mxu3  ;;  %v413_v18 = vadd.f32 %v412_v6, %v4652_v52  ;;  %v237_v23 = vpop.f32.mrf.mxu0  ;;  %v3996_v6 = vld [vmem:[#allocation3 + $0x58] sm:$0xf0] }
 0x130   :  { %v502_v19 = vadd.f32 %v501_v7, %v4654_v58  ;;  %v326_v26 = vpop.f32.mrf.mxu1  ;;  %v238_v29 = vadd.f32 %v237_v23, %v4642_v39  ;;  %v4298_v7 = vld [vmem:[#allocation3 + $0x1d4] sm:$0xf]  ;;  %v3999_v44 = vor.u32 %v4250_v45, %v3996_v6  ;;  %1908 = vmatpush.bf16.msra.mxu2 %v4127_v22 }
 0x131   :  { %vm612_vm3 = vcmp.gt.f32.partialorder %v413_v18, 0.0  ;;  %v740_v59 = vmul.f32 0.2, %v413_v18  ;;  %v327_v53 = vadd.f32 %v326_v26, %v4644_v42 }
 0x132   :  { %vm613_vm4 = vcmp.gt.f32.partialorder %v502_v19, 0.0  ;;  %v741_v1 = vmul.f32 0.2, %v502_v19  ;;  %1390 = vmatmul.bf16.gmra.mxu0 %v4718_v49  ;;  %1479 = vmatmul.bf16.gmra.mxu1 %v4720_v50  ;;  %v4188_v49 = vld [vmem:[#allocation3 + $0x1d8] sm:$0xf0]  ;;  %vm614_vm5 = vcmp.gt.f32.partialorder %v238_v29, 0.0 }
 0x133   :  { %1568 = vmatmul.bf16.gmra.mxu2 %v4730_v8  ;;  %v868_v48 = vsel %vm612_vm3, %v413_v18, %v740_v59  ;;  %v4191_v63 = vor.u32 %v4298_v7, %v4188_v49  ;;  %1730 = vmatpush.bf16.msra.mxu0 %v3999_v44  ;;  %v743_v18 = vmul.f32 0.2, %v327_v53  ;;  %vm615_vm6 = vcmp.gt.f32.partialorder %v327_v53, 0.0 }
 0x134   :  { %1657 = vmatmul.bf16.gmra.mxu3 %v4732_v9  ;;  %v869_v51 = vsel %vm613_vm4, %v502_v19, %v741_v1  ;;  %v4894_v50 = vpack.c.bf16 %v868_v48, %v864_v10  ;;  %v742_v9 = vmul.f32 0.2, %v238_v29 }
 0x135   :  { %v4896_v16 = vpack.c.bf16 %v869_v51, %v865_v27  ;;  %1997 = vmatpush.bf16.msra.mxu3 %v4191_v63  ;;  %v4266_v27 = vld [vmem:[#allocation3 + $0xd4] sm:$0xf]  ;;  %v871_v51 = vsel %vm615_vm6, %v327_v53, %v743_v18 }
 0x136   :  { %v415_v0 = vpop.f32.mrf.mxu2  ;;  %v870_v46 = vsel %vm614_vm5, %v238_v29, %v742_v9  ;;  %v4063_v45 = vor.u32 %v4266_v27, %v4060_v43 }
 0x137   :  { %v504_v23 = vpop.f32.mrf.mxu3  ;;  %v239_v8 = vpop.f32.mrf.mxu0  ;;  %v416_v59 = vadd.f32 %v415_v0, %v4652_v52 }
 0x138   :  { %v328_v21 = vpop.f32.mrf.mxu1  ;;  %v240_v19 = vadd.f32 %v239_v8, %v4642_v39  ;;  %v505_v10 = vadd.f32 %v504_v23, %v4654_v58  ;;  %1819 = vmatpush.bf16.msra.mxu1 %v4063_v45 }
 0x139   :  { %v329_v26 = vadd.f32 %v328_v21, %v4644_v42  ;;  %v744_v21 = vmul.f32 0.2, %v416_v59  ;;  %vm616_vm9 = vcmp.gt.f32.partialorder %v416_v59, 0.0 }
 0x13a   :  { %vm618_vm7 = vcmp.gt.f32.partialorder %v240_v19, 0.0  ;;  %v746_v1 = vmul.f32 0.2, %v240_v19  ;;  %v745_v63 = vmul.f32 0.2, %v505_v10  ;;  %vm617_vm10 = vcmp.gt.f32.partialorder %v505_v10, 0.0 }
 0x13b   :  { %vm619_vm8 = vcmp.gt.f32.partialorder %v329_v26, 0.0  ;;  %v747_v49 = vmul.f32 0.2, %v329_v26  ;;  %v872_v18 = vsel %vm616_vm9, %v416_v59, %v744_v21 }
 0x13c   :  { %v874_v48 = vsel %vm618_vm7, %v240_v19, %v746_v1 }
 0x13d   :  { %v875_v22 = vsel %vm619_vm8, %v329_v26, %v747_v49  ;;  %v4902_v6 = vpack.c.bf16 %v874_v48, %v870_v46  ;;  %v873_v26 = vsel %vm617_vm10, %v505_v10, %v745_v63 }
 0x13e   :  { %v4904_v8 = vpack.c.bf16 %v875_v22, %v871_v51  ;;  %v417_v7 = vpop.f32.mrf.mxu2 }
 0x13f   :  { %v506_v44 = vpop.f32.mrf.mxu3  ;;  %v418_v0 = vadd.f32 %v417_v7, %v4652_v52  ;;  %v242_v20 = vpop.f32.mrf.mxu0 }
 0x140   :  { %v507_v23 = vadd.f32 %v506_v44, %v4654_v58  ;;  %v331_v9 = vpop.f32.mrf.mxu1  ;;  %v243_v49 = vadd.f32 %v242_v20, %v4642_v39 }
 0x141   :  { %vm620_vm11 = vcmp.gt.f32.partialorder %v418_v0, 0.0  ;;  %v748_v29 = vmul.f32 0.2, %v418_v0  ;;  %v332_v27 = vadd.f32 %v331_v9, %v4644_v42 }
 0x142   :  { %vm621_vm12 = vcmp.gt.f32.partialorder %v507_v23, 0.0  ;;  %v749_v53 = vmul.f32 0.2, %v507_v23  ;;  %1395 = vmatmul.bf16.gmra.mxu0 %v4744_v34  ;;  %1484 = vmatmul.bf16.gmra.mxu1 %v4746_v35  ;;  %v750_v59 = vmul.f32 0.2, %v243_v49  ;;  %vm622_vm1 = vcmp.gt.f32.partialorder %v243_v49, 0.0 }
 0x143   :  { %1573 = vmatmul.bf16.gmra.mxu2 %v4756_v4  ;;  %v876_v19 = vsel %vm620_vm11, %v418_v0, %v748_v29  ;;  %v751_v21 = vmul.f32 0.2, %v332_v27  ;;  %vm623_vm13 = vcmp.gt.f32.partialorder %v332_v27, 0.0 }
 0x144   :  { %1662 = vmatmul.bf16.gmra.mxu3 %v4758_v5  ;;  %v877_v1 = vsel %vm621_vm12, %v507_v23, %v749_v53  ;;  %v4914_v43 = vpack.c.bf16 %v876_v19, %v872_v18  ;;  %v878_v23 = vsel %vm622_vm1, %v243_v49, %v750_v59 }
 0x145   :  { %v4916_v46 = vpack.c.bf16 %v877_v1, %v873_v26  ;;  %v879_v29 = vsel %vm623_vm13, %v332_v27, %v751_v21 }
 0x146   :  { %v420_v45 = vpop.f32.mrf.mxu2 }
 0x147   :  { %6102 = vst [vmem:[#allocation35_spill] sm:$0xff] %v4916_v46  ;;  %v509_v48 = vpop.f32.mrf.mxu3  ;;  %v244_v51 = vpop.f32.mrf.mxu0  ;;  %v421_v20 = vadd.f32 %v420_v45, %v4652_v52 }
 0x148   :  { %v333_v22 = vpop.f32.mrf.mxu1  ;;  %v245_v7 = vadd.f32 %v244_v51, %v4642_v39  ;;  %v510_v10 = vadd.f32 %v509_v48, %v4654_v58 }
 0x149   :  { %v334_v44 = vadd.f32 %v333_v22, %v4644_v42  ;;  %v752_v26 = vmul.f32 0.2, %v421_v20  ;;  %vm624_vm0 = vcmp.gt.f32.partialorder %v421_v20, 0.0 }
 0x14a   :  { %vm626_vm14 = vcmp.gt.f32.partialorder %v245_v7, 0.0  ;;  %v754_v63 = vmul.f32 0.2, %v245_v7  ;;  %v753_v1 = vmul.f32 0.2, %v510_v10  ;;  %vm625_vm2 = vcmp.gt.f32.partialorder %v510_v10, 0.0 }
 0x14b   :  { %vm627_vm15 = vcmp.gt.f32.partialorder %v334_v44, 0.0  ;;  %v755_v0 = vmul.f32 0.2, %v334_v44  ;;  %v880_v59 = vsel %vm624_vm0, %v421_v20, %v752_v26 }
 0x14c   :  { %v882_v9 = vsel %vm626_vm14, %v245_v7, %v754_v63  ;;  %v881_v21 = vsel %vm625_vm2, %v510_v10, %v753_v1  ;;  %v4116_v63 = vld [vmem:[#allocation3 + $0x148] sm:$0xf0] }
 0x14d   :  { %v883_v53 = vsel %vm627_vm15, %v334_v44, %v755_v0  ;;  %v4922_v18 = vpack.c.bf16 %v882_v9, %v878_v23  ;;  %v4280_v44 = vld [vmem:[#allocation3 + $0x144] sm:$0xf] }
 0x14e   :  { %v4924_v19 = vpack.c.bf16 %v883_v53, %v879_v29  ;;  %v422_v51 = vpop.f32.mrf.mxu2  ;;  %v4248_v0 = vld [vmem:[#allocation3 + $0x44] sm:$0xf]  ;;  %v4119_v53 = vor.u32 %v4280_v44, %v4116_v63  ;;  %v4052_v44 = vld [vmem:[#allocation3 + $0xc8] sm:$0xf0] }
 0x14f   :  { %v511_v22 = vpop.f32.mrf.mxu3  ;;  %v423_v45 = vadd.f32 %v422_v51, %v4652_v52  ;;  %v247_v5 = vpop.f32.mrf.mxu0  ;;  %v3988_v51 = vld [vmem:[#allocation3 + $0x48] sm:$0xf0] }
 0x150   :  { %v512_v48 = vadd.f32 %v511_v22, %v4654_v58  ;;  %v336_v4 = vpop.f32.mrf.mxu1  ;;  %v248_v7 = vadd.f32 %v247_v5, %v4642_v39  ;;  %v4296_v22 = vld [vmem:[#allocation3 + $0x1c4] sm:$0xf]  ;;  %v3991_v5 = vor.u32 %v4248_v0, %v3988_v51  ;;  %1909 = vmatpush.bf16.msra.mxu2 %v4119_v53 }
 0x151   :  { %vm628_vm3 = vcmp.gt.f32.partialorder %v423_v45, 0.0  ;;  %v756_v49 = vmul.f32 0.2, %v423_v45  ;;  %v337_v29 = vadd.f32 %v336_v4, %v4644_v42 }
 0x152   :  { %vm629_vm4 = vcmp.gt.f32.partialorder %v512_v48, 0.0  ;;  %v757_v27 = vmul.f32 0.2, %v512_v48  ;;  %1400 = vmatmul.bf16.gmra.mxu0 %v4770_v40  ;;  %1489 = vmatmul.bf16.gmra.mxu1 %v4772_v41  ;;  %v4180_v40 = vld [vmem:[#allocation3 + $0x1c8] sm:$0xf0]  ;;  %vm630_vm5 = vcmp.gt.f32.partialorder %v248_v7, 0.0 }
 0x153   :  { %1578 = vmatmul.bf16.gmra.mxu2 %v4782_v2  ;;  %v884_v23 = vsel %vm628_vm3, %v423_v45, %v756_v49  ;;  %v4183_v10 = vor.u32 %v4296_v22, %v4180_v40  ;;  %1731 = vmatpush.bf16.msra.mxu0 %v3991_v5  ;;  %v759_v4 = vmul.f32 0.2, %v337_v29  ;;  %vm631_vm6 = vcmp.gt.f32.partialorder %v337_v29, 0.0 }
 0x154   :  { %1667 = vmatmul.bf16.gmra.mxu3 %v4784_v3  ;;  %v885_v9 = vsel %vm629_vm4, %v512_v48, %v757_v27  ;;  %v4934_v41 = vpack.c.bf16 %v884_v23, %v880_v59  ;;  %v758_v3 = vmul.f32 0.2, %v248_v7 }
 0x155   :  { %v4936_v20 = vpack.c.bf16 %v885_v9, %v881_v21  ;;  %1998 = vmatpush.bf16.msra.mxu3 %v4183_v10  ;;  %v4264_v21 = vld [vmem:[#allocation3 + $0xc4] sm:$0xf]  ;;  %v887_v9 = vsel %vm631_vm6, %v337_v29, %v759_v4 }
 0x156   :  { %v425_v26 = vpop.f32.mrf.mxu2  ;;  %v886_v63 = vsel %vm630_vm5, %v248_v7, %v758_v3  ;;  %v4055_v0 = vor.u32 %v4264_v21, %v4052_v44 }
 0x157   :  { %v514_v1 = vpop.f32.mrf.mxu3  ;;  %v249_v2 = vpop.f32.mrf.mxu0  ;;  %v426_v49 = vadd.f32 %v425_v26, %v4652_v52 }
 0x158   :  { %v338_v35 = vpop.f32.mrf.mxu1  ;;  %v250_v45 = vadd.f32 %v249_v2, %v4642_v39  ;;  %v515_v59 = vadd.f32 %v514_v1, %v4654_v58  ;;  %1820 = vmatpush.bf16.msra.mxu1 %v4055_v0 }
 0x159   :  { %v339_v48 = vadd.f32 %v338_v35, %v4644_v42  ;;  %v760_v35 = vmul.f32 0.2, %v426_v49  ;;  %vm632_vm9 = vcmp.gt.f32.partialorder %v426_v49, 0.0 }
 0x15a   :  { %vm634_vm7 = vcmp.gt.f32.partialorder %v250_v45, 0.0  ;;  %v762_v27 = vmul.f32 0.2, %v250_v45  ;;  %v761_v10 = vmul.f32 0.2, %v515_v59  ;;  %vm633_vm10 = vcmp.gt.f32.partialorder %v515_v59, 0.0 }
 0x15b   :  { %vm635_vm8 = vcmp.gt.f32.partialorder %v339_v48, 0.0  ;;  %v763_v40 = vmul.f32 0.2, %v339_v48  ;;  %v888_v4 = vsel %vm632_vm9, %v426_v49, %v760_v35 }
 0x15c   :  { %v890_v23 = vsel %vm634_vm7, %v250_v45, %v762_v27 }
 0x15d   :  { %v891_v53 = vsel %vm635_vm8, %v339_v48, %v763_v40  ;;  %v4942_v51 = vpack.c.bf16 %v890_v23, %v886_v63  ;;  %v889_v48 = vsel %vm633_vm10, %v515_v59, %v761_v10 }
 0x15e   :  { %v4944_v2 = vpack.c.bf16 %v891_v53, %v887_v9  ;;  %v427_v22 = vpop.f32.mrf.mxu2 }
 0x15f   :  { %6103 = vst [vmem:[#allocation36_spill] sm:$0xff] %v4942_v51  ;;  %v516_v5 = vpop.f32.mrf.mxu3  ;;  %v428_v26 = vadd.f32 %v427_v22, %v4652_v52  ;;  %v252_v34 = vpop.f32.mrf.mxu0 }
 0x160   :  { %6104 = vst [vmem:[#allocation37_spill] sm:$0xff] %v4944_v2  ;;  %v517_v1 = vadd.f32 %v516_v5, %v4654_v58  ;;  %v341_v3 = vpop.f32.mrf.mxu1  ;;  %v253_v40 = vadd.f32 %v252_v34, %v4642_v39 }
 0x161   :  { %vm636_vm11 = vcmp.gt.f32.partialorder %v428_v26, 0.0  ;;  %v764_v7 = vmul.f32 0.2, %v428_v26  ;;  %v342_v21 = vadd.f32 %v341_v3, %v4644_v42 }
 0x162   :  { %vm637_vm12 = vcmp.gt.f32.partialorder %v517_v1, 0.0  ;;  %v765_v29 = vmul.f32 0.2, %v517_v1  ;;  %1405 = vmatmul.bf16.gmra.mxu0 %v4796_v32  ;;  %1494 = vmatmul.bf16.gmra.mxu1 %v4798_v33  ;;  %v766_v49 = vmul.f32 0.2, %v253_v40  ;;  %vm638_vm1 = vcmp.gt.f32.partialorder %v253_v40, 0.0 }
 0x163   :  { %1583 = vmatmul.bf16.gmra.mxu2 %v4808_v12  ;;  %v892_v45 = vsel %vm636_vm11, %v428_v26, %v764_v7  ;;  %v767_v35 = vmul.f32 0.2, %v342_v21  ;;  %vm639_vm13 = vcmp.gt.f32.partialorder %v342_v21, 0.0 }
 0x164   :  { %1672 = vmatmul.bf16.gmra.mxu3 %v4810_v15  ;;  %v893_v27 = vsel %vm637_vm12, %v517_v1, %v765_v29  ;;  %v4954_v44 = vpack.c.bf16 %v892_v45, %v888_v4  ;;  %v894_v1 = vsel %vm638_vm1, %v253_v40, %v766_v49 }
 0x165   :  { %v4956_v63 = vpack.c.bf16 %v893_v27, %v889_v48  ;;  %v895_v7 = vsel %vm639_vm13, %v342_v21, %v767_v35 }
 0x166   :  { %6105 = vst [vmem:[#allocation38_spill] sm:$0xff] %v4954_v44  ;;  %v430_v0 = vpop.f32.mrf.mxu2 }
 0x167   :  { %6106 = vst [vmem:[#allocation39_spill] sm:$0xff] %v4956_v63  ;;  %v519_v23 = vpop.f32.mrf.mxu3  ;;  %v254_v9 = vpop.f32.mrf.mxu0  ;;  %v431_v34 = vadd.f32 %v430_v0, %v4652_v52 }
 0x168   :  { %v343_v53 = vpop.f32.mrf.mxu1  ;;  %v255_v22 = vadd.f32 %v254_v9, %v4642_v39  ;;  %v520_v59 = vadd.f32 %v519_v23, %v4654_v58 }
 0x169   :  { %v344_v5 = vadd.f32 %v343_v53, %v4644_v42  ;;  %v768_v48 = vmul.f32 0.2, %v431_v34  ;;  %vm640_vm0 = vcmp.gt.f32.partialorder %v431_v34, 0.0 }
 0x16a   :  { %vm642_vm14 = vcmp.gt.f32.partialorder %v255_v22, 0.0  ;;  %v770_v10 = vmul.f32 0.2, %v255_v22  ;;  %v769_v27 = vmul.f32 0.2, %v520_v59  ;;  %vm641_vm2 = vcmp.gt.f32.partialorder %v520_v59, 0.0 }
 0x16b   :  { %vm643_vm15 = vcmp.gt.f32.partialorder %v344_v5, 0.0  ;;  %v771_v26 = vmul.f32 0.2, %v344_v5  ;;  %v896_v49 = vsel %vm640_vm0, %v431_v34, %v768_v48 }
 0x16c   :  { %v898_v3 = vsel %vm642_vm14, %v255_v22, %v770_v10  ;;  %v897_v35 = vsel %vm641_vm2, %v520_v59, %v769_v27  ;;  %v4108_v10 = vld [vmem:[#allocation3 + $0x138] sm:$0xf0] }
 0x16d   :  { %v899_v29 = vsel %vm643_vm15, %v344_v5, %v771_v26  ;;  %v4962_v4 = vpack.c.bf16 %v898_v3, %v894_v1  ;;  %v4278_v5 = vld [vmem:[#allocation3 + $0x134] sm:$0xf] }
 0x16e   :  { %v4964_v45 = vpack.c.bf16 %v899_v29, %v895_v7  ;;  %v432_v9 = vpop.f32.mrf.mxu2  ;;  %v4246_v26 = vld [vmem:[#allocation3 + $0x34] sm:$0xf]  ;;  %v4111_v29 = vor.u32 %v4278_v5, %v4108_v10  ;;  %v4044_v5 = vld [vmem:[#allocation3 + $0xb8] sm:$0xf0] }
 0x16f   :  { %v521_v53 = vpop.f32.mrf.mxu3  ;;  %v433_v0 = vadd.f32 %v432_v9, %v4652_v52  ;;  %v257_v15 = vpop.f32.mrf.mxu0  ;;  %v3980_v9 = vld [vmem:[#allocation3 + $0x38] sm:$0xf0] }
 0x170   :  { %v522_v23 = vadd.f32 %v521_v53, %v4654_v58  ;;  %v346_v12 = vpop.f32.mrf.mxu1  ;;  %v258_v22 = vadd.f32 %v257_v15, %v4642_v39  ;;  %v4294_v53 = vld [vmem:[#allocation3 + $0x1b4] sm:$0xf]  ;;  %v3983_v15 = vor.u32 %v4246_v26, %v3980_v9  ;;  %1910 = vmatpush.bf16.msra.mxu2 %v4111_v29 }
 0x171   :  { %vm644_vm3 = vcmp.gt.f32.partialorder %v433_v0, 0.0  ;;  %v772_v40 = vmul.f32 0.2, %v433_v0  ;;  %v347_v7 = vadd.f32 %v346_v12, %v4644_v42 }
 0x172   :  { %vm645_vm4 = vcmp.gt.f32.partialorder %v522_v23, 0.0  ;;  %v773_v21 = vmul.f32 0.2, %v522_v23  ;;  %1410 = vmatmul.bf16.gmra.mxu0 %v4822_v54  ;;  %1499 = vmatmul.bf16.gmra.mxu1 %v4824_v57  ;;  %v4172_v54 = vld [vmem:[#allocation3 + $0x1b8] sm:$0xf0]  ;;  %vm646_vm5 = vcmp.gt.f32.partialorder %v258_v22, 0.0 }
 0x173   :  { %1588 = vmatmul.bf16.gmra.mxu2 %v4834_v24  ;;  %v900_v1 = vsel %vm644_vm3, %v433_v0, %v772_v40  ;;  %v4175_v59 = vor.u32 %v4294_v53, %v4172_v54  ;;  %1732 = vmatpush.bf16.msra.mxu0 %v3983_v15  ;;  %v775_v12 = vmul.f32 0.2, %v347_v7  ;;  %vm647_vm6 = vcmp.gt.f32.partialorder %v347_v7, 0.0 }
 0x174   :  { %1677 = vmatmul.bf16.gmra.mxu3 %v4836_v25  ;;  %v901_v3 = vsel %vm645_vm4, %v522_v23, %v773_v21  ;;  %v4974_v57 = vpack.c.bf16 %v900_v1, %v896_v49  ;;  %v774_v25 = vmul.f32 0.2, %v258_v22 }
 0x175   :  { %v4976_v34 = vpack.c.bf16 %v901_v3, %v897_v35  ;;  %1999 = vmatpush.bf16.msra.mxu3 %v4175_v59  ;;  %v4262_v35 = vld [vmem:[#allocation3 + $0xb4] sm:$0xf]  ;;  %v903_v3 = vsel %vm647_vm6, %v347_v7, %v775_v12 }
 0x176   :  { %v435_v48 = vpop.f32.mrf.mxu2  ;;  %v902_v10 = vsel %vm646_vm5, %v258_v22, %v774_v25  ;;  %v4047_v26 = vor.u32 %v4262_v35, %v4044_v5 }
 0x177   :  { %v524_v27 = vpop.f32.mrf.mxu3  ;;  %v259_v24 = vpop.f32.mrf.mxu0  ;;  %v436_v40 = vadd.f32 %v435_v48, %v4652_v52 }
 0x178   :  { %v348_v33 = vpop.f32.mrf.mxu1  ;;  %v260_v0 = vadd.f32 %v259_v24, %v4642_v39  ;;  %v525_v49 = vadd.f32 %v524_v27, %v4654_v58  ;;  %1821 = vmatpush.bf16.msra.mxu1 %v4047_v26 }
 0x179   :  { %v349_v23 = vadd.f32 %v348_v33, %v4644_v42  ;;  %v776_v33 = vmul.f32 0.2, %v436_v40  ;;  %vm648_vm9 = vcmp.gt.f32.partialorder %v436_v40, 0.0 }
 0x17a   :  { %vm650_vm7 = vcmp.gt.f32.partialorder %v260_v0, 0.0  ;;  %v778_v21 = vmul.f32 0.2, %v260_v0  ;;  %v777_v59 = vmul.f32 0.2, %v525_v49  ;;  %vm649_vm10 = vcmp.gt.f32.partialorder %v525_v49, 0.0 }
 0x17b   :  { %vm651_vm8 = vcmp.gt.f32.partialorder %v349_v23, 0.0  ;;  %v779_v54 = vmul.f32 0.2, %v349_v23  ;;  %v904_v12 = vsel %vm648_vm9, %v436_v40, %v776_v33 }
 0x17c   :  { %v906_v1 = vsel %vm650_vm7, %v260_v0, %v778_v21 }
 0x17d   :  { %v907_v29 = vsel %vm651_vm8, %v349_v23, %v779_v54  ;;  %v4982_v9 = vpack.c.bf16 %v906_v1, %v902_v10  ;;  %v905_v23 = vsel %vm649_vm10, %v525_v49, %v777_v59 }
 0x17e   :  { %v4984_v24 = vpack.c.bf16 %v907_v29, %v903_v3  ;;  %v437_v53 = vpop.f32.mrf.mxu2 }
 0x17f   :  { %v526_v15 = vpop.f32.mrf.mxu3  ;;  %v438_v48 = vadd.f32 %v437_v53, %v4652_v52  ;;  %v262_v32 = vpop.f32.mrf.mxu0 }
 0x180   :  { %v527_v27 = vadd.f32 %v526_v15, %v4654_v58  ;;  %v351_v25 = vpop.f32.mrf.mxu1  ;;  %v263_v54 = vadd.f32 %v262_v32, %v4642_v39  ;;  %v5003_v32 = vld [vmem:[%s6027_s4] sm:$0x3] }
 0x181   :  { %vm652_vm11 = vcmp.gt.f32.partialorder %v438_v48, 0.0  ;;  %v780_v22 = vmul.f32 0.2, %v438_v48  ;;  %v352_v35 = vadd.f32 %v351_v25, %v4644_v42  ;;  %6107 = vst [vmem:[#allocation40_spill] sm:$0xff] %v5003_v32  ;;  %v5008_v25 = vperm.slane %v5003_v32, 0 }
 0x182   :  { %vm653_vm12 = vcmp.gt.f32.partialorder %v527_v27, 0.0  ;;  %v781_v7 = vmul.f32 0.2, %v527_v27  ;;  %1415 = vmatmul.bf16.gmra.mxu0 %v4842_v61  ;;  %1504 = vmatmul.bf16.gmra.mxu1 %v4844_v62  ;;  %v782_v40 = vmul.f32 0.2, %v263_v54  ;;  %vm654_vm1 = vcmp.gt.f32.partialorder %v263_v54, 0.0 }
 0x183   :  { %1593 = vmatmul.bf16.gmra.mxu2 %v4854_v47  ;;  %v908_v0 = vsel %vm652_vm11, %v438_v48, %v780_v22  ;;  %v783_v33 = vmul.f32 0.2, %v352_v35  ;;  %vm655_vm13 = vcmp.gt.f32.partialorder %v352_v35, 0.0 }
 0x184   :  { %1682 = vmatmul.bf16.gmra.mxu3 %v4856_v38  ;;  %v909_v21 = vsel %vm653_vm12, %v527_v27, %v781_v7  ;;  %v4994_v5 = vpack.c.bf16 %v908_v0, %v904_v12 }
 0x185   :  { %v4996_v10 = vpack.c.bf16 %v909_v21, %v905_v23  ;;  %v911_v22 = vsel %vm655_vm13, %v352_v35, %v783_v33 }
 0x186   :  { %v440_v26 = vpop.f32.mrf.mxu2 }
 0x187   :  { %v529_v1 = vpop.f32.mrf.mxu3  ;;  %v264_v3 = vpop.f32.mrf.mxu0  ;;  %v441_v49 = vadd.f32 %v440_v26, %v4652_v52 }
 0x188   :  { %v353_v29 = vpop.f32.mrf.mxu1  ;;  %v265_v53 = vadd.f32 %v264_v3, %v4642_v39  ;;  %v530_v27 = vadd.f32 %v529_v1, %v4654_v58  ;;  %v910_v39 = vsel %vm654_vm1, %v263_v54, %v782_v40 }
 0x189   :  { %v354_v15 = vadd.f32 %v353_v29, %v4644_v42  ;;  %v784_v23 = vmul.f32 0.2, %v441_v49  ;;  %vm656_vm0 = vcmp.gt.f32.partialorder %v441_v49, 0.0 }
 0x18a   :  { %vm658_vm14 = vcmp.gt.f32.partialorder %v265_v53, 0.0  ;;  %v786_v59 = vmul.f32 0.2, %v265_v53  ;;  %v785_v3 = vmul.f32 0.2, %v530_v27  ;;  %vm657_vm2 = vcmp.gt.f32.partialorder %v530_v27, 0.0 }
 0x18b   :  { %vm659_vm15 = vcmp.gt.f32.partialorder %v354_v15, 0.0  ;;  %v787_v48 = vmul.f32 0.2, %v354_v15 }
 0x18c   :  { %v914_v42 = vsel %vm658_vm14, %v265_v53, %v786_v59  ;;  %v912_v53 = vsel %vm656_vm0, %v441_v49, %v784_v23 }
 0x18d   :  { %v915_v7 = vsel %vm659_vm15, %v354_v15, %v787_v48  ;;  %v5010_v12 = vpack.c.bf16 %v914_v42, %v910_v39  ;;  %v4244_v15 = vld [vmem:[#allocation3 + $0x24] sm:$0xf]  ;;  %v3972_v42 = vld [vmem:[#allocation3 + $0x28] sm:$0xf0] }
 0x18e   :  { %v5012_v0 = vpack.c.bf16 %v915_v7, %v911_v22  ;;  %v442_v21 = vpop.f32.mrf.mxu2  ;;  %v4292_v22 = vld [vmem:[#allocation3 + $0x1a4] sm:$0xf]  ;;  %v3975_v49 = vor.u32 %v4244_v15, %v3972_v42 }
 0x18f   :  { %v531_v26 = vpop.f32.mrf.mxu3  ;;  %v443_v29 = vadd.f32 %v442_v21, %v4652_v52  ;;  %v1381_v38 = vpop.f32.mrf.mxu0  ;;  %v4276_v52 = vld [vmem:[#allocation3 + $0x124] sm:$0xf] }
 0x190   :  { %v532_v1 = vadd.f32 %v531_v26, %v4654_v58  ;;  %v1470_v32 = vpop.f32.mrf.mxu1  ;;  %v1382_v54 = vadd.f32 %v1381_v38, %v5008_v25  ;;  %v4100_v58 = vld [vmem:[#allocation3 + $0x128] sm:$0xf0]  ;;  %v913_v38 = vsel %vm657_vm2, %v530_v27, %v785_v3  ;;  %1733 = vmatpush.bf16.msra.mxu0 %v3975_v49 }
 0x191   :  { %vm660_vm3 = vcmp.gt.f32.partialorder %v443_v29, 0.0  ;;  %v788_v35 = vmul.f32 0.2, %v443_v29  ;;  %v4103_v39 = vor.u32 %v4276_v52, %v4100_v58 }
 0x192   :  { %vm661_vm4 = vcmp.gt.f32.partialorder %v532_v1, 0.0  ;;  %v789_v40 = vmul.f32 0.2, %v532_v1  ;;  %v1471_v33 = vadd.f32 %v1470_v32, %v1382_v54  ;;  %1420 = vmatmul.bf16.gmra.mxu0 %v4862_v36  ;;  %1509 = vmatmul.bf16.gmra.mxu1 %v4864_v37  ;;  %v4164_v32 = vld [vmem:[#allocation3 + $0x1a8] sm:$0xf0] }
 0x193   :  { %1598 = vmatmul.bf16.gmra.mxu2 %v4874_v11  ;;  %v916_v59 = vsel %vm660_vm3, %v443_v29, %v788_v35  ;;  %v4167_v23 = vor.u32 %v4292_v22, %v4164_v32  ;;  %v4036_v35 = vld [vmem:[#allocation3 + $0xa8] sm:$0xf0] }
 0x194   :  { %1687 = vmatmul.bf16.gmra.mxu3 %v4876_v17  ;;  %v917_v48 = vsel %vm661_vm4, %v532_v1, %v789_v40  ;;  %v5022_v7 = vpack.c.bf16 %v916_v59, %v912_v53  ;;  %1911 = vmatpush.bf16.msra.mxu2 %v4103_v39  ;;  %v4260_v1 = vld [vmem:[#allocation3 + $0xa4] sm:$0xf] }
 0x195   :  { %v5024_v21 = vpack.c.bf16 %v917_v48, %v913_v38  ;;  %2000 = vmatpush.bf16.msra.mxu3 %v4167_v23  ;;  %v4039_v40 = vor.u32 %v4260_v1, %v4036_v35 }
 0x196   :  { %v1559_v26 = vpop.f32.mrf.mxu2 }
 0x197   :  { %6108 = vst [vmem:[#allocation41_spill] sm:$0xff] %v5024_v21  ;;  %v1648_v54 = vpop.f32.mrf.mxu3  ;;  %v1560_v17 = vadd.f32 %v1559_v26, %v1471_v33  ;;  %v1383_v11 = vpop.f32.mrf.mxu0  ;;  %1822 = vmatpush.bf16.msra.mxu1 %v4039_v40 }
 0x198   :  { %v1472_v37 = vpop.f32.mrf.mxu1  ;;  %v1384_v27 = vadd.f32 %v1383_v11, %v5008_v25 }
 0x199   :  { %v5027_v3 = vadd.f32 %v1648_v54, %v1560_v17 }
 0x19a   :  { %v1473_v29 = vadd.f32 %v1472_v37, %v1384_v27 }
 0x19b   :  { %vm2084_vm5 = vcmp.gt.f32.partialorder %v5027_v3, 0.0 }
 0x19e   :  { %v1561_v53 = vpop.f32.mrf.mxu2 }
 0x19f   :  { %v1650_v52 = vpop.f32.mrf.mxu3  ;;  %v1562_v58 = vadd.f32 %v1561_v53, %v1473_v29  ;;  %v1386_v15 = vpop.f32.mrf.mxu0  ;;  %v4274_v53 = vld [vmem:[#allocation3 + $0x114] sm:$0xf] }
 0x1a0   :  { %v1475_v59 = vpop.f32.mrf.mxu1  ;;  %v1387_v33 = vadd.f32 %v1386_v15, %v5008_v25  ;;  %v4242_v15 = vld [vmem:[#allocation3 + $0x14] sm:$0xf] }
 0x1a1   :  { %v5030_v38 = vadd.f32 %v1650_v52, %v1562_v58  ;;  %v4092_v52 = vld [vmem:[#allocation3 + $0x118] sm:$0xf0] }
 0x1a2   :  { %v1476_v48 = vadd.f32 %v1475_v59, %v1387_v33  ;;  %1425 = vmatmul.bf16.gmra.mxu0 %v4882_v28  ;;  %1514 = vmatmul.bf16.gmra.mxu1 %v4884_v60  ;;  %v4095_v58 = vor.u32 %v4274_v53, %v4092_v52  ;;  %v3964_v59 = vld [vmem:[#allocation3 + $0x18] sm:$0xf0]  ;;  %v4290_v33 = vld [vmem:[#allocation3 + $0x194] sm:$0xf] }
 0x1a3   :  { %1603 = vmatmul.bf16.gmra.mxu2 %v4894_v50  ;;  %vm2086_vm7 = vcmp.gt.f32.partialorder %v5030_v38, 0.0 }
 0x1a4   :  { %1692 = vmatmul.bf16.gmra.mxu3 %v4896_v16  ;;  %1912 = vmatpush.bf16.msra.mxu2 %v4095_v58 }
 0x1a6   :  { %v1564_v37 = vpop.f32.mrf.mxu2 }
 0x1a7   :  { %v1653_v11 = vpop.f32.mrf.mxu3  ;;  %v1565_v17 = vadd.f32 %v1564_v37, %v1476_v48  ;;  %v1388_v39 = vpop.f32.mrf.mxu0  ;;  %v3967_v48 = vor.u32 %v4242_v15, %v3964_v59  ;;  %v4156_v37 = vld [vmem:[#allocation3 + $0x198] sm:$0xf0] }
 0x1a8   :  { %v1477_v42 = vpop.f32.mrf.mxu1  ;;  %v1389_v22 = vadd.f32 %v1388_v39, %v5008_v25  ;;  %v4159_v39 = vor.u32 %v4290_v33, %v4156_v37 }
 0x1a9   :  { %v5037_v32 = vadd.f32 %v1653_v11, %v1565_v17  ;;  %1734 = vmatpush.bf16.msra.mxu0 %v3967_v48 }
 0x1aa   :  { %v1478_v49 = vadd.f32 %v1477_v42, %v1389_v22  ;;  %2001 = vmatpush.bf16.msra.mxu3 %v4159_v39 }
 0x1ab   :  { %vm2088_vm9 = vcmp.gt.f32.partialorder %v5037_v32, 0.0 }
 0x1ae   :  { %v1566_v23 = vpop.f32.mrf.mxu2 }
 0x1af   :  { %v1655_v26 = vpop.f32.mrf.mxu3  ;;  %v1567_v54 = vadd.f32 %v1566_v23, %v1478_v49  ;;  %v1391_v27 = vpop.f32.mrf.mxu0 }
 0x1b0   :  { %v1480_v29 = vpop.f32.mrf.mxu1  ;;  %v1392_v1 = vadd.f32 %v1391_v27, %v5008_v25  ;;  %v4258_v27 = vld [vmem:[#allocation3 + $0x94] sm:$0xf] }
 0x1b1   :  { %v5040_v35 = vadd.f32 %v1655_v26, %v1567_v54 }
 0x1b2   :  { %v1481_v40 = vadd.f32 %v1480_v29, %v1392_v1  ;;  %1430 = vmatmul.bf16.gmra.mxu0 %v4902_v6  ;;  %1519 = vmatmul.bf16.gmra.mxu1 %v4904_v8  ;;  %v4028_v29 = vld [vmem:[#allocation3 + $0x98] sm:$0xf0] }
 0x1b3   :  { %1608 = vmatmul.bf16.gmra.mxu2 %v4914_v43  ;;  %v4031_v1 = vor.u32 %v4258_v27, %v4028_v29  ;;  %vm2090_vm11 = vcmp.gt.f32.partialorder %v5040_v35, 0.0 }
 0x1b4   :  { %1697 = vmatmul.bf16.gmra.mxu3 %v4916_v46 }
 0x1b5   :  { %1823 = vmatpush.bf16.msra.mxu1 %v4031_v1 }
 0x1b6   :  { %v1569_v11 = vpop.f32.mrf.mxu2 }
 0x1b7   :  { %v1658_v17 = vpop.f32.mrf.mxu3  ;;  %v1570_v42 = vadd.f32 %v1569_v11, %v1481_v40  ;;  %v1393_v22 = vpop.f32.mrf.mxu0 }
 0x1b8   :  { %v1482_v49 = vpop.f32.mrf.mxu1  ;;  %v1394_v23 = vadd.f32 %v1393_v22, %v5008_v25 }
 0x1b9   :  { %v5047_v26 = vadd.f32 %v1658_v17, %v1570_v42 }
 0x1ba   :  { %v1483_v54 = vadd.f32 %v1482_v49, %v1394_v23 }
 0x1bb   :  { %vm2092_vm1 = vcmp.gt.f32.partialorder %v5047_v26, 0.0 }
 0x1be   :  { %v1571_v53 = vpop.f32.mrf.mxu2 }
 0x1bf   :  { %v1660_v52 = vpop.f32.mrf.mxu3  ;;  %v1572_v15 = vadd.f32 %v1571_v53, %v1483_v54  ;;  %v1396_v59 = vpop.f32.mrf.mxu0 }
 0x1c0   :  { %v1485_v46 = vpop.f32.mrf.mxu1  ;;  %v1397_v40 = vadd.f32 %v1396_v59, %v5008_v25  ;;  %v4084_v59 = vld [vmem:[#allocation3 + $0x108] sm:$0xf0] }
 0x1c1   :  { %v5050_v58 = vadd.f32 %v1660_v52, %v1572_v15  ;;  %v4272_v15 = vld [vmem:[#allocation3 + $0x104] sm:$0xf] }
 0x1c2   :  { %v1486_v33 = vadd.f32 %v1485_v46, %v1397_v40  ;;  %1435 = vmatmul.bf16.gmra.mxu0 %v4922_v18  ;;  %1524 = vmatmul.bf16.gmra.mxu1 %v4924_v19  ;;  %v4240_v40 = vld [vmem:[#allocation3 + $0x4] sm:$0xf] }
 0x1c3   :  { %1613 = vmatmul.bf16.gmra.mxu2 %v4934_v41  ;;  %vm2094_vm14 = vcmp.gt.f32.partialorder %v5050_v58, 0.0 }
 0x1c4   :  { %1702 = vmatmul.bf16.gmra.mxu3 %v4936_v20 }
 0x1c6   :  { %v1574_v48 = vpop.f32.mrf.mxu2 }
 0x1c7   :  { %v1663_v37 = vpop.f32.mrf.mxu3  ;;  %v1575_v11 = vadd.f32 %v1574_v48, %v1486_v33  ;;  %v1398_v17 = vpop.f32.mrf.mxu0  ;;  %v3956_v33 = vld [vmem:[#allocation3 + $0x8] sm:$0xf0]  ;;  %v4087_v48 = vor.u32 %v4272_v15, %v4084_v59 }
 0x1c8   :  { %v1487_v39 = vpop.f32.mrf.mxu1  ;;  %v1399_v42 = vadd.f32 %v1398_v17, %v5008_v25  ;;  %v4148_v17 = vld [vmem:[#allocation3 + $0x188] sm:$0xf0] }
 0x1c9   :  { %v5057_v22 = vadd.f32 %v1663_v37, %v1575_v11  ;;  %v3959_v37 = vor.u32 %v4240_v40, %v3956_v33  ;;  %v4288_v11 = vld [vmem:[#allocation3 + $0x184] sm:$0xf]  ;;  %1913 = vmatpush.bf16.msra.mxu2 %v4087_v48 }
 0x1ca   :  { %v1488_v49 = vadd.f32 %v1487_v39, %v1399_v42 }
 0x1cb   :  { %1735 = vmatpush.bf16.msra.mxu0 %v3959_v37  ;;  %vm2096_vm0 = vcmp.gt.f32.partialorder %v5057_v22, 0.0 }
 0x1ce   :  { %v1576_v23 = vpop.f32.mrf.mxu2 }
 0x1cf   :  { %v1665_v46 = vpop.f32.mrf.mxu3  ;;  %v1577_v54 = vadd.f32 %v1576_v23, %v1488_v49  ;;  %v1401_v27 = vpop.f32.mrf.mxu0  ;;  %v4151_v49 = vor.u32 %v4288_v11, %v4148_v17 }
 0x1d0   :  { %v1490_v29 = vpop.f32.mrf.mxu1  ;;  %v1402_v1 = vadd.f32 %v1401_v27, %v5008_v25 }
 0x1d1   :  { %v5060_v53 = vadd.f32 %v1665_v46, %v1577_v54  ;;  %2002 = vmatpush.bf16.msra.mxu3 %v4151_v49 }
 0x1d2   :  { %v1491_v52 = vadd.f32 %v1490_v29, %v1402_v1  ;;  %1440 = vmatmul.bf16.gmra.mxu0 %v4942_v51  ;;  %1529 = vmatmul.bf16.gmra.mxu1 %v4944_v2 }
 0x1d3   :  { %1618 = vmatmul.bf16.gmra.mxu2 %v4954_v44  ;;  %v4020_v44 = vld [vmem:[#allocation3 + $0x88] sm:$0xf0]  ;;  %vm2098_vm3 = vcmp.gt.f32.partialorder %v5060_v53, 0.0 }
 0x1d4   :  { %1707 = vmatmul.bf16.gmra.mxu3 %v4956_v63  ;;  %v4256_v63 = vld [vmem:[#allocation3 + $0x84] sm:$0xf] }
 0x1d5   :  { %v4023_v15 = vor.u32 %v4256_v63, %v4020_v44 }
 0x1d6   :  { %v1579_v39 = vpop.f32.mrf.mxu2 }
 0x1d7   :  { %v1668_v42 = vpop.f32.mrf.mxu3  ;;  %v1580_v23 = vadd.f32 %v1579_v39, %v1491_v52  ;;  %v1403_v46 = vpop.f32.mrf.mxu0  ;;  %1824 = vmatpush.bf16.msra.mxu1 %v4023_v15 }
 0x1d8   :  { %v1492_v54 = vpop.f32.mrf.mxu1  ;;  %v1404_v27 = vadd.f32 %v1403_v46, %v5008_v25 }
 0x1d9   :  { %v5067_v29 = vadd.f32 %v1668_v42, %v1580_v23 }
 0x1da   :  { %v1493_v1 = vadd.f32 %v1492_v54, %v1404_v27 }
 0x1de   :  { %v1581_v59 = vpop.f32.mrf.mxu2 }
 0x1df   :  { %v1670_v40 = vpop.f32.mrf.mxu3  ;;  %v1582_v33 = vadd.f32 %v1581_v59, %v1493_v1  ;;  %v1406_v2 = vpop.f32.mrf.mxu0 }
 0x1e0   :  { %v1495_v51 = vpop.f32.mrf.mxu1  ;;  %v1407_v52 = vadd.f32 %v1406_v2, %v5008_v25 }
 0x1e1   :  { %v5070_v11 = vadd.f32 %v1670_v40, %v1582_v33 }
 0x1e2   :  { %v1496_v48 = vadd.f32 %v1495_v51, %v1407_v52  ;;  %1445 = vmatmul.bf16.gmra.mxu0 %v4962_v4  ;;  %1534 = vmatmul.bf16.gmra.mxu1 %v4964_v45 }
 0x1e3   :  { %1623 = vmatmul.bf16.gmra.mxu2 %v4974_v57 }
 0x1e4   :  { %1712 = vmatmul.bf16.gmra.mxu3 %v4976_v34 }
 0x1e6   :  { %v1584_v44 = vpop.f32.mrf.mxu2 }
 0x1e7   :  { %v1673_v63 = vpop.f32.mrf.mxu3  ;;  %v1585_v37 = vadd.f32 %v1584_v44, %v1496_v48  ;;  %v1408_v17 = vpop.f32.mrf.mxu0 }
 0x1e8   :  { %v1497_v39 = vpop.f32.mrf.mxu1  ;;  %v1409_v42 = vadd.f32 %v1408_v17, %v5008_v25 }
 0x1e9   :  { %v5077_v49 = vadd.f32 %v1673_v63, %v1585_v37 }
 0x1ea   :  { %v1498_v2 = vadd.f32 %v1497_v39, %v1409_v42 }
 0x1ee   :  { %v1586_v23 = vpop.f32.mrf.mxu2 }
 0x1ef   :  { %v1675_v51 = vpop.f32.mrf.mxu3  ;;  %v1587_v46 = vadd.f32 %v1586_v23, %v1498_v2  ;;  %v1411_v54 = vpop.f32.mrf.mxu0 }
 0x1f0   :  { %v1500_v27 = vpop.f32.mrf.mxu1  ;;  %v1412_v1 = vadd.f32 %v1411_v54, %v5008_v25 }
 0x1f1   :  { %v5080_v15 = vadd.f32 %v1675_v51, %v1587_v46 }
 0x1f2   :  { %v1501_v59 = vadd.f32 %v1500_v27, %v1412_v1  ;;  %1450 = vmatmul.bf16.gmra.mxu0 %v4982_v9  ;;  %1539 = vmatmul.bf16.gmra.mxu1 %v4984_v24 }
 0x1f3   :  { %1628 = vmatmul.bf16.gmra.mxu2 %v4994_v5 }
 0x1f4   :  { %1717 = vmatmul.bf16.gmra.mxu3 %v4996_v10 }
 0x1f6   :  { %v1589_v40 = vpop.f32.mrf.mxu2 }
 0x1f7   :  { %v1678_v33 = vpop.f32.mrf.mxu3  ;;  %v1590_v52 = vadd.f32 %v1589_v40, %v1501_v59  ;;  %v1413_v48 = vpop.f32.mrf.mxu0 }
 0x1f8   :  { %v1502_v44 = vpop.f32.mrf.mxu1  ;;  %v1414_v63 = vadd.f32 %v1413_v48, %v5008_v25 }
 0x1f9   :  { %v5087_v37 = vadd.f32 %v1678_v33, %v1590_v52 }
 0x1fa   :  { %v1503_v17 = vadd.f32 %v1502_v44, %v1414_v63 }
 0x1fe   :  { %v1591_v39 = vpop.f32.mrf.mxu2 }
 0x1ff   :  { %v1680_v42 = vpop.f32.mrf.mxu3  ;;  %v1592_v2 = vadd.f32 %v1591_v39, %v1503_v17  ;;  %v1416_v23 = vpop.f32.mrf.mxu0 }
 0x200   :  { %v1505_v51 = vpop.f32.mrf.mxu1  ;;  %v1417_v46 = vadd.f32 %v1416_v23, %v5008_v25 }
 0x201   :  { %v5090_v54 = vadd.f32 %v1680_v42, %v1592_v2 }
 0x202   :  { %v1506_v27 = vadd.f32 %v1505_v51, %v1417_v46  ;;  %1455 = vmatmul.bf16.gmra.mxu0 %v5010_v12  ;;  %1544 = vmatmul.bf16.gmra.mxu1 %v5012_v0 }
 0x203   :  { %1633 = vmatmul.bf16.gmra.mxu2 %v5022_v7 }
 0x204   :  { %1722 = vmatmul.bf16.gmra.mxu3 %v5024_v21 }
 0x206   :  { %v1594_v1 = vpop.f32.mrf.mxu2 }
 0x207   :  { %v1683_v59 = vpop.f32.mrf.mxu3  ;;  %v1595_v40 = vadd.f32 %v1594_v1, %v1506_v27  ;;  %v1418_v33 = vpop.f32.mrf.mxu0 }
 0x208   :  { %v1507_v52 = vpop.f32.mrf.mxu1  ;;  %v1419_v48 = vadd.f32 %v1418_v33, %v5008_v25 }
 0x209   :  { %v5097_v44 = vadd.f32 %v1683_v59, %v1595_v40 }
 0x20a   :  { %v1508_v63 = vadd.f32 %v1507_v52, %v1419_v48 }
 0x20e   :  { %v1596_v17 = vpop.f32.mrf.mxu2 }
 0x20f   :  { %v1685_v39 = vpop.f32.mrf.mxu3  ;;  %v1597_v42 = vadd.f32 %v1596_v17, %v1508_v63  ;;  %v1421_v2 = vpop.f32.mrf.mxu0 }
 0x210   :  { %v1510_v23 = vpop.f32.mrf.mxu1  ;;  %v1422_v51 = vadd.f32 %v1421_v2, %v5008_v25 }
 0x211   :  { %v5100_v46 = vadd.f32 %v1685_v39, %v1597_v42 }
 0x212   :  { %v1511_v21 = vadd.f32 %v1510_v23, %v1422_v51  ;;  %1736 = vmatmul.bf16.vlgmr.msra.gmra.mxu0 %v4666_v13  ;;  %1825 = vmatmul.bf16.vlgmr.msra.gmra.mxu1 %v4668_v14  ;;  %v6110_v23 = vld [vmem:[#allocation10_spill] sm:$0xff] }
 0x213   :  { %1914 = vmatmul.bf16.vlgmr.msra.gmra.mxu2 %v4676_v30 }
 0x214   :  { %2003 = vmatmul.bf16.vlgmr.msra.gmra.mxu3 %v4678_v31 }
 0x216   :  { %v1599_v27 = vpop.f32.mrf.mxu2 }
 0x217   :  { %v1688_v1 = vpop.f32.mrf.mxu3  ;;  %v1600_v59 = vadd.f32 %v1599_v27, %v1511_v21  ;;  %v1423_v40 = vpop.f32.mrf.mxu0  ;;  %v6109_v21 = vld [vmem:[#allocation9_spill] sm:$0xff] }
 0x218   :  { %v1512_v33 = vpop.f32.mrf.mxu1  ;;  %v1424_v52 = vadd.f32 %v1423_v40, %v5008_v25 }
 0x219   :  { %v5107_v48 = vadd.f32 %v1688_v1, %v1600_v59 }
 0x21a   :  { %v1513_v63 = vadd.f32 %v1512_v33, %v1424_v52 }
 0x21e   :  { %v1601_v17 = vpop.f32.mrf.mxu2 }
 0x21f   :  { %v1690_v39 = vpop.f32.mrf.mxu3  ;;  %v1602_v42 = vadd.f32 %v1601_v17, %v1513_v63  ;;  %v1426_v13 = vpop.f32.mrf.mxu0 }
 0x220   :  { %v1515_v2 = vpop.f32.mrf.mxu1  ;;  %v1427_v14 = vadd.f32 %v1426_v13, %v5008_v25 }
 0x221   :  { %v5110_v30 = vadd.f32 %v1690_v39, %v1602_v42 }
 0x222   :  { %v1516_v31 = vadd.f32 %v1515_v2, %v1427_v14  ;;  %1741 = vmatmul.bf16.gmra.mxu0 %v4692_v55  ;;  %1830 = vmatmul.bf16.gmra.mxu1 %v4694_v56 }
 0x223   :  { %1919 = vmatmul.bf16.gmra.mxu2 %v6109_v21  ;;  %v6113_v21 = vld [vmem:[#allocation11_spill] sm:$0xff] }
 0x224   :  { %2008 = vmatmul.bf16.gmra.mxu3 %v6110_v23  ;;  %v6115_v23 = vld [vmem:[#allocation13_spill] sm:$0xff] }
 0x226   :  { %v1604_v51 = vpop.f32.mrf.mxu2 }
 0x227   :  { %v1693_v27 = vpop.f32.mrf.mxu3  ;;  %v1605_v1 = vadd.f32 %v1604_v51, %v1516_v31  ;;  %v1428_v59 = vpop.f32.mrf.mxu0  ;;  %v6114_v31 = vld [vmem:[#allocation12_spill] sm:$0xff]  ;;  %v6116_v51 = vld [vmem:[#allocation14_spill] sm:$0xff] }
 0x228   :  { %v1517_v40 = vpop.f32.mrf.mxu1  ;;  %v1429_v33 = vadd.f32 %v1428_v59, %v5008_v25 }
 0x229   :  { %v5117_v52 = vadd.f32 %v1693_v27, %v1605_v1 }
 0x22a   :  { %v1518_v63 = vadd.f32 %v1517_v40, %v1429_v33 }
 0x22b   :  { %6111 = vst [vmem:[#allocation9_spill] sm:$0xff] %v5117_v52  ;;  %v6131_v52 = vld [vmem:[#allocation24_spill] sm:$0xff] }
 0x22e   :  { %v1606_v17 = vpop.f32.mrf.mxu2 }
 0x22f   :  { %v1695_v39 = vpop.f32.mrf.mxu3  ;;  %v1607_v42 = vadd.f32 %v1606_v17, %v1518_v63  ;;  %v1431_v55 = vpop.f32.mrf.mxu0 }
 0x230   :  { %v1520_v13 = vpop.f32.mrf.mxu1  ;;  %v1432_v56 = vadd.f32 %v1431_v55, %v5008_v25 }
 0x231   :  { %v5120_v2 = vadd.f32 %v1695_v39, %v1607_v42 }
 0x232   :  { %v1521_v14 = vadd.f32 %v1520_v13, %v1432_v56  ;;  %1746 = vmatmul.bf16.gmra.mxu0 %v6113_v21  ;;  %1835 = vmatmul.bf16.gmra.mxu1 %v6114_v31 }
 0x233   :  { %6112 = vst [vmem:[#allocation10_spill] sm:$0xff] %v5120_v2  ;;  %1924 = vmatmul.bf16.gmra.mxu2 %v6115_v23  ;;  %v6119_v2 = vld [vmem:[#allocation15_spill] sm:$0xff] }
 0x234   :  { %2013 = vmatmul.bf16.gmra.mxu3 %v6116_v51 }
 0x236   :  { %v1609_v27 = vpop.f32.mrf.mxu2 }
 0x237   :  { %v1698_v1 = vpop.f32.mrf.mxu3  ;;  %v1610_v59 = vadd.f32 %v1609_v27, %v1521_v14  ;;  %v1433_v40 = vpop.f32.mrf.mxu0  ;;  %v6120_v14 = vld [vmem:[#allocation16_spill] sm:$0xff]  ;;  %v6121_v27 = vld [vmem:[#allocation17_spill] sm:$0xff] }
 0x238   :  { %v1522_v33 = vpop.f32.mrf.mxu1  ;;  %v1434_v63 = vadd.f32 %v1433_v40, %v5008_v25  ;;  %v6122_v40 = vld [vmem:[#allocation18_spill] sm:$0xff] }
 0x239   :  { %v5127_v17 = vadd.f32 %v1698_v1, %v1610_v59 }
 0x23a   :  { %v1523_v39 = vadd.f32 %v1522_v33, %v1434_v63 }
 0x23b   :  { %6117 = vst [vmem:[#allocation11_spill] sm:$0xff] %v5127_v17 }
 0x23e   :  { %v1611_v42 = vpop.f32.mrf.mxu2 }
 0x23f   :  { %v1700_v55 = vpop.f32.mrf.mxu3  ;;  %v1612_v13 = vadd.f32 %v1611_v42, %v1523_v39  ;;  %v1436_v56 = vpop.f32.mrf.mxu0 }
 0x240   :  { %v1525_v21 = vpop.f32.mrf.mxu1  ;;  %v1437_v31 = vadd.f32 %v1436_v56, %v5008_v25 }
 0x241   :  { %v5130_v23 = vadd.f32 %v1700_v55, %v1612_v13 }
 0x242   :  { %v1526_v51 = vadd.f32 %v1525_v21, %v1437_v31  ;;  %1751 = vmatmul.bf16.gmra.mxu0 %v6119_v2  ;;  %1840 = vmatmul.bf16.gmra.mxu1 %v6120_v14 }
 0x243   :  { %6118 = vst [vmem:[#allocation12_spill] sm:$0xff] %v5130_v23  ;;  %1929 = vmatmul.bf16.gmra.mxu2 %v6121_v27  ;;  %v6125_v23 = vld [vmem:[#allocation19_spill] sm:$0xff] }
 0x244   :  { %2018 = vmatmul.bf16.gmra.mxu3 %v6122_v40 }
 0x246   :  { %v1614_v1 = vpop.f32.mrf.mxu2 }
 0x247   :  { %v1703_v59 = vpop.f32.mrf.mxu3  ;;  %v1615_v33 = vadd.f32 %v1614_v1, %v1526_v51  ;;  %v1438_v63 = vpop.f32.mrf.mxu0  ;;  %v6126_v51 = vld [vmem:[#allocation20_spill] sm:$0xff]  ;;  %v6127_v1 = vld [vmem:[#allocation21_spill] sm:$0xff] }
 0x248   :  { %v1527_v39 = vpop.f32.mrf.mxu1  ;;  %v1439_v42 = vadd.f32 %v1438_v63, %v5008_v25  ;;  %v6128_v63 = vld [vmem:[#allocation22_spill] sm:$0xff] }
 0x249   :  { %v5137_v17 = vadd.f32 %v1703_v59, %v1615_v33 }
 0x24a   :  { %v1528_v55 = vadd.f32 %v1527_v39, %v1439_v42 }
 0x24b   :  { %6123 = vst [vmem:[#allocation13_spill] sm:$0xff] %v5137_v17  ;;  %v2442_v17 = vld [vmem:[#allocation2] sm:$0x1] }
 0x24e   :  { %v1616_v13 = vpop.f32.mrf.mxu2 }
 0x24f   :  { %v1705_v56 = vpop.f32.mrf.mxu3  ;;  %v1617_v21 = vadd.f32 %v1616_v13, %v1528_v55  ;;  %v1441_v2 = vpop.f32.mrf.mxu0  ;;  %v4495_v13 = vmov 0  }
 0x250   :  { %v1530_v31 = vpop.f32.mrf.mxu1  ;;  %v1442_v14 = vadd.f32 %v1441_v2, %v5008_v25  ;;  %4309 = vset.pattern.permute.xlu0 %v4495_v13  ;;  %4310 = vset.pattern.permute.xlu2 %v4495_v13 }
 0x251   :  { %v5140_v27 = vadd.f32 %v1705_v56, %v1617_v21  ;;  %2445 = vperm.xlu0 %4309, %v2442_v17   ;;  %4311 = vset.pattern.permute.xlu1 %v4495_v13  ;;  %v6133_v17 = vld [vmem:[#allocation26_spill] sm:$0xff] }
 0x252   :  { %v1531_v40 = vadd.f32 %v1530_v31, %v1442_v14  ;;  %1756 = vmatmul.bf16.gmra.mxu0 %v6125_v23  ;;  %1845 = vmatmul.bf16.gmra.mxu1 %v6126_v51 }
 0x253   :  { %6124 = vst [vmem:[#allocation14_spill] sm:$0xff] %v5140_v27  ;;  %1934 = vmatmul.bf16.gmra.mxu2 %v6127_v1  ;;  %v6130_v27 = vld [vmem:[#allocation23_spill] sm:$0xff] }
 0x254   :  { %2023 = vmatmul.bf16.gmra.mxu3 %v6128_v63 }
 0x256   :  { %v1619_v59 = vpop.f32.mrf.mxu2 }
 0x257   :  { %v1708_v33 = vpop.f32.mrf.mxu3  ;;  %v1620_v39 = vadd.f32 %v1619_v59, %v1531_v40  ;;  %v1443_v42 = vpop.f32.mrf.mxu0 }
 0x258   :  { %v1532_v55 = vpop.f32.mrf.mxu1  ;;  %v1444_v56 = vadd.f32 %v1443_v42, %v5008_v25  ;;  %v6132_v42 = vld [vmem:[#allocation25_spill] sm:$0xff] }
 0x259   :  { %v5147_v23 = vadd.f32 %v1708_v33, %v1620_v39 }
 0x25a   :  { %v1533_v21 = vadd.f32 %v1532_v55, %v1444_v56 }
 0x25b   :  { %6129 = vst [vmem:[#allocation15_spill] sm:$0xff] %v5147_v23  ;;  %v6136_v23 = vld [vmem:[#allocation27_spill] sm:$0xff] }
 0x25e   :  { %v1621_v2 = vpop.f32.mrf.mxu2 }
 0x25f   :  { %v1710_v31 = vpop.f32.mrf.mxu3  ;;  %v1622_v14 = vadd.f32 %v1621_v2, %v1533_v21  ;;  %v1446_v51 = vpop.f32.mrf.mxu0 }
 0x260   :  { %v1535_v1 = vpop.f32.mrf.mxu1  ;;  %v1447_v40 = vadd.f32 %v1446_v51, %v5008_v25 }
 0x261   :  { %v5150_v63 = vadd.f32 %v1710_v31, %v1622_v14 }
 0x262   :  { %v1536_v59 = vadd.f32 %v1535_v1, %v1447_v40  ;;  %1761 = vmatmul.bf16.gmra.mxu0 %v6130_v27  ;;  %1850 = vmatmul.bf16.gmra.mxu1 %v6131_v52 }
 0x263   :  { %1939 = vmatmul.bf16.gmra.mxu2 %v6132_v42 }
 0x264   :  { %2028 = vmatmul.bf16.gmra.mxu3 %v6133_v17 }
 0x266   :  { %v1624_v33 = vpop.f32.mrf.mxu2 }
 0x267   :  { %v1713_v39 = vpop.f32.mrf.mxu3  ;;  %v1625_v55 = vadd.f32 %v1624_v33, %v1536_v59  ;;  %v1448_v13 = vpop.f32.mrf.mxu0  ;;  %v6137_v59 = vld [vmem:[#allocation28_spill] sm:$0xff]  ;;  %v6138_v33 = vld [vmem:[#allocation29_spill] sm:$0xff] }
 0x268   :  { %v1537_v56 = vpop.f32.mrf.mxu1  ;;  %v1449_v21 = vadd.f32 %v1448_v13, %v5008_v25  ;;  %v6139_v13 = vld [vmem:[#allocation30_spill] sm:$0xff] }
 0x269   :  { %v5157_v2 = vadd.f32 %v1713_v39, %v1625_v55 }
 0x26a   :  { %v1538_v31 = vadd.f32 %v1537_v56, %v1449_v21 }
 0x26b   :  { %6134 = vst [vmem:[#allocation16_spill] sm:$0xff] %v5157_v2 }
 0x26e   :  { %v1626_v14 = vpop.f32.mrf.mxu2 }
 0x26f   :  { %v1715_v51 = vpop.f32.mrf.mxu3  ;;  %v1627_v1 = vadd.f32 %v1626_v14, %v1538_v31  ;;  %v1451_v27 = vpop.f32.mrf.mxu0 }
 0x270   :  { %v1540_v40 = vpop.f32.mrf.mxu1  ;;  %v1452_v52 = vadd.f32 %v1451_v27, %v5008_v25 }
 0x271   :  { %v5160_v42 = vadd.f32 %v1715_v51, %v1627_v1 }
 0x272   :  { %v1541_v17 = vadd.f32 %v1540_v40, %v1452_v52  ;;  %1766 = vmatmul.bf16.gmra.mxu0 %v6136_v23  ;;  %1855 = vmatmul.bf16.gmra.mxu1 %v6137_v59 }
 0x273   :  { %6135 = vst [vmem:[#allocation17_spill] sm:$0xff] %v5160_v42  ;;  %1944 = vmatmul.bf16.gmra.mxu2 %v6138_v33 }
 0x274   :  { %2033 = vmatmul.bf16.gmra.mxu3 %v6139_v13 }
 0x276   :  { %v1629_v39 = vpop.f32.mrf.mxu2 }
 0x277   :  { %v1718_v55 = vpop.f32.mrf.mxu3  ;;  %v1630_v56 = vadd.f32 %v1629_v39, %v1541_v17  ;;  %v1453_v21 = vpop.f32.mrf.mxu0  ;;  %v6141_v17 = vld [vmem:[#allocation31_spill] sm:$0xff] }
 0x278   :  { %v1542_v31 = vpop.f32.mrf.mxu1  ;;  %v1454_v14 = vadd.f32 %v1453_v21, %v5008_v25 }
 0x279   :  { %v5167_v2 = vadd.f32 %v1718_v55, %v1630_v56 }
 0x27a   :  { %v1543_v51 = vadd.f32 %v1542_v31, %v1454_v14 }
 0x27e   :  { %v1631_v1 = vpop.f32.mrf.mxu2 }
 0x27f   :  { %v1720_v27 = vpop.f32.mrf.mxu3  ;;  %v1632_v40 = vadd.f32 %v1631_v1, %v1543_v51  ;;  %v1456_v23 = vpop.f32.mrf.mxu0 }
 0x280   :  { %v1545_v52 = vpop.f32.mrf.mxu1  ;;  %v1457_v59 = vadd.f32 %v1456_v23, %v5008_v25 }
 0x281   :  { %v5170_v33 = vadd.f32 %v1720_v27, %v1632_v40  ;;  %v6143_v27 = vld [vmem:[#allocation40_spill] sm:$0xff] }
 0x282   :  { %v1546_v13 = vadd.f32 %v1545_v52, %v1457_v59  ;;  %1771 = vmatmul.bf16.gmra.mxu0 %v4842_v61  ;;  %1860 = vmatmul.bf16.gmra.mxu1 %v4844_v62  ;;  %v5180_v40 = vperm.slane %v6143_v27, 1 }
 0x283   :  { %6140 = vst [vmem:[#allocation18_spill] sm:$0xff] %v5170_v33  ;;  %1949 = vmatmul.bf16.gmra.mxu2 %v4854_v47 }
 0x284   :  { %2038 = vmatmul.bf16.gmra.mxu3 %v6141_v17 }
 0x286   :  { %v1634_v39 = vpop.f32.mrf.mxu2 }
 0x287   :  { %v1723_v55 = vpop.f32.mrf.mxu3  ;;  %v1635_v56 = vadd.f32 %v1634_v39, %v1546_v13  ;;  %v1458_v21 = vpop.f32.mrf.mxu0  ;;  %v6145_v13 = vld [vmem:[#allocation32_spill] sm:$0xff]  ;;  %v6147_v39 = vld [vmem:[#allocation34_spill] sm:$0xff] }
 0x288   :  { %v1547_v31 = vpop.f32.mrf.mxu1  ;;  %v1459_v14 = vadd.f32 %v1458_v21, %v5008_v25  ;;  %v6146_v25 = vld [vmem:[#allocation33_spill] sm:$0xff] }
 0x289   :  { %v5177_v51 = vadd.f32 %v1723_v55, %v1635_v56 }
 0x28a   :  { %v1548_v1 = vadd.f32 %v1547_v31, %v1459_v14  ;;  %v2148_v31 = vmul.f32 0.2, %v5027_v3 }
 0x28b   :  { %6142 = vst [vmem:[#allocation19_spill] sm:$0xff] %v5177_v51 }
 0x28e   :  { %v1636_v61 = vpop.f32.mrf.mxu2 }
 0x28f   :  { %v1725_v23 = vpop.f32.mrf.mxu3  ;;  %v1637_v62 = vadd.f32 %v1636_v61, %v1548_v1  ;;  %v1737_v52 = vpop.f32.mrf.mxu0  ;;  %v2276_v61 = vld [vmem:[%s6028_s5] sm:$0x3]  ;;  %s4496_s5 = smov [#allocation6]  }
 0x290   :  { %v1826_v47 = vpop.f32.mrf.mxu1  ;;  %v1738_v17 = vadd.f32 %v1737_v52, %v5180_v40  ;;  %v5197_v52 = vperm.slane %v2276_v61, 1  ;;  %s3876_s25 = sshll.u32 %s4496_s5, 4  ;;  %s3877_s25 = int_to_ptr.vmem [resolvable:$true] %s3876_s25 }
 0x291   :  { %v5182_v59 = vadd.f32 %v1725_v23, %v1637_v62  ;;  %v5195_v62 = vperm.slane %v2276_v61, 0 }
 0x292   :  { %1776 = vmatmul.bf16.gmra.mxu0 %v4862_v36  ;;  %1865 = vmatmul.bf16.gmra.mxu1 %v6145_v13  ;;  %v1827_v55 = vadd.f32 %v1826_v47, %v1738_v17  ;;  %v2212_v17 = vsel %vm2084_vm5, %v5027_v3, %v2148_v31  ;;  %vm2100_vm5 = vcmp.gt.f32.partialorder %v5067_v29, 0.0 }
 0x293   :  { %6144 = vst [vmem:[#allocation20_spill] sm:$0xff] %v5182_v59  ;;  %1954 = vmatmul.bf16.gmra.mxu2 %v6146_v25 }
 0x294   :  { %2043 = vmatmul.bf16.gmra.mxu3 %v6147_v39 }
 0x296   :  { %v1915_v56 = vpop.f32.mrf.mxu2 }
 0x297   :  { %v2004_v21 = vpop.f32.mrf.mxu3  ;;  %v1916_v14 = vadd.f32 %v1915_v56, %v1827_v55  ;;  %v1739_v1 = vpop.f32.mrf.mxu0  ;;  %v2282_v56 = vmul.f32 %v5195_v62, %v2212_v17 }
 0x298   :  { %v1828_v27 = vpop.f32.mrf.mxu1  ;;  %v1740_v23 = vadd.f32 %v1739_v1, %v5180_v40 }
 0x299   :  { %v2005_v36 = vadd.f32 %v2004_v21, %v1916_v14  ;;  %v2150_v21 = vmul.f32 0.2, %v5030_v38 }
 0x29a   :  { %v1829_v13 = vadd.f32 %v1828_v27, %v1740_v23 }
 0x29b   :  { %vm2085_vm6 = vcmp.gt.f32.partialorder %v2005_v36, 0.0  ;;  %v2149_v47 = vmul.f32 0.2, %v2005_v36  ;;  %v2214_v31 = vsel %vm2086_vm7, %v5030_v38, %v2150_v21  ;;  %vm2102_vm7 = vcmp.gt.f32.partialorder %v5070_v11, 0.0 }
 0x29d   :  { %v2213_v25 = vsel %vm2085_vm6, %v2005_v36, %v2149_v47  ;;  %v2284_v47 = vmul.f32 %v5195_v62, %v2214_v31 }
 0x29e   :  { %v1917_v39 = vpop.f32.mrf.mxu2  ;;  %v2283_v51 = vmul.f32 %v5197_v52, %v2213_v25 }
 0x29f   :  { %v2006_v55 = vpop.f32.mrf.mxu3  ;;  %v1918_v14 = vadd.f32 %v1917_v39, %v1829_v13  ;;  %v1742_v1 = vpop.f32.mrf.mxu0 }
 0x2a0   :  { %v1831_v59 = vpop.f32.mrf.mxu1  ;;  %v2346_v33 = vadd.f32 %v2283_v51, %v2282_v56  ;;  %v1743_v42 = vadd.f32 %v1742_v1, %v5180_v40  ;;  %v2154_v1 = vmul.f32 0.2, %v5040_v35 }
 0x2a1   :  { %v2007_v61 = vadd.f32 %v2006_v55, %v1918_v14 }
 0x2a2   :  { %2347 = vadd.xlane.f32.xlu0 %v2346_v33  ;;  %1781 = vmatmul.bf16.gmra.mxu0 %v4882_v28  ;;  %v1832_v27 = vadd.f32 %v1831_v59, %v1743_v42  ;;  %v2152_v28 = vmul.f32 0.2, %v5037_v32 }
 0x2a3   :  { %v2151_v3 = vmul.f32 0.2, %v2007_v61  ;;  %1870 = vmatmul.bf16.gmra.mxu1 %v4884_v60  ;;  %1959 = vmatmul.bf16.gmra.mxu2 %v4894_v50  ;;  %vm2087_vm8 = vcmp.gt.f32.partialorder %v2007_v61, 0.0 }
 0x2a4   :  { %2048 = vmatmul.bf16.gmra.mxu3 %v4896_v16  ;;  %v2216_v42 = vsel %vm2088_vm9, %v5037_v32, %v2152_v28  ;;  %vm2104_vm9 = vcmp.gt.f32.partialorder %v5077_v49, 0.0 }
 0x2a5   :  { %v2215_v51 = vsel %vm2087_vm8, %v2007_v61, %v2151_v3  ;;  %v2286_v21 = vmul.f32 %v5195_v62, %v2216_v42 }
 0x2a6   :  { %v1920_v36 = vpop.f32.mrf.mxu2  ;;  %v2285_v33 = vmul.f32 %v5197_v52, %v2215_v51 }
 0x2a7   :  { %v2009_v23 = vpop.f32.mrf.mxu3  ;;  %v1921_v17 = vadd.f32 %v1920_v36, %v1832_v27  ;;  %v1744_v13 = vpop.f32.mrf.mxu0 }
 0x2a8   :  { %v1833_v60 = vpop.f32.mrf.mxu1  ;;  %v2349_v50 = vadd.f32 %v2285_v33, %v2284_v47  ;;  %v1745_v38 = vadd.f32 %v1744_v13, %v5180_v40  ;;  %v6148_v47 = vld [vmem:[#allocation35_spill] sm:$0xff] }
 0x2a9   :  { %v2010_v25 = vadd.f32 %v2009_v23, %v1921_v17  ;;  %v2218_v23 = vsel %vm2090_vm11, %v5040_v35, %v2154_v1  ;;  %vm2106_vm11 = vcmp.gt.f32.partialorder %v5080_v15, 0.0 }
 0x2aa   :  { %2350 = vadd.xlane.f32.xlu1 %v2349_v50  ;;  %v1834_v59 = vadd.f32 %v1833_v60, %v1745_v38  ;;  %v2288_v60 = vmul.f32 %v5195_v62, %v2218_v23 }
 0x2ab   :  { %vm2089_vm10 = vcmp.gt.f32.partialorder %v2010_v25, 0.0  ;;  %v2153_v16 = vmul.f32 0.2, %v2010_v25 }
 0x2ad   :  { %v2217_v39 = vsel %vm2089_vm10, %v2010_v25, %v2153_v16 }
 0x2ae   :  { %v1922_v55 = vpop.f32.mrf.mxu2  ;;  %v2287_v14 = vmul.f32 %v5197_v52, %v2217_v39 }
 0x2af   :  { %v2011_v56 = vpop.f32.mrf.mxu3  ;;  %v1923_v61 = vadd.f32 %v1922_v55, %v1834_v59  ;;  %v1747_v3 = vpop.f32.mrf.mxu0 }
 0x2b0   :  { %v1836_v31 = vpop.f32.mrf.mxu1  ;;  %v2352_v27 = vadd.f32 %v2287_v14, %v2286_v21  ;;  %v1748_v36 = vadd.f32 %v1747_v3, %v5180_v40 }
 0x2b1   :  { %v2012_v51 = vadd.f32 %v2011_v56, %v1923_v61  ;;  %v2158_v61 = vmul.f32 0.2, %v5050_v58 }
 0x2b2   :  { %2353 = vadd.xlane.f32.xlu1 %v2352_v27  ;;  %1786 = vmatmul.bf16.gmra.mxu0 %v4902_v6  ;;  %v1837_v33 = vadd.f32 %v1836_v31, %v1748_v36  ;;  %v2156_v6 = vmul.f32 0.2, %v5047_v26 }
 0x2b3   :  { %v2155_v32 = vmul.f32 0.2, %v2012_v51  ;;  %1875 = vmatmul.bf16.gmra.mxu1 %v4904_v8  ;;  %1964 = vmatmul.bf16.gmra.mxu2 %v4914_v43  ;;  %vm2091_vm12 = vcmp.gt.f32.partialorder %v2012_v51, 0.0  ;;  %v2222_v23 = vsel %vm2094_vm14, %v5050_v58, %v2158_v61  ;;  %vm2110_vm14 = vcmp.gt.f32.partialorder %v5090_v54, 0.0 }
 0x2b4   :  { %2053 = vmatmul.bf16.gmra.mxu3 %v6148_v47  ;;  %v2220_v59 = vsel %vm2092_vm1, %v5047_v26, %v2156_v6  ;;  %vm2108_vm1 = vcmp.gt.f32.partialorder %v5087_v37, 0.0 }
 0x2b5   :  { %v2219_v28 = vsel %vm2091_vm12, %v2012_v51, %v2155_v32  ;;  %v2290_v14 = vmul.f32 %v5195_v62, %v2220_v59 }
 0x2b6   :  { %v1925_v17 = vpop.f32.mrf.mxu2  ;;  %v2289_v50 = vmul.f32 %v5197_v52, %v2219_v28 }
 0x2b7   :  { %v2014_v13 = vpop.f32.mrf.mxu3  ;;  %v1926_v25 = vadd.f32 %v1925_v17, %v1837_v33  ;;  %v1749_v38 = vpop.f32.mrf.mxu0 }
 0x2b8   :  { %v1838_v8 = vpop.f32.mrf.mxu1  ;;  %v2355_v43 = vadd.f32 %v2289_v50, %v2288_v60  ;;  %v1750_v35 = vadd.f32 %v1749_v38, %v5180_v40 }
 0x2b9   :  { %v2015_v16 = vadd.f32 %v2014_v13, %v1926_v25  ;;  %v2292_v13 = vmul.f32 %v5195_v62, %v2222_v23 }
 0x2ba   :  { %2356 = vadd.xlane.f32.xlu2 %v2355_v43  ;;  %v1839_v39 = vadd.f32 %v1838_v8, %v1750_v35 }
 0x2bb   :  { %vm2093_vm13 = vcmp.gt.f32.partialorder %v2015_v16, 0.0  ;;  %v2157_v42 = vmul.f32 0.2, %v2015_v16 }
 0x2bd   :  { %v2221_v55 = vsel %vm2093_vm13, %v2015_v16, %v2157_v42 }
 0x2be   :  { %v1927_v56 = vpop.f32.mrf.mxu2  ;;  %v2291_v1 = vmul.f32 %v5197_v52, %v2221_v55 }
 0x2bf   :  { %v2016_v21 = vpop.f32.mrf.mxu3  ;;  %v1928_v3 = vadd.f32 %v1927_v56, %v1839_v39  ;;  %v1752_v31 = vpop.f32.mrf.mxu0  ;;  %v2162_v39 = vmul.f32 0.2, %v5060_v53 }
 0x2c0   :  { %v1841_v27 = vpop.f32.mrf.mxu1  ;;  %v2358_v51 = vadd.f32 %v2291_v1, %v2290_v14  ;;  %v1753_v32 = vadd.f32 %v1752_v31, %v5180_v40  ;;  %v6150_v31 = vld [vmem:[#allocation37_spill] sm:$0xff] }
 0x2c1   :  { %v2017_v36 = vadd.f32 %v2016_v21, %v1928_v3 }
 0x2c2   :  { %2359 = vadd.xlane.f32.xlu2 %v2358_v51  ;;  %1791 = vmatmul.bf16.gmra.mxu0 %v4922_v18  ;;  %v1842_v47 = vadd.f32 %v1841_v27, %v1753_v32  ;;  %v2160_v18 = vmul.f32 0.2, %v5057_v22  ;;  %v6151_v27 = vld [vmem:[#allocation38_spill] sm:$0xff]  ;;  %v2226_v51 = vsel %vm2098_vm3, %v5060_v53, %v2162_v39  ;;  %vm2114_vm3 = vcmp.gt.f32.partialorder %v5100_v46, 0.0 }
 0x2c3   :  { %vm2095_vm15 = vcmp.gt.f32.partialorder %v2017_v36, 0.0  ;;  %v2159_v26 = vmul.f32 0.2, %v2017_v36  ;;  %1880 = vmatmul.bf16.gmra.mxu1 %v4924_v19  ;;  %1969 = vmatmul.bf16.gmra.mxu2 %v4934_v41 }
 0x2c4   :  { %2058 = vmatmul.bf16.gmra.mxu3 %v4936_v20  ;;  %v2224_v38 = vsel %vm2096_vm0, %v5057_v22, %v2160_v18  ;;  %v6149_v22 = vld [vmem:[#allocation36_spill] sm:$0xff]  ;;  %vm2112_vm0 = vcmp.gt.f32.partialorder %v5097_v44, 0.0 }
 0x2c5   :  { %v2223_v33 = vsel %vm2095_vm15, %v2017_v36, %v2159_v26  ;;  %v2294_v42 = vmul.f32 %v5195_v62, %v2224_v38  ;;  %v6152_v36 = vld [vmem:[#allocation39_spill] sm:$0xff] }
 0x2c6   :  { %v1930_v28 = vpop.f32.mrf.mxu2  ;;  %v2293_v60 = vmul.f32 %v5197_v52, %v2223_v33  ;;  %v2296_v33 = vmul.f32 %v5195_v62, %v2226_v51 }
 0x2c7   :  { %v2019_v17 = vpop.f32.mrf.mxu3  ;;  %v1931_v50 = vadd.f32 %v1930_v28, %v1842_v47  ;;  %v1754_v6 = vpop.f32.mrf.mxu0 }
 0x2c8   :  { %v1843_v25 = vpop.f32.mrf.mxu1  ;;  %v2361_v41 = vadd.f32 %v2293_v60, %v2292_v13  ;;  %v1755_v58 = vadd.f32 %v1754_v6, %v5180_v40 }
 0x2c9   :  { %v2020_v19 = vadd.f32 %v2019_v17, %v1931_v50  ;;  %v2164_v17 = vmul.f32 0.2, %v5067_v29 }
 0x2ca   :  { %2362 = vadd.xlane.f32.xlu1 %v2361_v41  ;;  %v1844_v8 = vadd.f32 %v1843_v25, %v1755_v58 }
 0x2cb   :  { %vm2097_vm2 = vcmp.gt.f32.partialorder %v2020_v19, 0.0  ;;  %v2161_v20 = vmul.f32 0.2, %v2020_v19  ;;  %v2228_v41 = vsel %vm2100_vm5, %v5067_v29, %v2164_v17  ;;  %vm2116_vm5 = vcmp.gt.f32.partialorder %v5107_v48, 0.0 }
 0x2cd   :  { %v2225_v43 = vsel %vm2097_vm2, %v2020_v19, %v2161_v20 }
 0x2ce   :  { %v1932_v16 = vpop.f32.mrf.mxu2  ;;  %v2295_v59 = vmul.f32 %v5197_v52, %v2225_v43 }
 0x2cf   :  { %v2021_v35 = vpop.f32.mrf.mxu3  ;;  %v1933_v55 = vadd.f32 %v1932_v16, %v1844_v8  ;;  %v1757_v56 = vpop.f32.mrf.mxu0  ;;  %v2298_v8 = vmul.f32 %v5195_v62, %v2228_v41  ;;  %v2166_v16 = vmul.f32 0.2, %v5070_v11 }
 0x2d0   :  { %v1846_v21 = vpop.f32.mrf.mxu1  ;;  %v2364_v14 = vadd.f32 %v2295_v59, %v2294_v42  ;;  %v1758_v61 = vadd.f32 %v1757_v56, %v5180_v40 }
 0x2d1   :  { %v2022_v1 = vadd.f32 %v2021_v35, %v1933_v55 }
 0x2d2   :  { %2365 = vadd.xlane.f32.xlu2 %v2364_v14  ;;  %1796 = vmatmul.bf16.gmra.mxu0 %v6149_v22  ;;  %v1847_v32 = vadd.f32 %v1846_v21, %v1758_v61  ;;  %v2230_v21 = vsel %vm2102_vm7, %v5070_v11, %v2166_v16  ;;  %vm2118_vm7 = vcmp.gt.f32.partialorder %v5110_v30, 0.0 }
 0x2d3   :  { %vm2099_vm4 = vcmp.gt.f32.partialorder %v2022_v1, 0.0  ;;  %v2163_v3 = vmul.f32 0.2, %v2022_v1  ;;  %1885 = vmatmul.bf16.gmra.mxu1 %v6150_v31  ;;  %1974 = vmatmul.bf16.gmra.mxu2 %v6151_v27 }
 0x2d4   :  { %2063 = vmatmul.bf16.gmra.mxu3 %v6152_v36 }
 0x2d5   :  { %v2227_v26 = vsel %vm2099_vm4, %v2022_v1, %v2163_v3  ;;  %v2300_v3 = vmul.f32 %v5195_v62, %v2230_v21 }
 0x2d6   :  { %v1935_v23 = vpop.f32.mrf.mxu2  ;;  %v2297_v28 = vmul.f32 %v5197_v52, %v2227_v26 }
 0x2d7   :  { %v2024_v47 = vpop.f32.mrf.mxu3  ;;  %v1936_v13 = vadd.f32 %v1935_v23, %v1847_v32  ;;  %v1759_v60 = vpop.f32.mrf.mxu0 }
 0x2d8   :  { %v1848_v18 = vpop.f32.mrf.mxu1  ;;  %v2367_v50 = vadd.f32 %v2297_v28, %v2296_v33  ;;  %v1760_v53 = vadd.f32 %v1759_v60, %v5180_v40 }
 0x2d9   :  { %v2025_v6 = vadd.f32 %v2024_v47, %v1936_v13  ;;  %v2170_v13 = vmul.f32 0.2, %v5080_v15 }
 0x2da   :  { %2368 = vadd.xlane.f32.xlu1 %v2367_v50  ;;  %v1849_v19 = vadd.f32 %v1848_v18, %v1760_v53 }
 0x2db   :  { %vm2101_vm6 = vcmp.gt.f32.partialorder %v2025_v6, 0.0  ;;  %v2165_v25 = vmul.f32 0.2, %v2025_v6  ;;  %v2234_v41 = vsel %vm2106_vm11, %v5080_v15, %v2170_v13  ;;  %v2446_v13 = vpop.permute.xlu0 %2445 }
 0x2dd   :  { %v2229_v58 = vsel %vm2101_vm6, %v2025_v6, %v2165_v25 }
 0x2de   :  { %v1937_v20 = vpop.f32.mrf.mxu2  ;;  %v2299_v43 = vmul.f32 %v5197_v52, %v2229_v58 }
 0x2df   :  { %v2026_v38 = vpop.f32.mrf.mxu3  ;;  %v1938_v35 = vadd.f32 %v1937_v20, %v1849_v19  ;;  %v1762_v42 = vpop.f32.mrf.mxu0 }
 0x2e0   :  { %v1851_v59 = vpop.f32.mrf.mxu1  ;;  %v2370_v39 = vadd.f32 %v2299_v43, %v2298_v8  ;;  %v1763_v56 = vadd.f32 %v1762_v42, %v5180_v40  ;;  %v2304_v8 = vmul.f32 %v5195_v62, %v2234_v41 }
 0x2e1   :  { %v2027_v55 = vadd.f32 %v2026_v38, %v1938_v35 }
 0x2e2   :  { %2371 = vadd.xlane.f32.xlu2 %v2370_v39  ;;  %1801 = vmatmul.bf16.gmra.mxu0 %v4962_v4  ;;  %v1852_v14 = vadd.f32 %v1851_v59, %v1763_v56  ;;  %v2168_v4 = vmul.f32 0.2, %v5077_v49 }
 0x2e3   :  { %vm2103_vm8 = vcmp.gt.f32.partialorder %v2027_v55, 0.0  ;;  %v2167_v29 = vmul.f32 0.2, %v2027_v55  ;;  %1890 = vmatmul.bf16.gmra.mxu1 %v4964_v45  ;;  %1979 = vmatmul.bf16.gmra.mxu2 %v4974_v57 }
 0x2e4   :  { %2068 = vmatmul.bf16.gmra.mxu3 %v4976_v34  ;;  %v2232_v32 = vsel %vm2104_vm9, %v5077_v49, %v2168_v4 }
 0x2e5   :  { %v2231_v1 = vsel %vm2103_vm8, %v2027_v55, %v2167_v29  ;;  %v2302_v28 = vmul.f32 %v5195_v62, %v2232_v32 }
 0x2e6   :  { %v1940_v61 = vpop.f32.mrf.mxu2  ;;  %v2301_v31 = vmul.f32 %v5197_v52, %v2231_v1  ;;  %v2174_v1 = vmul.f32 0.2, %v5090_v54 }
 0x2e7   :  { %v2029_v22 = vpop.f32.mrf.mxu3  ;;  %v1941_v27 = vadd.f32 %v1940_v61, %v1852_v14  ;;  %v1764_v51 = vpop.f32.mrf.mxu0 }
 0x2e8   :  { %v1853_v36 = vpop.f32.mrf.mxu1  ;;  %v2373_v57 = vadd.f32 %v2301_v31, %v2300_v3  ;;  %v1765_v11 = vadd.f32 %v1764_v51, %v5180_v40  ;;  %v2238_v51 = vsel %vm2110_vm14, %v5090_v54, %v2174_v1 }
 0x2e9   :  { %v2030_v45 = vadd.f32 %v2029_v22, %v1941_v27  ;;  %v2308_v32 = vmul.f32 %v5195_v62, %v2238_v51 }
 0x2ea   :  { %2374 = vadd.xlane.f32.xlu1 %v2373_v57  ;;  %v1854_v26 = vadd.f32 %v1853_v36, %v1765_v11  ;;  %v6153_v36 = vld [vmem:[#allocation41_spill] sm:$0xff] }
 0x2eb   :  { %vm2105_vm10 = vcmp.gt.f32.partialorder %v2030_v45, 0.0  ;;  %v2169_v34 = vmul.f32 0.2, %v2030_v45 }
 0x2ed   :  { %v2233_v23 = vsel %vm2105_vm10, %v2030_v45, %v2169_v34 }
 0x2ee   :  { %v1942_v47 = vpop.f32.mrf.mxu2  ;;  %v2303_v17 = vmul.f32 %v5197_v52, %v2233_v23 }
 0x2ef   :  { %v2031_v33 = vpop.f32.mrf.mxu3  ;;  %v1943_v60 = vadd.f32 %v1942_v47, %v1854_v26  ;;  %v1767_v18 = vpop.f32.mrf.mxu0 }
 0x2f0   :  { %v1856_v50 = vpop.f32.mrf.mxu1  ;;  %v2376_v6 = vadd.f32 %v2303_v17, %v2302_v28  ;;  %v1768_v25 = vadd.f32 %v1767_v18, %v5180_v40 }
 0x2f1   :  { %v2032_v53 = vadd.f32 %v2031_v33, %v1943_v60 }
 0x2f2   :  { %2377 = vadd.xlane.f32.xlu2 %v2376_v6  ;;  %1806 = vmatmul.bf16.gmra.mxu0 %v4982_v9  ;;  %v1857_v19 = vadd.f32 %v1856_v50, %v1768_v25  ;;  %v2172_v9 = vmul.f32 0.2, %v5087_v37 }
 0x2f3   :  { %vm2107_vm12 = vcmp.gt.f32.partialorder %v2032_v53, 0.0  ;;  %v2171_v49 = vmul.f32 0.2, %v2032_v53  ;;  %1895 = vmatmul.bf16.gmra.mxu1 %v4984_v24  ;;  %1984 = vmatmul.bf16.gmra.mxu2 %v4994_v5 }
 0x2f4   :  { %2073 = vmatmul.bf16.gmra.mxu3 %v4996_v10  ;;  %v2236_v59 = vsel %vm2108_vm1, %v5087_v37, %v2172_v9  ;;  %v5318_v9 = vperm.slane %v2446_v13, 0 }
 0x2f5   :  { %v2235_v58 = vsel %vm2107_vm12, %v2032_v53, %v2171_v49  ;;  %v2306_v21 = vmul.f32 %v5195_v62, %v2236_v59  ;;  %v2178_v49 = vmul.f32 0.2, %v5100_v46 }
 0x2f6   :  { %v1945_v20 = vpop.f32.mrf.mxu2  ;;  %v2305_v43 = vmul.f32 %v5197_v52, %v2235_v58 }
 0x2f7   :  { %v2034_v38 = vpop.f32.mrf.mxu3  ;;  %v1946_v16 = vadd.f32 %v1945_v20, %v1857_v19  ;;  %v1769_v35 = vpop.f32.mrf.mxu0 }
 0x2f8   :  { %v1858_v42 = vpop.f32.mrf.mxu1  ;;  %v2379_v24 = vadd.f32 %v2305_v43, %v2304_v8  ;;  %v1770_v15 = vadd.f32 %v1769_v35, %v5180_v40  ;;  %v2242_v43 = vsel %vm2114_vm3, %v5100_v46, %v2178_v49 }
 0x2f9   :  { %v2035_v5 = vadd.f32 %v2034_v38, %v1946_v16 }
 0x2fa   :  { %2380 = vadd.xlane.f32.xlu1 %v2379_v24  ;;  %v1859_v39 = vadd.f32 %v1858_v42, %v1770_v15 }
 0x2fb   :  { %vm2109_vm13 = vcmp.gt.f32.partialorder %v2035_v5, 0.0  ;;  %v2173_v10 = vmul.f32 0.2, %v2035_v5 }
 0x2fd   :  { %v2237_v55 = vsel %vm2109_vm13, %v2035_v5, %v2173_v10  ;;  %v2312_v10 = vmul.f32 %v5195_v62, %v2242_v43 }
 0x2fe   :  { %v1947_v56 = vpop.f32.mrf.mxu2  ;;  %v2307_v14 = vmul.f32 %v5197_v52, %v2237_v55 }
 0x2ff   :  { %v2036_v29 = vpop.f32.mrf.mxu3  ;;  %v1948_v61 = vadd.f32 %v1947_v56, %v1859_v39  ;;  %v1772_v22 = vpop.f32.mrf.mxu0  ;;  %v2180_v39 = vmul.f32 0.2, %v5107_v48 }
 0x300   :  { %v1861_v3 = vpop.f32.mrf.mxu1  ;;  %v2382_v31 = vadd.f32 %v2307_v14, %v2306_v21  ;;  %v1773_v27 = vadd.f32 %v1772_v22, %v5180_v40 }
 0x301   :  { %v2037_v4 = vadd.f32 %v2036_v29, %v1948_v61  ;;  %v2244_v22 = vsel %vm2116_vm5, %v5107_v48, %v2180_v39 }
 0x302   :  { %2383 = vadd.xlane.f32.xlu2 %v2382_v31  ;;  %1811 = vmatmul.bf16.gmra.mxu0 %v5010_v12  ;;  %v1862_v57 = vadd.f32 %v1861_v3, %v1773_v27  ;;  %v2176_v12 = vmul.f32 0.2, %v5097_v44 }
 0x303   :  { %vm2111_vm15 = vcmp.gt.f32.partialorder %v2037_v4, 0.0  ;;  %v2175_v37 = vmul.f32 0.2, %v2037_v4  ;;  %1900 = vmatmul.bf16.gmra.mxu1 %v5012_v0  ;;  %1989 = vmatmul.bf16.gmra.mxu2 %v5022_v7 }
 0x304   :  { %2078 = vmatmul.bf16.gmra.mxu3 %v6153_v36  ;;  %v2240_v17 = vsel %vm2112_vm0, %v5097_v44, %v2176_v12  ;;  %v2314_v36 = vmul.f32 %v5195_v62, %v2244_v22 }
 0x305   :  { %v2239_v45 = vsel %vm2111_vm15, %v2037_v4, %v2175_v37  ;;  %v2310_v53 = vmul.f32 %v5195_v62, %v2240_v17 }
 0x306   :  { %v1950_v11 = vpop.f32.mrf.mxu2  ;;  %v2309_v26 = vmul.f32 %v5197_v52, %v2239_v45 }
 0x307   :  { %v2039_v34 = vpop.f32.mrf.mxu3  ;;  %v1951_v23 = vadd.f32 %v1950_v11, %v1862_v57  ;;  %v1774_v47 = vpop.f32.mrf.mxu0 }
 0x308   :  { %v1863_v33 = vpop.f32.mrf.mxu1  ;;  %v2385_v0 = vadd.f32 %v2309_v26, %v2308_v32  ;;  %v1775_v54 = vadd.f32 %v1774_v47, %v5180_v40  ;;  %v2182_v32 = vmul.f32 0.2, %v5110_v30 }
 0x309   :  { %v2040_v7 = vadd.f32 %v2039_v34, %v1951_v23 }
 0x30a   :  { %2386 = vadd.xlane.f32.xlu1 %v2385_v0  ;;  %v1864_v60 = vadd.f32 %v1863_v33, %v1775_v54 }
 0x30b   :  { %vm2113_vm2 = vcmp.gt.f32.partialorder %v2040_v7, 0.0  ;;  %v2177_v28 = vmul.f32 0.2, %v2040_v7 }
 0x30d   :  { %v2241_v18 = vsel %vm2113_vm2, %v2040_v7, %v2177_v28  ;;  %v2246_v7 = vsel %vm2118_vm7, %v5110_v30, %v2182_v32 }
 0x30e   :  { %v1952_v50 = vpop.f32.mrf.mxu2  ;;  %v2311_v25 = vmul.f32 %v5197_v52, %v2241_v18  ;;  %v6154_v18 = vld [vmem:[#allocation9_spill] sm:$0xff] }
 0x30f   :  { %v2041_v6 = vpop.f32.mrf.mxu3  ;;  %v1953_v41 = vadd.f32 %v1952_v50, %v1864_v60  ;;  %v1777_v19 = vpop.f32.mrf.mxu0  ;;  %v2184_v50 = vmul.f32 0.2, %v6154_v18  ;;  %vm2120_vm9 = vcmp.gt.f32.partialorder %v6154_v18, 0.0 }
 0x310   :  { %v1866_v58 = vpop.f32.mrf.mxu1  ;;  %v2388_v20 = vadd.f32 %v2311_v25, %v2310_v53  ;;  %v1778_v44 = vadd.f32 %v1777_v19, %v5180_v40  ;;  %v2316_v53 = vmul.f32 %v5195_v62, %v2246_v7 }
 0x311   :  { %v2042_v38 = vadd.f32 %v2041_v6, %v1953_v41  ;;  %v2248_v43 = vsel %vm2120_vm9, %v6154_v18, %v2184_v50 }
 0x312   :  { %2389 = vadd.xlane.f32.xlu2 %v2388_v20  ;;  %v1867_v16 = vadd.f32 %v1866_v58, %v1778_v44 }
 0x313   :  { %vm2115_vm4 = vcmp.gt.f32.partialorder %v2042_v38, 0.0  ;;  %v2179_v8 = vmul.f32 0.2, %v2042_v38 }
 0x315   :  { %v2348_v35 = vpop.xlane.xlu0 %2347  ;;  %v2243_v42 = vsel %vm2115_vm4, %v2042_v38, %v2179_v8 }
 0x316   :  { %v2449_v24 = vadd.f32 %v5318_v9, %v2348_v35  ;;  %v1955_v5 = vpop.f32.mrf.mxu2  ;;  %v2313_v59 = vmul.f32 %v5197_v52, %v2243_v42 }
 0x317   :  { %v2044_v15 = vpop.f32.mrf.mxu3  ;;  %v1956_v55 = vadd.f32 %v1955_v5, %v1867_v16  ;;  %v1779_v56 = vpop.f32.mrf.mxu0 }
 0x318   :  { %v4208_v46 = vmul.f32 -1.442695, %v2449_v24  ;;  %v2391_v29 = vadd.f32 %v2313_v59, %v2312_v10  ;;  %v1780_v14 = vadd.f32 %v1779_v56, %v5180_v40  ;;  %v1868_v1 = vpop.f32.mrf.mxu1 }
 0x319   :  { %v2045_v21 = vadd.f32 %v2044_v15, %v1956_v55 }
 0x31a   :  { %4312 = vpow2.f32 %v4208_v46  ;;  %2392 = vadd.xlane.f32.xlu0 %v2391_v29  ;;  %v1869_v3 = vadd.f32 %v1868_v1, %v1780_v14  ;;  %v2318_v46 = vmul.f32 %v5195_v62, %v2248_v43 }
 0x31b   :  { %vm2117_vm6 = vcmp.gt.f32.partialorder %v2045_v21, 0.0  ;;  %v2181_v61 = vmul.f32 0.2, %v2045_v21 }
 0x31d   :  { %v2351_v31 = vpop.xlane.xlu1 %2350  ;;  %v2245_v4 = vsel %vm2117_vm6, %v2045_v21, %v2181_v61 }
 0x31e   :  { %v2450_v27 = vadd.f32 %v5318_v9, %v2351_v31  ;;  %v1957_v37 = vpop.f32.mrf.mxu2  ;;  %v2315_v57 = vmul.f32 %v5197_v52, %v2245_v4 }
 0x31f   :  { %v2046_v51 = vpop.f32.mrf.mxu3  ;;  %v1958_v45 = vadd.f32 %v1957_v37, %v1869_v3  ;;  %v1782_v11 = vpop.f32.mrf.mxu0 }
 0x320   :  { %v4313_v34 = vpop.eup %4312  ;;  %v4209_v26 = vmul.f32 -1.442695, %v2450_v27  ;;  %v2394_v12 = vadd.f32 %v2315_v57, %v2314_v36  ;;  %v1783_v47 = vadd.f32 %v1782_v11, %v5180_v40  ;;  %v1871_v0 = vpop.f32.mrf.mxu1 }
 0x321   :  { %v2577_v48 = vadd.f32 1.0, %v4313_v34  ;;  %v2047_v23 = vadd.f32 %v2046_v51, %v1958_v45 }
 0x322   :  { %4314 = vpow2.f32 %v4209_v26  ;;  %2395 = vadd.xlane.f32.xlu1 %v2394_v12  ;;  %v1872_v54 = vadd.f32 %v1871_v0, %v1783_v47 }
 0x323   :  { %4316 = vrcp.f32 %v2577_v48  ;;  %vm2119_vm8 = vcmp.gt.f32.partialorder %v2047_v23, 0.0  ;;  %v2183_v33 = vmul.f32 0.2, %v2047_v23  ;;  %v2618_v24 = vand.u32 2147483647, %v2577_v48 }
 0x324   :  { %v2620_v5 = vand.u32 2147483648, %v2577_v48  ;;  %vm2614_vm12 = vweird.f32 %v2577_v48 }
 0x325   :  { %v2354_v28 = vpop.xlane.xlu1 %2353  ;;  %v2247_v60 = vsel %vm2119_vm8, %v2047_v23, %v2183_v33  ;;  %vm2619_vm13 = vcmp.eq.f32.partialorder %v2618_v24, 8.507059e+37  ;;  %v6155_v23 = vld [vmem:[#allocation10_spill] sm:$0xff] }
 0x326   :  { %v2451_v17 = vadd.f32 %v5318_v9, %v2354_v28  ;;  %v1960_v13 = vpop.f32.mrf.mxu2  ;;  %v2317_v25 = vmul.f32 %v5197_v52, %v2247_v60  ;;  %v2621_v3 = vor.u32 1.1754944e-38, %v2620_v5  ;;  %v2186_v47 = vmul.f32 0.2, %v6155_v23 }
 0x327   :  { %v1961_v6 = vadd.f32 %v1960_v13, %v1872_v54  ;;  %v2049_v19 = vpop.f32.mrf.mxu3  ;;  %v1784_v38 = vpop.f32.mrf.mxu0  ;;  %vm2122_vm15 = vcmp.gt.f32.partialorder %v6155_v23, 0.0 }
 0x328   :  { %v4315_v49 = vpop.eup %4314  ;;  %v4210_v41 = vmul.f32 -1.442695, %v2451_v17  ;;  %v2397_v44 = vadd.f32 %v2317_v25, %v2316_v53  ;;  %v1785_v42 = vadd.f32 %v1784_v38, %v5180_v40  ;;  %v1873_v55 = vpop.f32.mrf.mxu1 }
 0x329   :  { %v4317_v58 = vpop.eup %4316  ;;  %v5339_v30 = vadd.f32 1.0, %v4315_v49  ;;  %v2050_v20 = vadd.f32 %v2049_v19, %v1961_v6 }
 0x32a   :  { %v2610_v8 = vmul.f32 %v4317_v58, %v2577_v48  ;;  %4318 = vpow2.f32 %v4210_v41  ;;  %2398 = vadd.xlane.f32.xlu2 %v2397_v44  ;;  %vm2615_vm11 = vweird.f32 %v4317_v58  ;;  %v1874_v1 = vadd.f32 %v1873_v55, %v1785_v42 }
 0x32b   :  { %4320 = vrcp.f32 %v5339_v30  ;;  %vm2121_vm10 = vcmp.gt.f32.partialorder %v2050_v20, 0.0  ;;  %v2185_v35 = vmul.f32 0.2, %v2050_v20  ;;  %vm2616_vm1 = vmor %vm2614_vm12, %vm2615_vm11  ;;  %v2635_v17 = vand.u32 2147483648, %v5339_v30 }
 0x32c   :  { %v2611_v16 = vsub.f32 1.0, %v2610_v8  ;;  %vm2629_vm0 = vweird.f32 %v5339_v30  ;;  %v2633_v18 = vand.u32 2147483647, %v5339_v30 }
 0x32d   :  { %v2357_v15 = vpop.xlane.xlu2 %2356  ;;  %v2249_v39 = vsel %vm2121_vm10, %v2050_v20, %v2185_v35  ;;  %v2636_v41 = vor.u32 1.1754944e-38, %v2635_v17 }
 0x32e   :  { %v2612_v10 = vmul.f32 %v4317_v58, %v2611_v16  ;;  %v2452_v59 = vadd.f32 %v5318_v9, %v2357_v15  ;;  %v1962_v56 = vpop.f32.mrf.mxu2  ;;  %v2319_v29 = vmul.f32 %v5197_v52, %v2249_v39  ;;  %vm2634_vm4 = vcmp.eq.f32.partialorder %v2633_v18, 8.507059e+37 }
 0x32f   :  { %v1963_v51 = vadd.f32 %v1962_v56, %v1874_v1  ;;  %v2051_v32 = vpop.f32.mrf.mxu3 }
 0x330   :  { %v4319_v21 = vpop.eup %4318  ;;  %v2613_v14 = vadd.f32 %v4317_v58, %v2612_v10  ;;  %v4211_v61 = vmul.f32 -1.442695, %v2452_v59  ;;  %v2400_v4 = vadd.f32 %v2319_v29, %v2318_v46 }
 0x331   :  { %v4321_v22 = vpop.eup %4320  ;;  %v5347_v31 = vadd.f32 1.0, %v4319_v21  ;;  %v2052_v48 = vadd.f32 %v2051_v32, %v1963_v51 }
 0x332   :  { %v2617_v27 = vsel %vm2616_vm1, %v4317_v58, %v2613_v14  ;;  %v2625_v37 = vmul.f32 %v4321_v22, %v5339_v30  ;;  %4322 = vpow2.f32 %v4211_v61  ;;  %2401 = vadd.xlane.f32.xlu0 %v2400_v4  ;;  %vm2630_vm14 = vweird.f32 %v4321_v22 }
 0x333   :  { %v2622_v36 = vsel %vm2619_vm13, %v2621_v3, %v2617_v27  ;;  %4324 = vrcp.f32 %v5347_v31  ;;  %v2187_v53 = vmul.f32 0.2, %v2052_v48  ;;  %vm2631_vm2 = vmor %vm2629_vm0, %vm2630_vm14  ;;  %vm2123_vm3 = vcmp.gt.f32.partialorder %v2052_v48, 0.0 }
 0x334   :  { %v3121_v57 = vperm.slane %v2622_v36, 0  ;;  %v3122_v45 = vperm.slane %v2622_v36, 1  ;;  %v3123_v11 = vperm.slane %v2622_v36, 2  ;;  %v3124_v34 = vperm.slane %v2622_v36, 3 }
 0x335   :  { %v3125_v26 = vperm.slane %v2622_v36, 4  ;;  %v2626_v12 = vsub.f32 1.0, %v2625_v37  ;;  %v3126_v33 = vperm.slane %v2622_v36, 5  ;;  %v2360_v0 = vpop.xlane.xlu2 %2359  ;;  %v3127_v54 = vperm.slane %v2622_v36, 6 }
 0x336   :  { %3377 = vst [vmem:[#allocation1] ss:$9 sm:$0xff] %v3121_v57  ;;  %v3128_v60 = vperm.slane %v2622_v36, 7  ;;  %v2453_v25 = vadd.f32 %v5318_v9, %v2360_v0  ;;  %v2250_v58 = vsel %vm2122_vm15, %v6155_v23, %v2186_v47  ;;  %v2251_v44 = vsel %vm2123_vm3, %v2052_v48, %v2187_v53  ;;  %v1787_v48 = vpop.f32.mrf.mxu0 }
 0x337   :  { %3379 = vst [vmem:[#allocation1 + $0x1] ss:$9 sm:$0xff] %v3122_v45  ;;  %v2627_v28 = vmul.f32 %v4321_v22, %v2626_v12  ;;  %v2320_v43 = vmul.f32 %v5195_v62, %v2250_v58  ;;  %v2321_v16 = vmul.f32 %v5197_v52, %v2251_v44  ;;  %v2650_v21 = vand.u32 2147483648, %v5347_v31 }
 0x338   :  { %v4323_v7 = vpop.eup %4322  ;;  %3381 = vst [vmem:[#allocation1 + $0x2] ss:$9 sm:$0xff] %v3123_v11  ;;  %v4212_v38 = vmul.f32 -1.442695, %v2453_v25  ;;  %vm2644_vm6 = vweird.f32 %v5347_v31  ;;  %v2648_v61 = vand.u32 2147483647, %v5347_v31  ;;  %v1876_v25 = vpop.f32.mrf.mxu1 }
 0x339   :  { %v5353_v13 = vpop.eup %4324  ;;  %3383 = vst [vmem:[#allocation1 + $0x3] ss:$9 sm:$0xff] %v3124_v34  ;;  %v2628_v50 = vadd.f32 %v4321_v22, %v2627_v28  ;;  %v5361_v19 = vadd.f32 1.0, %v4323_v7  ;;  %v2403_v5 = vadd.f32 %v2321_v16, %v2320_v43  ;;  %v2651_v27 = vor.u32 1.1754944e-38, %v2650_v21  ;;  %v2054_v16 = vpop.f32.mrf.mxu3 }
 0x33a   :  { %3385 = vst [vmem:[#allocation1 + $0x4] ss:$9 sm:$0xff] %v3125_v26  ;;  %v2640_v6 = vmul.f32 %v5353_v13, %v5347_v31  ;;  %vm2645_vm5 = vweird.f32 %v5353_v13  ;;  %vm2649_vm8 = vcmp.eq.f32.partialorder %v2648_v61, 8.507059e+37 }
 0x33b   :  { %3387 = vst [vmem:[#allocation1 + $0x5] ss:$9 sm:$0xff] %v3126_v33  ;;  %v2632_v49 = vsel %vm2631_vm2, %v4321_v22, %v2628_v50  ;;  %4326 = vrcp.f32 %v5361_v19  ;;  %2404 = vadd.xlane.f32.xlu1 %v2403_v5  ;;  %vm2646_vm7 = vmor %vm2644_vm6, %vm2645_vm5  ;;  %vm2659_vm10 = vweird.f32 %v5361_v19 }
 0x33c   :  { %3389 = vst [vmem:[#allocation1 + $0x6] ss:$9 sm:$0xff] %v3127_v54  ;;  %v2637_v30 = vsel %vm2634_vm4, %v2636_v41, %v2632_v49  ;;  %v2641_v20 = vsub.f32 1.0, %v2640_v6  ;;  %4328 = vpow2.f32 %v4212_v38  ;;  %v2665_v54 = vand.u32 2147483648, %v5361_v19  ;;  %v1965_v49 = vpop.f32.mrf.mxu2 }
 0x33d   :  { %3391 = vst [vmem:[#allocation1 + $0x7] ss:$9 sm:$0xff] %v3128_v60  ;;  %v3129_v8 = vperm.slane %v2637_v30, 0  ;;  %v3130_v35 = vperm.slane %v2637_v30, 1  ;;  %v3131_v24 = vperm.slane %v2637_v30, 2  ;;  %v3132_v10 = vperm.slane %v2637_v30, 3  ;;  %v2363_v46 = vpop.xlane.xlu1 %2362 }
 0x33e   :  { %v2642_v42 = vmul.f32 %v5353_v13, %v2641_v20  ;;  %v3133_v59 = vperm.slane %v2637_v30, 4  ;;  %v3134_v55 = vperm.slane %v2637_v30, 5  ;;  %v3135_v29 = vperm.slane %v2637_v30, 6 }
 0x33f   :  { %v3136_v1 = vperm.slane %v2637_v30, 7  ;;  %v2454_v3 = vadd.f32 %v5318_v9, %v2363_v46  ;;  %v1788_v60 = vadd.f32 %v1787_v48, %v5180_v40  ;;  %v2666_v53 = vor.u32 1.1754944e-38, %v2665_v54 }
 0x340   :  { %v2643_v56 = vadd.f32 %v5353_v13, %v2642_v42 }
 0x341   :  { %v5370_v39 = vpop.eup %4326  ;;  %v4213_v57 = vmul.f32 -1.442695, %v2454_v3 }
 0x342   :  { %v4329_v14 = vpop.eup %4328  ;;  %v2655_v22 = vmul.f32 %v5370_v39, %v5361_v19  ;;  %v2647_v4 = vsel %vm2646_vm7, %v5353_v13, %v2643_v56  ;;  %vm2660_vm9 = vweird.f32 %v5370_v39  ;;  %v2663_v13 = vand.u32 2147483647, %v5361_v19 }
 0x343   :  { %v5381_v37 = vadd.f32 1.0, %v4329_v14  ;;  %v2652_v51 = vsel %vm2649_vm8, %v2651_v27, %v2647_v4  ;;  %vm2661_vm11 = vmor %vm2659_vm10, %vm2660_vm9  ;;  %v1877_v19 = vadd.f32 %v1876_v25, %v1788_v60  ;;  %v1878_v27 = vpop.f32.mrf.mxu1 }
 0x344   :  { %v3392_v15 = vld [vmem:[#allocation1] sm:$0xff]  ;;  %v2656_v36 = vsub.f32 1.0, %v2655_v22  ;;  %v3137_v31 = vperm.slane %v2652_v51, 0  ;;  %v3138_v45 = vperm.slane %v2652_v51, 1  ;;  %v3139_v34 = vperm.slane %v2652_v51, 2 }
 0x345   :  { %3393 = vst [vmem:[#allocation1] ss:$9 sm:$0xff] %v3129_v8  ;;  %3673 = vperm.xlu2 %4310, %v3392_v15   ;;  %4330 = vrcp.f32 %v5381_v37  ;;  %v3140_v26 = vperm.slane %v2652_v51, 3  ;;  %v3141_v12 = vperm.slane %v2652_v51, 4  ;;  %v3142_v47 = vperm.slane %v2652_v51, 5  ;;  %v2366_v0 = vpop.xlane.xlu2 %2365 }
 0x346   :  { %3394 = vst [vmem:[#allocation1 + $0x1] ss:$9 sm:$0xff] %v3130_v35  ;;  %v2657_v11 = vmul.f32 %v5370_v39, %v2656_v36  ;;  %4332 = vpow2.f32 %v4213_v57  ;;  %v3143_v7 = vperm.slane %v2652_v51, 6  ;;  %v3144_v17 = vperm.slane %v2652_v51, 7  ;;  %v1789_v35 = vpop.f32.mrf.mxu0  ;;  %v1967_v51 = vpop.f32.mrf.mxu2 }
 0x347   :  { %3395 = vst [vmem:[#allocation1 + $0x2] ss:$9 sm:$0xff] %v3131_v24  ;;  %v2455_v50 = vadd.f32 %v5318_v9, %v2366_v0  ;;  %vm2664_vm12 = vcmp.eq.f32.partialorder %v2663_v13, 8.507059e+37  ;;  %v1966_v38 = vadd.f32 %v1965_v49, %v1877_v19  ;;  %v2680_v14 = vand.u32 2147483648, %v5381_v37  ;;  %v6159_v19 = vld [vmem:[#allocation12_spill] sm:$0xff] }
 0x348   :  { %3396 = vst [vmem:[#allocation1 + $0x3] ss:$9 sm:$0xff] %v3132_v10  ;;  %v2658_v33 = vadd.f32 %v5370_v39, %v2657_v11  ;;  %v6156_v10 = vld [vmem:[#allocation11_spill] sm:$0xff]  ;;  %vm2674_vm14 = vweird.f32 %v5381_v37  ;;  %v2678_v3 = vand.u32 2147483647, %v5381_v37  ;;  %v1790_v4 = vadd.f32 %v1789_v35, %v5180_v40 }
 0x349   :  { %3397 = vst [vmem:[#allocation1 + $0x4] ss:$9 sm:$0xff] %v3133_v59  ;;  %v4214_v20 = vmul.f32 -1.442695, %v2455_v50  ;;  %v2055_v24 = vadd.f32 %v2054_v16, %v1966_v38  ;;  %v2188_v59 = vmul.f32 0.2, %v6156_v10 }
 0x34a   :  { %3398 = vst [vmem:[#allocation1 + $0x5] ss:$9 sm:$0xff] %v3134_v55  ;;  %v2662_v6 = vsel %vm2661_vm11, %v5370_v39, %v2658_v33  ;;  %vm2124_vm1 = vcmp.gt.f32.partialorder %v6156_v10, 0.0  ;;  %v2681_v11 = vor.u32 1.1754944e-38, %v2680_v14  ;;  %vm2679_vm2 = vcmp.eq.f32.partialorder %v2678_v3, 8.507059e+37 }
 0x34b   :  { %3399 = vst [vmem:[#allocation1 + $0x6] ss:$9 sm:$0xff] %v3135_v29  ;;  %v5385_v23 = vpop.eup %4330  ;;  %v2667_v58 = vsel %vm2664_vm12, %v2666_v53, %v2662_v6  ;;  %vm2125_vm0 = vcmp.gt.f32.partialorder %v2055_v24, 0.0  ;;  %v5434_v6 = vpop.f32.mrf.mxu1  ;;  %vm2126_vm3 = vcmp.gt.f32.partialorder %v6159_v19, 0.0 }
 0x34c   :  { %3400 = vst [vmem:[#allocation1 + $0x7] ss:$9 sm:$0xff] %v3136_v1  ;;  %v4333_v28 = vpop.eup %4332  ;;  %v2670_v18 = vmul.f32 %v5385_v23, %v5381_v37  ;;  %v3145_v44 = vperm.slane %v2667_v58, 0  ;;  %v3146_v8 = vperm.slane %v2667_v58, 1  ;;  %v3147_v42 = vperm.slane %v2667_v58, 2 }
 0x34d   :  { %v5397_v41 = vadd.f32 1.0, %v4333_v28  ;;  %v3148_v15 = vperm.slane %v2667_v58, 3  ;;  %v3149_v39 = vperm.slane %v2667_v58, 4  ;;  %v3150_v56 = vperm.slane %v2667_v58, 5  ;;  %v2369_v29 = vpop.xlane.xlu1 %2368  ;;  %v2056_v28 = vpop.f32.mrf.mxu3 }
 0x34e   :  { %v2671_v30 = vsub.f32 1.0, %v2670_v18  ;;  %vm2675_vm13 = vweird.f32 %v5385_v23  ;;  %v3151_v21 = vperm.slane %v2667_v58, 6  ;;  %v2189_v1 = vmul.f32 0.2, %v2055_v24  ;;  %v5436_v53 = vpop.f32.mrf.mxu2 }
 0x34f   :  { %4334 = vrcp.f32 %v5397_v41  ;;  %v3152_v22 = vperm.slane %v2667_v58, 7  ;;  %vm5413_vm15 = vmor %vm2674_vm14, %vm2675_vm13  ;;  %v2252_v37 = vsel %vm2124_vm1, %v6156_v10, %v2188_v59  ;;  %v2190_v58 = vmul.f32 0.2, %v6159_v19  ;;  %v6163_v10 = vld [vmem:[#allocation13_spill] sm:$0xff] }
 0x350   :  { %v2672_v43 = vmul.f32 %v5385_v23, %v2671_v30  ;;  %4336 = vpow2.f32 %v4214_v20  ;;  %v2322_v48 = vmul.f32 %v5195_v62, %v2252_v37  ;;  %v2695_v16 = vand.u32 2147483648, %v5397_v41 }
 0x351   :  { %vm2689_vm5 = vweird.f32 %v5397_v41  ;;  %vm2128_vm14 = vcmp.gt.f32.partialorder %v6163_v10, 0.0 }
 0x352   :  { %v2673_v46 = vadd.f32 %v5385_v23, %v2672_v43 }
 0x353   :  { %v3401_v32 = vld [vmem:[#allocation1] sm:$0xff] }
 0x354   :  { %3402 = vst [vmem:[#allocation1] ss:$9 sm:$0xff] %v3137_v31  ;;  %3676 = vperm.xlu0 %4309, %v3401_v32   ;;  %v2456_v31 = vadd.f32 %v5318_v9, %v2369_v29  ;;  %v1879_v32 = vadd.f32 %v1878_v27, %v1790_v4  ;;  %v1883_v4 = vpop.f32.mrf.mxu1 }
 0x355   :  { %3403 = vst [vmem:[#allocation1 + $0x1] ss:$9 sm:$0xff] %v3138_v45  ;;  %v5402_v55 = vpop.eup %4334  ;;  %v2677_v45 = vsel %vm5413_vm15, %v5385_v23, %v2673_v46  ;;  %v2254_v46 = vsel %vm2126_vm3, %v6159_v19, %v2190_v58 }
 0x356   :  { %3404 = vst [vmem:[#allocation1 + $0x2] ss:$9 sm:$0xff] %v3139_v34  ;;  %v4337_v61 = vpop.eup %4336  ;;  %v2685_v57 = vmul.f32 %v5402_v55, %v5397_v41  ;;  %v4215_v0 = vmul.f32 -1.442695, %v2456_v31  ;;  %v1968_v54 = vadd.f32 %v1967_v51, %v1879_v32  ;;  %vm2690_vm4 = vweird.f32 %v5402_v55  ;;  %v1972_v27 = vpop.f32.mrf.mxu2 }
 0x357   :  { %3405 = vst [vmem:[#allocation1 + $0x3] ss:$9 sm:$0xff] %v3140_v26  ;;  %v5426_v34 = vadd.f32 1.0, %v4337_v61  ;;  %v5428_v26 = vpop.f32.mrf.mxu0  ;;  %vm5449_vm6 = vmor %vm2689_vm5, %vm2690_vm4  ;;  %v2324_v61 = vmul.f32 %v5195_v62, %v2254_v46 }
 0x358   :  { %3406 = vst [vmem:[#allocation1 + $0x4] ss:$9 sm:$0xff] %v3141_v12  ;;  %v2253_v12 = vsel %vm2125_vm0, %v2055_v24, %v2189_v1  ;;  %v2686_v33 = vsub.f32 1.0, %v2685_v57  ;;  %v2057_v50 = vadd.f32 %v2056_v28, %v1968_v54  ;;  %v1793_v37 = vadd.f32 %v5428_v26, %v5180_v40 }
 0x359   :  { %3407 = vst [vmem:[#allocation1 + $0x5] ss:$9 sm:$0xff] %v3142_v47  ;;  %v2682_v47 = vsel %vm2679_vm2, %v2681_v11, %v2677_v45  ;;  %4338 = vrcp.f32 %v5426_v34  ;;  %vm2704_vm11 = vweird.f32 %v5426_v34  ;;  %v2708_v58 = vand.u32 2147483647, %v5426_v34 }
 0x35a   :  { %3408 = vst [vmem:[#allocation1 + $0x6] ss:$9 sm:$0xff] %v3143_v7  ;;  %v2323_v7 = vmul.f32 %v5197_v52, %v2253_v12  ;;  %v3154_v13 = vperm.slane %v2682_v47, 1  ;;  %v2687_v60 = vmul.f32 %v5402_v55, %v2686_v33  ;;  %4340 = vpow2.f32 %v4215_v0 }
 0x35b   :  { %3409 = vst [vmem:[#allocation1 + $0x7] ss:$9 sm:$0xff] %v3144_v17  ;;  %v3153_v17 = vperm.slane %v2682_v47, 0  ;;  %v3155_v18 = vperm.slane %v2682_v47, 2  ;;  %v3156_v49 = vperm.slane %v2682_v47, 3  ;;  %v3157_v30 = vperm.slane %v2682_v47, 4 }
 0x35c   :  { %v2406_v23 = vadd.f32 %v2323_v7, %v2322_v48  ;;  %v3158_v38 = vperm.slane %v2682_v47, 5  ;;  %v3159_v43 = vperm.slane %v2682_v47, 6  ;;  %v2191_v35 = vmul.f32 0.2, %v2057_v50 }
 0x35d   :  { %vm2127_vm7 = vcmp.gt.f32.partialorder %v2057_v50, 0.0  ;;  %v1882_v7 = vadd.f32 %v5434_v6, %v1793_v37  ;;  %vm2709_vm13 = vcmp.eq.f32.partialorder %v2708_v58, 8.507059e+37 }
 0x35e   :  { %v2255_v1 = vsel %vm2127_vm7, %v2057_v50, %v2191_v35  ;;  %v2710_v50 = vand.u32 2147483648, %v5426_v34 }
 0x35f   :  { %v5441_v20 = vpop.eup %4338  ;;  %v2325_v36 = vmul.f32 %v5197_v52, %v2255_v1 }
 0x360   :  { %v4341_v24 = vpop.eup %4340  ;;  %v2700_v59 = vmul.f32 %v5441_v20, %v5426_v34  ;;  %vm2705_vm9 = vweird.f32 %v5441_v20 }
 0x361   :  { %v5465_v14 = vadd.f32 1.0, %v4341_v24  ;;  %vm2706_vm12 = vmor %vm2704_vm11, %vm2705_vm9  ;;  %vm2134_vm9 = vcmp.gt.f32.partialorder %v5150_v63, 0.0 }
 0x362   :  { %v3410_v5 = vld [vmem:[#allocation1] sm:$0xff]  ;;  %v2701_v3 = vsub.f32 1.0, %v2700_v59  ;;  %v2192_v59 = vmul.f32 0.2, %v6163_v10 }
 0x363   :  { %3411 = vst [vmem:[#allocation1] ss:$9 sm:$0xff] %v3145_v44  ;;  %3679 = vperm.xlu1 %4311, %v3410_v5   ;;  %v2688_v44 = vadd.f32 %v5402_v55, %v2687_v60  ;;  %v3160_v5 = vperm.slane %v2682_v47, 7  ;;  %4342 = vrcp.f32 %v5465_v14  ;;  %v2725_v37 = vand.u32 2147483648, %v5465_v14 }
 0x364   :  { %3412 = vst [vmem:[#allocation1 + $0x1] ss:$9 sm:$0xff] %v3146_v8  ;;  %v2372_v8 = vpop.xlane.xlu2 %2371  ;;  %v2702_v32 = vmul.f32 %v5441_v20, %v2701_v3  ;;  %v2256_v3 = vsel %vm2128_vm14, %v6163_v10, %v2192_v59  ;;  %vm2719_vm2 = vweird.f32 %v5465_v14 }
 0x365   :  { %3413 = vst [vmem:[#allocation1 + $0x2] ss:$9 sm:$0xff] %v3147_v42  ;;  %v1794_v42 = vpop.f32.mrf.mxu0 }
 0x366   :  { %3414 = vst [vmem:[#allocation1 + $0x3] ss:$9 sm:$0xff] %v3148_v15  ;;  %v2693_v15 = vand.u32 2147483647, %v5397_v41  ;;  %v2692_v41 = vsel %vm5449_vm6, %v5402_v55, %v2688_v44  ;;  %v1795_v29 = vadd.f32 %v1794_v42, %v5180_v40  ;;  %v2409_v55 = vadd.f32 %v2325_v36, %v2324_v61 }
 0x367   :  { %3415 = vst [vmem:[#allocation1 + $0x4] ss:$9 sm:$0xff] %v3149_v39  ;;  %v5455_v39 = vpop.f32.mrf.mxu3  ;;  %v2703_v26 = vadd.f32 %v5441_v20, %v2702_v32 }
 0x368   :  { %3416 = vst [vmem:[#allocation1 + $0x5] ss:$9 sm:$0xff] %v3150_v56  ;;  %v2457_v56 = vadd.f32 %v5318_v9, %v2372_v8  ;;  %vm2694_vm8 = vcmp.eq.f32.partialorder %v2693_v15, 8.507059e+37  ;;  %v1884_v57 = vadd.f32 %v1883_v4, %v1795_v29  ;;  %v2711_v8 = vor.u32 1.1754944e-38, %v2710_v50 }
 0x369   :  { %3417 = vst [vmem:[#allocation1 + $0x6] ss:$9 sm:$0xff] %v3151_v21  ;;  %v2696_v21 = vor.u32 1.1754944e-38, %v2695_v16  ;;  %v5476_v28 = vpop.eup %4342 }
 0x36a   :  { %3418 = vst [vmem:[#allocation1 + $0x7] ss:$9 sm:$0xff] %v3152_v22  ;;  %v4216_v51 = vmul.f32 -1.442695, %v2457_v56  ;;  %v1973_v45 = vadd.f32 %v1972_v27, %v1884_v57  ;;  %vm2720_vm0 = vweird.f32 %v5476_v28 }
 0x36b   :  { %v2697_v22 = vsel %vm2694_vm8, %v2696_v21, %v2692_v41  ;;  %vm2721_vm3 = vmor %vm2719_vm2, %vm2720_vm0 }
 0x36c   :  { %v3161_v31 = vperm.slane %v2697_v22, 0  ;;  %v3162_v11 = vperm.slane %v2697_v22, 1  ;;  %4344 = vpow2.f32 %v4216_v51  ;;  %v3163_v12 = vperm.slane %v2697_v22, 2 }
 0x36d   :  { %v3164_v47 = vperm.slane %v2697_v22, 3  ;;  %v3165_v0 = vperm.slane %v2697_v22, 4  ;;  %v3168_v6 = vperm.slane %v2697_v22, 7 }
 0x36e   :  { %2407 = vadd.xlane.f32.xlu2 %v2406_v23  ;;  %v3166_v23 = vperm.slane %v2697_v22, 5 }
 0x36f   :  { %v2061_v33 = vpop.f32.mrf.mxu3 }
 0x370   :  { %v2062_v54 = vadd.f32 %v2061_v33, %v1973_v45  ;;  %v2326_v45 = vmul.f32 %v5195_v62, %v2256_v3  ;;  %v2198_v3 = vmul.f32 0.2, %v5150_v63 }
 0x371   :  { %v5438_v25 = vld [vmem:[#allocation1] sm:$0xff] }
 0x372   :  { %3420 = vst [vmem:[#allocation1] ss:$9 sm:$0xff] %v3153_v17  ;;  %v2375_v17 = vpop.xlane.xlu1 %2374  ;;  %v4345_v19 = vpop.eup %4344  ;;  %vm2131_vm1 = vcmp.gt.f32.partialorder %v2062_v54, 0.0 }
 0x373   :  { %3421 = vst [vmem:[#allocation1 + $0x1] ss:$9 sm:$0xff] %v3154_v13  ;;  %v6162_v13 = vld [vmem:[#allocation14_spill] sm:$0xff]  ;;  %v2458_v44 = vadd.f32 %v5318_v9, %v2375_v17  ;;  %v5491_v16 = vadd.f32 1.0, %v4345_v19 }
 0x374   :  { %3422 = vst [vmem:[#allocation1 + $0x2] ss:$9 sm:$0xff] %v3155_v18  ;;  %v2194_v60 = vmul.f32 0.2, %v6162_v13  ;;  %v3167_v18 = vperm.slane %v2697_v22, 6  ;;  %vm2130_vm10 = vcmp.gt.f32.partialorder %v6162_v13, 0.0  ;;  %v5504_v22 = vpop.f32.mrf.mxu0 }
 0x375   :  { %3423 = vst [vmem:[#allocation1 + $0x3] ss:$9 sm:$0xff] %v3156_v49  ;;  %v1971_v49 = vadd.f32 %v5436_v53, %v1882_v7  ;;  %v2707_v53 = vsel %vm2706_vm12, %v5441_v20, %v2703_v26  ;;  %v4217_v24 = vmul.f32 -1.442695, %v2458_v44  ;;  %4346 = vrcp.f32 %v5491_v16 }
 0x376   :  { %3424 = vst [vmem:[#allocation1 + $0x4] ss:$9 sm:$0xff] %v3157_v30  ;;  %v2715_v30 = vmul.f32 %v5476_v28, %v5465_v14  ;;  %v2258_v34 = vsel %vm2130_vm10, %v6162_v13, %v2194_v60  ;;  %v2712_v35 = vsel %vm2709_vm13, %v2711_v8, %v2707_v53  ;;  %v2726_v26 = vor.u32 1.1754944e-38, %v2725_v37 }
 0x377   :  { %3425 = vst [vmem:[#allocation1 + $0x5] ss:$9 sm:$0xff] %v3158_v38  ;;  %v2195_v38 = vmul.f32 0.2, %v2062_v54  ;;  %v2328_v15 = vmul.f32 %v5195_v62, %v2258_v34  ;;  %v3170_v41 = vperm.slane %v2712_v35, 1  ;;  %4348 = vpow2.f32 %v4217_v24 }
 0x378   :  { %3426 = vst [vmem:[#allocation1 + $0x6] ss:$9 sm:$0xff] %v3159_v43  ;;  %v2060_v43 = vadd.f32 %v5455_v39, %v1971_v49  ;;  %v2716_v42 = vsub.f32 1.0, %v2715_v30  ;;  %v3169_v39 = vperm.slane %v2712_v35, 0  ;;  %v3171_v21 = vperm.slane %v2712_v35, 2  ;;  %v5528_v49 = vpop.f32.mrf.mxu3 }
 0x379   :  { %3427 = vst [vmem:[#allocation1 + $0x7] ss:$9 sm:$0xff] %v3160_v5  ;;  %v2259_v5 = vsel %vm2131_vm1, %v2062_v54, %v2195_v38  ;;  %v3172_v61 = vperm.slane %v2712_v35, 3  ;;  %v3173_v27 = vperm.slane %v2712_v35, 4  ;;  %v3174_v36 = vperm.slane %v2712_v35, 5 }
 0x37a   :  { %v2329_v20 = vmul.f32 %v5197_v52, %v2259_v5  ;;  %v2193_v56 = vmul.f32 0.2, %v2060_v43  ;;  %vm2129_vm15 = vcmp.gt.f32.partialorder %v2060_v43, 0.0  ;;  %v2717_v29 = vmul.f32 %v5476_v28, %v2716_v42  ;;  %v2381_v24 = vpop.xlane.xlu1 %2380 }
 0x37b   :  { %v5507_v51 = vpop.eup %4346  ;;  %vm2734_vm6 = vweird.f32 %v5491_v16  ;;  %v2738_v59 = vand.u32 2147483647, %v5491_v16 }
 0x37c   :  { %v2415_v46 = vadd.f32 %v2329_v20, %v2328_v15  ;;  %v2257_v4 = vsel %vm2129_vm15, %v2060_v43, %v2193_v56  ;;  %v2718_v57 = vadd.f32 %v5476_v28, %v2717_v29  ;;  %v2730_v33 = vmul.f32 %v5507_v51, %v5491_v16 }
 0x37d   :  { %v4349_v32 = vpop.eup %4348  ;;  %vm2735_vm5 = vweird.f32 %v5507_v51  ;;  %v2740_v15 = vand.u32 2147483648, %v5491_v16  ;;  %vm2739_vm8 = vcmp.eq.f32.partialorder %v2738_v59, 8.507059e+37 }
 0x37e   :  { %2410 = vadd.xlane.f32.xlu0 %v2409_v55  ;;  %2416 = vadd.xlane.f32.xlu2 %v2415_v46  ;;  %v2378_v55 = vpop.xlane.xlu2 %2377  ;;  %v2722_v54 = vsel %vm2721_vm3, %v5476_v28, %v2718_v57  ;;  %v5525_v17 = vadd.f32 1.0, %v4349_v32  ;;  %v2731_v13 = vsub.f32 1.0, %v2730_v33  ;;  %vm5541_vm7 = vmor %vm2734_vm6, %vm2735_vm5 }
 0x380   :  { %v5473_v48 = vld [vmem:[#allocation1] sm:$0xff]  ;;  %4350 = vrcp.f32 %v5525_v17  ;;  %v2732_v19 = vmul.f32 %v5507_v51, %v2731_v13  ;;  %v2755_v13 = vand.u32 2147483648, %v5525_v17  ;;  %vm2749_vm12 = vweird.f32 %v5525_v17 }
 0x381   :  { %3429 = vst [vmem:[#allocation1] ss:$9 sm:$0xff] %v3161_v31  ;;  %v3175_v31 = vperm.slane %v2712_v35, 6 }
 0x382   :  { %3430 = vst [vmem:[#allocation1 + $0x1] ss:$9 sm:$0xff] %v3162_v11  ;;  %v2327_v11 = vmul.f32 %v5197_v52, %v2257_v4 }
 0x383   :  { %3431 = vst [vmem:[#allocation1 + $0x2] ss:$9 sm:$0xff] %v3163_v12  ;;  %v3176_v12 = vperm.slane %v2712_v35, 7  ;;  %v2733_v35 = vadd.f32 %v5507_v51, %v2732_v19 }
 0x384   :  { %3432 = vst [vmem:[#allocation1 + $0x3] ss:$9 sm:$0xff] %v3164_v47  ;;  %v2723_v47 = vand.u32 2147483647, %v5465_v14  ;;  %v2412_v7 = vadd.f32 %v2327_v11, %v2326_v45 }
 0x385   :  { %3433 = vst [vmem:[#allocation1 + $0x4] ss:$9 sm:$0xff] %v3165_v0  ;;  %v2459_v0 = vadd.f32 %v5318_v9, %v2378_v55  ;;  %v2737_v29 = vsel %vm5541_vm7, %v5507_v51, %v2733_v35  ;;  %v1798_v35 = vadd.f32 %v5504_v22, %v5180_v40  ;;  %v2387_v22 = vpop.xlane.xlu1 %2386 }
 0x386   :  { %3434 = vst [vmem:[#allocation1 + $0x5] ss:$9 sm:$0xff] %v3166_v23  ;;  %v5521_v23 = vpop.f32.mrf.mxu1  ;;  %vm2724_vm4 = vcmp.eq.f32.partialorder %v2723_v47, 8.507059e+37  ;;  %v5534_v43 = vpop.eup %4350 }
 0x387   :  { %3435 = vst [vmem:[#allocation1 + $0x6] ss:$9 sm:$0xff] %v3167_v18  ;;  %v2727_v14 = vsel %vm2724_vm4, %v2726_v26, %v2722_v54  ;;  %v4218_v60 = vmul.f32 -1.442695, %v2459_v0  ;;  %v1799_v18 = vpop.f32.mrf.mxu0  ;;  %v2745_v46 = vmul.f32 %v5534_v43, %v5525_v17  ;;  %vm2750_vm11 = vweird.f32 %v5534_v43  ;;  %v2384_v54 = vpop.xlane.xlu2 %2383 }
 0x388   :  { %3436 = vst [vmem:[#allocation1 + $0x7] ss:$9 sm:$0xff] %v3168_v6  ;;  %v3177_v50 = vperm.slane %v2727_v14, 0  ;;  %v3178_v28 = vperm.slane %v2727_v14, 1  ;;  %v1800_v6 = vadd.f32 %v1799_v18, %v5180_v40  ;;  %v3179_v58 = vperm.slane %v2727_v14, 2  ;;  %vm2751_vm1 = vmor %vm2749_vm12, %vm2750_vm11 }
 0x389   :  { %4352 = vpow2.f32 %v4218_v60  ;;  %v3180_v38 = vperm.slane %v2727_v14, 3  ;;  %v3181_v44 = vperm.slane %v2727_v14, 4  ;;  %v3182_v34 = vperm.slane %v2727_v14, 5 }
 0x38a   :  { %v3183_v5 = vperm.slane %v2727_v14, 6  ;;  %v3184_v10 = vperm.slane %v2727_v14, 7  ;;  %v1887_v59 = vadd.f32 %v5521_v23, %v1798_v35 }
 0x38d   :  { %2413 = vadd.xlane.f32.xlu1 %v2412_v7 }
 0x38e   :  { %v1888_v53 = vpop.f32.mrf.mxu1 }
 0x38f   :  { %v5502_v1 = vld [vmem:[#allocation1] sm:$0xff]  ;;  %v1889_v42 = vadd.f32 %v1888_v53, %v1800_v6  ;;  %v4353_v20 = vpop.eup %4352  ;;  %v2461_v6 = vadd.f32 %v5318_v9, %v2384_v54 }
 0x390   :  { %3438 = vst [vmem:[#allocation1] ss:$9 sm:$0xff] %v3169_v39  ;;  %v5551_v16 = vadd.f32 1.0, %v4353_v20 }
 0x391   :  { %3439 = vst [vmem:[#allocation1 + $0x1] ss:$9 sm:$0xff] %v3170_v41  ;;  %v2460_v41 = vadd.f32 %v5318_v9, %v2381_v24 }
 0x392   :  { %3440 = vst [vmem:[#allocation1 + $0x2] ss:$9 sm:$0xff] %v3171_v21  ;;  %3682 = vperm.xlu0 %4309, %v5438_v25   ;;  %v5523_v25 = vpop.f32.mrf.mxu2  ;;  %v2741_v21 = vor.u32 1.1754944e-38, %v2740_v15  ;;  %4354 = vrcp.f32 %v5551_v16  ;;  %vm2764_vm15 = vweird.f32 %v5551_v16  ;;  %v2768_v23 = vand.u32 2147483647, %v5551_v16 }
 0x393   :  { %3441 = vst [vmem:[#allocation1 + $0x3] ss:$9 sm:$0xff] %v3172_v61  ;;  %v2066_v61 = vpop.f32.mrf.mxu3  ;;  %v4219_v57 = vmul.f32 -1.442695, %v2460_v41  ;;  %v2770_v41 = vand.u32 2147483648, %v5551_v16 }
 0x394   :  { %3442 = vst [vmem:[#allocation1 + $0x4] ss:$9 sm:$0xff] %v3173_v27  ;;  %v2742_v27 = vsel %vm2739_vm8, %v2741_v21, %v2737_v29  ;;  %v1976_v21 = vadd.f32 %v5523_v25, %v1887_v59  ;;  %vm2769_vm2 = vcmp.eq.f32.partialorder %v2768_v23, 8.507059e+37 }
 0x395   :  { %3443 = vst [vmem:[#allocation1 + $0x5] ss:$9 sm:$0xff] %v3174_v36  ;;  %v2746_v36 = vsub.f32 1.0, %v2745_v46  ;;  %v3185_v51 = vperm.slane %v2742_v27, 0  ;;  %v3186_v37 = vperm.slane %v2742_v27, 1  ;;  %4356 = vpow2.f32 %v4219_v57 }
 0x396   :  { %3444 = vst [vmem:[#allocation1 + $0x6] ss:$9 sm:$0xff] %v3175_v31  ;;  %3685 = vperm.xlu2 %4310, %v5473_v48   ;;  %v2262_v31 = vsel %vm2134_vm9, %v5150_v63, %v2198_v3  ;;  %v3187_v11 = vperm.slane %v2742_v27, 2  ;;  %v3188_v48 = vperm.slane %v2742_v27, 3  ;;  %v3190_v7 = vperm.slane %v2742_v27, 5 }
 0x397   :  { %3445 = vst [vmem:[#allocation1 + $0x7] ss:$9 sm:$0xff] %v3176_v12  ;;  %v2747_v45 = vmul.f32 %v5534_v43, %v2746_v36  ;;  %v3189_v12 = vperm.slane %v2742_v27, 4  ;;  %v2332_v33 = vmul.f32 %v5195_v62, %v2262_v31  ;;  %v3191_v14 = vperm.slane %v2742_v27, 6  ;;  %v1802_v36 = vpop.f32.mrf.mxu0 }
 0x398   :  { %v5562_v0 = vpop.eup %4354  ;;  %v3192_v18 = vperm.slane %v2742_v27, 7  ;;  %v2771_v57 = vor.u32 1.1754944e-38, %v2770_v41  ;;  %v2065_v31 = vadd.f32 %v5528_v49, %v1976_v21 }
 0x399   :  { %v2748_v63 = vadd.f32 %v5534_v43, %v2747_v45  ;;  %v2760_v19 = vmul.f32 %v5562_v0, %v5551_v16  ;;  %vm2765_vm14 = vweird.f32 %v5562_v0 }
 0x39a   :  { %v1977_v8 = vpop.f32.mrf.mxu2  ;;  %vm2766_vm0 = vmor %vm2764_vm15, %vm2765_vm14  ;;  %vm2133_vm4 = vcmp.gt.f32.partialorder %v2065_v31, 0.0 }
 0x39b   :  { %v1978_v56 = vadd.f32 %v1977_v8, %v1889_v42  ;;  %v4357_v60 = vpop.eup %4356  ;;  %v4220_v8 = vmul.f32 -1.442695, %v2461_v6 }
 0x39d   :  { %v2067_v4 = vadd.f32 %v2066_v61, %v1978_v56 }
 0x39e   :  { %v5532_v30 = vld [vmem:[#allocation1] sm:$0xff] }
 0x39f   :  { %3447 = vst [vmem:[#allocation1] ss:$9 sm:$0xff] %v3177_v50  ;;  %v2199_v55 = vmul.f32 0.2, %v2067_v4  ;;  %vm2135_vm10 = vcmp.gt.f32.partialorder %v2067_v4, 0.0 }
 0x3a0   :  { %3448 = vst [vmem:[#allocation1 + $0x1] ss:$9 sm:$0xff] %v3178_v28  ;;  %v2753_v50 = vand.u32 2147483647, %v5525_v17  ;;  %v2761_v17 = vsub.f32 1.0, %v2760_v19 }
 0x3a1   :  { %3449 = vst [vmem:[#allocation1 + $0x2] ss:$9 sm:$0xff] %v3179_v58  ;;  %v2263_v47 = vsel %vm2135_vm10, %v2067_v4, %v2199_v55  ;;  %v2752_v58 = vsel %vm2751_vm1, %v5534_v43, %v2748_v63  ;;  %v2462_v4 = vadd.f32 %v5318_v9, %v2387_v22 }
 0x3a2   :  { %3450 = vst [vmem:[#allocation1 + $0x3] ss:$9 sm:$0xff] %v3180_v38  ;;  %v2333_v26 = vmul.f32 %v5197_v52, %v2263_v47  ;;  %v2756_v38 = vor.u32 1.1754944e-38, %v2755_v13  ;;  %vm2754_vm13 = vcmp.eq.f32.partialorder %v2753_v50, 8.507059e+37  ;;  %v2762_v24 = vmul.f32 %v5562_v0, %v2761_v17  ;;  %v5613_v17 = vpop.f32.mrf.mxu0 }
 0x3a3   :  { %3451 = vst [vmem:[#allocation1 + $0x4] ss:$9 sm:$0xff] %v3181_v44  ;;  %v5574_v44 = vadd.f32 1.0, %v4357_v60  ;;  %v4221_v45 = vmul.f32 -1.442695, %v2462_v4 }
 0x3a4   :  { %3452 = vst [vmem:[#allocation1 + $0x5] ss:$9 sm:$0xff] %v3182_v34  ;;  %v2421_v28 = vadd.f32 %v2333_v26, %v2332_v33  ;;  %v2757_v53 = vsel %vm2754_vm13, %v2756_v38, %v2752_v58  ;;  %v2763_v39 = vadd.f32 %v5562_v0, %v2762_v24  ;;  %v1891_v33 = vpop.f32.mrf.mxu1  ;;  %v2390_v58 = vpop.xlane.xlu2 %2389 }
 0x3a5   :  { %3453 = vst [vmem:[#allocation1 + $0x6] ss:$9 sm:$0xff] %v3183_v5  ;;  %4358 = vrcp.f32 %v5574_v44  ;;  %v3193_v34 = vperm.slane %v2757_v53, 0  ;;  %v3194_v42 = vperm.slane %v2757_v53, 1  ;;  %v3195_v43 = vperm.slane %v2757_v53, 2  ;;  %v2069_v24 = vpop.f32.mrf.mxu3 }
 0x3a6   :  { %3454 = vst [vmem:[#allocation1 + $0x7] ss:$9 sm:$0xff] %v3184_v10  ;;  %2422 = vadd.xlane.f32.xlu1 %v2421_v28  ;;  %4360 = vpow2.f32 %v4220_v8  ;;  %v3196_v15 = vperm.slane %v2757_v53, 3  ;;  %v3197_v20 = vperm.slane %v2757_v53, 4  ;;  %v3198_v56 = vperm.slane %v2757_v53, 5 }
 0x3a7   :  { %v3199_v46 = vperm.slane %v2757_v53, 6  ;;  %v3200_v61 = vperm.slane %v2757_v53, 7  ;;  %v2767_v27 = vsel %vm2766_vm0, %v5562_v0, %v2763_v39  ;;  %vm2779_vm6 = vweird.f32 %v5574_v44 }
 0x3a8   :  { %v2772_v16 = vsel %vm2769_vm2, %v2771_v57, %v2767_v27  ;;  %v2783_v35 = vand.u32 2147483647, %v5574_v44  ;;  %vm2140_vm0 = vcmp.gt.f32.partialorder %v5167_v2, 0.0 }
 0x3a9   :  { %v3202_v0 = vperm.slane %v2772_v16, 1  ;;  %v3203_v54 = vperm.slane %v2772_v16, 2  ;;  %v3205_v13 = vperm.slane %v2772_v16, 4  ;;  %v3206_v19 = vperm.slane %v2772_v16, 5 }
 0x3aa   :  { %v3207_v53 = vperm.slane %v2772_v16, 6  ;;  %vm2784_vm8 = vcmp.eq.f32.partialorder %v2783_v35, 8.507059e+37  ;;  %v1807_v4 = vpop.f32.mrf.mxu0 }
 0x3ab   :  { %v5582_v10 = vpop.eup %4358 }
 0x3ac   :  { %v4361_v29 = vpop.eup %4360  ;;  %v2775_v3 = vmul.f32 %v5582_v10, %v5574_v44  ;;  %vm2780_vm5 = vweird.f32 %v5582_v10 }
 0x3ad   :  { %v5559_v32 = vld [vmem:[#allocation1] sm:$0xff]  ;;  %v5595_v25 = vadd.f32 1.0, %v4361_v29  ;;  %vm2781_vm7 = vmor %vm2779_vm6, %vm2780_vm5 }
 0x3ae   :  { %3456 = vst [vmem:[#allocation1] ss:$9 sm:$0xff] %v3185_v51  ;;  %v6166_v51 = vld [vmem:[#allocation15_spill] sm:$0xff] }
 0x3af   :  { %3457 = vst [vmem:[#allocation1 + $0x1] ss:$9 sm:$0xff] %v3186_v37  ;;  %v2196_v55 = vmul.f32 0.2, %v6166_v51  ;;  %vm2132_vm3 = vcmp.gt.f32.partialorder %v6166_v51, 0.0  ;;  %v2776_v37 = vsub.f32 1.0, %v2775_v3  ;;  %4362 = vrcp.f32 %v5595_v25 }
 0x3b0   :  { %3458 = vst [vmem:[#allocation1 + $0x2] ss:$9 sm:$0xff] %v3187_v11  ;;  %v1803_v11 = vadd.f32 %v1802_v36, %v5180_v40  ;;  %4364 = vpow2.f32 %v4221_v45  ;;  %v1808_v45 = vadd.f32 %v1807_v4, %v5180_v40  ;;  %vm2794_vm12 = vweird.f32 %v5595_v25 }
 0x3b1   :  { %3459 = vst [vmem:[#allocation1 + $0x3] ss:$9 sm:$0xff] %v3188_v48  ;;  %v2197_v48 = vmul.f32 0.2, %v2065_v31  ;;  %v2260_v47 = vsel %vm2132_vm3, %v6166_v51, %v2196_v55  ;;  %v2777_v49 = vmul.f32 %v5582_v10, %v2776_v37 }
 0x3b2   :  { %3460 = vst [vmem:[#allocation1 + $0x4] ss:$9 sm:$0xff] %v3189_v12  ;;  %v3201_v12 = vperm.slane %v2772_v16, 0  ;;  %v1892_v63 = vadd.f32 %v1891_v33, %v1803_v11  ;;  %v2330_v50 = vmul.f32 %v5195_v62, %v2260_v47  ;;  %v2393_v33 = vpop.xlane.xlu0 %2392 }
 0x3b3   :  { %3461 = vst [vmem:[#allocation1 + $0x5] ss:$9 sm:$0xff] %v3190_v7  ;;  %v1980_v7 = vpop.f32.mrf.mxu2  ;;  %v2778_v6 = vadd.f32 %v5582_v10, %v2777_v49  ;;  %v2800_v49 = vand.u32 2147483648, %v5595_v25 }
 0x3b4   :  { %3462 = vst [vmem:[#allocation1 + $0x6] ss:$9 sm:$0xff] %v3191_v14  ;;  %v3204_v14 = vperm.slane %v2772_v16, 3  ;;  %v1981_v60 = vadd.f32 %v1980_v7, %v1892_v63 }
 0x3b5   :  { %3463 = vst [vmem:[#allocation1 + $0x7] ss:$9 sm:$0xff] %v3192_v18  ;;  %v2261_v18 = vsel %vm2133_vm4, %v2065_v31, %v2197_v48  ;;  %v5608_v28 = vpop.eup %4362  ;;  %v2782_v59 = vsel %vm2781_vm7, %v5582_v10, %v2778_v6  ;;  %v2464_v6 = vadd.f32 %v5318_v9, %v2393_v33 }
 0x3b6   :  { %v2331_v38 = vmul.f32 %v5197_v52, %v2261_v18  ;;  %v4365_v8 = vpop.eup %4364  ;;  %vm2795_vm11 = vweird.f32 %v5608_v28 }
 0x3b7   :  { %v5624_v39 = vadd.f32 1.0, %v4365_v8  ;;  %vm2796_vm1 = vmor %vm2794_vm12, %vm2795_vm11 }
 0x3b9   :  { %4366 = vrcp.f32 %v5624_v39  ;;  %vm2809_vm2 = vweird.f32 %v5624_v39 }
 0x3bb   :  { %v5629_v29 = vpop.f32.mrf.mxu2 }
 0x3bc   :  { %v5580_v5 = vld [vmem:[#allocation1] sm:$0xff] }
 0x3bd   :  { %3465 = vst [vmem:[#allocation1] ss:$9 sm:$0xff] %v3193_v34  ;;  %v3208_v34 = vperm.slane %v2772_v16, 7  ;;  %v5637_v16 = vpop.f32.mrf.mxu3 }
 0x3be   :  { %3466 = vst [vmem:[#allocation1 + $0x1] ss:$9 sm:$0xff] %v3194_v42  ;;  %v2418_v42 = vadd.f32 %v2331_v38, %v2330_v50  ;;  %v2801_v38 = vor.u32 1.1754944e-38, %v2800_v49 }
 0x3bf   :  { %3467 = vst [vmem:[#allocation1 + $0x2] ss:$9 sm:$0xff] %v3195_v43  ;;  %3694 = vperm.xlu1 %4311, %v5559_v32   ;;  %v2785_v32 = vand.u32 2147483648, %v5574_v44  ;;  %v2790_v43 = vmul.f32 %v5608_v28, %v5595_v25  ;;  %v6167_v44 = vld [vmem:[#allocation16_spill] sm:$0xff]  ;;  %v5641_v48 = vpop.eup %4366 }
 0x3c0   :  { %3468 = vst [vmem:[#allocation1 + $0x3] ss:$9 sm:$0xff] %v3196_v15  ;;  %v2463_v15 = vadd.f32 %v5318_v9, %v2390_v58  ;;  %2419 = vadd.xlane.f32.xlu0 %v2418_v42  ;;  %v2200_v22 = vmul.f32 0.2, %v6167_v44  ;;  %vm2136_vm9 = vcmp.gt.f32.partialorder %v6167_v44, 0.0  ;;  %vm2810_vm15 = vweird.f32 %v5641_v48 }
 0x3c1   :  { %3469 = vst [vmem:[#allocation1 + $0x4] ss:$9 sm:$0xff] %v3197_v20  ;;  %v2070_v20 = vadd.f32 %v2069_v24, %v1981_v60  ;;  %v2791_v21 = vsub.f32 1.0, %v2790_v43  ;;  %vm2811_vm3 = vmor %vm2809_vm2, %vm2810_vm15 }
 0x3c2   :  { %3470 = vst [vmem:[#allocation1 + $0x5] ss:$9 sm:$0xff] %v3198_v56  ;;  %v2786_v56 = vor.u32 1.1754944e-38, %v2785_v32  ;;  %v2264_v36 = vsel %vm2136_vm9, %v6167_v44, %v2200_v22 }
 0x3c3   :  { %3471 = vst [vmem:[#allocation1 + $0x6] ss:$9 sm:$0xff] %v3199_v46  ;;  %v5627_v46 = vpop.f32.mrf.mxu1  ;;  %v2201_v23 = vmul.f32 0.2, %v2070_v20  ;;  %vm2137_vm10 = vcmp.gt.f32.partialorder %v2070_v20, 0.0  ;;  %v2792_v27 = vmul.f32 %v5608_v28, %v2791_v21  ;;  %v2334_v11 = vmul.f32 %v5195_v62, %v2264_v36  ;;  %v1985_v60 = vpop.f32.mrf.mxu2 }
 0x3c4   :  { %3472 = vst [vmem:[#allocation1 + $0x7] ss:$9 sm:$0xff] %v3200_v61  ;;  %v2787_v41 = vsel %vm2784_vm8, %v2786_v56, %v2782_v59  ;;  %v4222_v61 = vmul.f32 -1.442695, %v2463_v15 }
 0x3c5   :  { %v3209_v10 = vperm.slane %v2787_v41, 0  ;;  %v3210_v3 = vperm.slane %v2787_v41, 1  ;;  %v3211_v57 = vperm.slane %v2787_v41, 2  ;;  %v2265_v51 = vsel %vm2137_vm10, %v2070_v20, %v2201_v23  ;;  %v2074_v35 = vpop.f32.mrf.mxu3 }
 0x3c6   :  { %4368 = vpow2.f32 %v4222_v61  ;;  %v3212_v31 = vperm.slane %v2787_v41, 3  ;;  %v3213_v37 = vperm.slane %v2787_v41, 4  ;;  %v2793_v47 = vadd.f32 %v5608_v28, %v2792_v27  ;;  %v2396_v61 = vpop.xlane.xlu1 %2395 }
 0x3c7   :  { %v3215_v7 = vperm.slane %v2787_v41, 6  ;;  %v2813_v27 = vand.u32 2147483647, %v5624_v39 }
 0x3c8   :  { %v2797_v58 = vsel %vm2796_vm1, %v5608_v28, %v2793_v47 }
 0x3c9   :  { %vm2814_vm4 = vcmp.eq.f32.partialorder %v2813_v27, 8.507059e+37 }
 0x3cb   :  { %v5604_v26 = vld [vmem:[#allocation1] sm:$0xff] }
 0x3cc   :  { %3474 = vst [vmem:[#allocation1] ss:$9 sm:$0xff] %v3201_v12  ;;  %v3214_v12 = vperm.slane %v2787_v41, 5  ;;  %v4369_v63 = vpop.eup %4368 }
 0x3cd   :  { %3475 = vst [vmem:[#allocation1 + $0x1] ss:$9 sm:$0xff] %v3202_v0  ;;  %v2335_v0 = vmul.f32 %v5197_v52, %v2265_v51  ;;  %v2465_v51 = vadd.f32 %v5318_v9, %v2396_v61 }
 0x3ce   :  { %3476 = vst [vmem:[#allocation1 + $0x2] ss:$9 sm:$0xff] %v3203_v54  ;;  %v3216_v54 = vperm.slane %v2787_v41, 7  ;;  %v2204_v41 = vmul.f32 0.2, %v5167_v2 }
 0x3cf   :  { %3477 = vst [vmem:[#allocation1 + $0x3] ss:$9 sm:$0xff] %v3204_v14  ;;  %v1896_v14 = vpop.f32.mrf.mxu1  ;;  %v2424_v18 = vadd.f32 %v2335_v0, %v2334_v11  ;;  %v4224_v33 = vmul.f32 -1.442695, %v2465_v51 }
 0x3d0   :  { %3478 = vst [vmem:[#allocation1 + $0x4] ss:$9 sm:$0xff] %v3205_v13  ;;  %v2798_v13 = vand.u32 2147483647, %v5595_v25  ;;  %v1897_v50 = vadd.f32 %v1896_v14, %v1808_v45  ;;  %v5655_v25 = vadd.f32 1.0, %v4369_v63 }
 0x3d1   :  { %3479 = vst [vmem:[#allocation1 + $0x5] ss:$9 sm:$0xff] %v3206_v19  ;;  %v2805_v19 = vmul.f32 %v5641_v48, %v5624_v39  ;;  %2425 = vadd.xlane.f32.xlu2 %v2424_v18 }
 0x3d2   :  { %3480 = vst [vmem:[#allocation1 + $0x6] ss:$9 sm:$0xff] %v3207_v53  ;;  %v1986_v53 = vadd.f32 %v1985_v60, %v1897_v50  ;;  %vm2799_vm13 = vcmp.eq.f32.partialorder %v2798_v13, 8.507059e+37  ;;  %4370 = vrcp.f32 %v5655_v25  ;;  %vm2824_vm6 = vweird.f32 %v5655_v25 }
 0x3d3   :  { %3481 = vst [vmem:[#allocation1 + $0x7] ss:$9 sm:$0xff] %v3208_v34  ;;  %v2802_v32 = vsel %vm2799_vm13, %v2801_v38, %v2797_v58  ;;  %v2806_v8 = vsub.f32 1.0, %v2805_v19  ;;  %v4223_v34 = vmul.f32 -1.442695, %v2464_v6  ;;  %v2399_v58 = vpop.xlane.xlu2 %2398 }
 0x3d4   :  { %v2075_v42 = vadd.f32 %v2074_v35, %v1986_v53  ;;  %3688 = vperm.xlu0 %4309, %v5502_v1   ;;  %v3217_v24 = vperm.slane %v2802_v32, 0  ;;  %v3218_v43 = vperm.slane %v2802_v32, 1  ;;  %v3219_v15 = vperm.slane %v2802_v32, 2 }
 0x3d5   :  { %v2807_v28 = vmul.f32 %v5641_v48, %v2806_v8  ;;  %4372 = vpow2.f32 %v4223_v34  ;;  %v3220_v59 = vperm.slane %v2802_v32, 3  ;;  %v3221_v44 = vperm.slane %v2802_v32, 4 }
 0x3d6   :  { %v2205_v56 = vmul.f32 0.2, %v2075_v42  ;;  %vm2141_vm14 = vcmp.gt.f32.partialorder %v2075_v42, 0.0  ;;  %v3222_v21 = vperm.slane %v2802_v32, 5  ;;  %v3223_v23 = vperm.slane %v2802_v32, 6 }
 0x3d7   :  { %v2808_v1 = vadd.f32 %v5641_v48, %v2807_v28  ;;  %v3224_v4 = vperm.slane %v2802_v32, 7  ;;  %v2466_v8 = vadd.f32 %v5318_v9, %v2399_v58 }
 0x3d8   :  { %v5662_v22 = vpop.eup %4370  ;;  %v2269_v36 = vsel %vm2141_vm14, %v2075_v42, %v2205_v56  ;;  %v6168_v56 = vld [vmem:[#allocation17_spill] sm:$0xff] }
 0x3d9   :  { %vm2825_vm5 = vweird.f32 %v5662_v22  ;;  %v4225_v28 = vmul.f32 -1.442695, %v2466_v8  ;;  %vm2138_vm10 = vcmp.gt.f32.partialorder %v6168_v56, 0.0 }
 0x3da   :  { %v5635_v55 = vld [vmem:[#allocation1] sm:$0xff]  ;;  %vm2826_vm7 = vmor %vm2824_vm6, %vm2825_vm5  ;;  %vm3773_vm6 = vcmask 130112  }
 0x3db   :  { %3483 = vst [vmem:[#allocation1] ss:$9 sm:$0xff] %v3209_v10  ;;  %v2815_v10 = vand.u32 2147483648, %v5624_v39  ;;  %v2339_v39 = vmul.f32 %v5197_v52, %v2269_v36 }
 0x3dc   :  { %3484 = vst [vmem:[#allocation1 + $0x1] ss:$9 sm:$0xff] %v3210_v3  ;;  %v4373_v3 = vpop.eup %4372 }
 0x3dd   :  { %3485 = vst [vmem:[#allocation1 + $0x2] ss:$9 sm:$0xff] %v3211_v57  ;;  %v2820_v57 = vmul.f32 %v5662_v22, %v5655_v25  ;;  %v2816_v45 = vor.u32 1.1754944e-38, %v2815_v10  ;;  %v5679_v11 = vadd.f32 1.0, %v4373_v3  ;;  %v1898_v3 = vpop.f32.mrf.mxu1 }
 0x3de   :  { %3486 = vst [vmem:[#allocation1 + $0x3] ss:$9 sm:$0xff] %v3212_v31  ;;  %v2812_v31 = vsel %vm2811_vm3, %v5641_v48, %v2808_v1  ;;  %v1805_v48 = vadd.f32 %v5613_v17, %v5180_v40 }
 0x3df   :  { %3487 = vst [vmem:[#allocation1 + $0x4] ss:$9 sm:$0xff] %v3213_v37  ;;  %v2268_v37 = vsel %vm2140_vm0, %v5167_v2, %v2204_v41  ;;  %v2821_v47 = vsub.f32 1.0, %v2820_v57  ;;  %4374 = vrcp.f32 %v5679_v11  ;;  %v1987_v57 = vpop.f32.mrf.mxu2  ;;  %vm2839_vm12 = vweird.f32 %v5679_v11 }
 0x3e0   :  { %3488 = vst [vmem:[#allocation1 + $0x5] ss:$9 sm:$0xff] %v3214_v12  ;;  %v2817_v12 = vsel %vm2814_vm4, %v2816_v45, %v2812_v31  ;;  %v2338_v0 = vmul.f32 %v5195_v62, %v2268_v37  ;;  %4376 = vpow2.f32 %v4224_v33  ;;  %v1894_v14 = vadd.f32 %v5627_v46, %v1805_v48  ;;  %v2402_v37 = vpop.xlane.xlu0 %2401 }
 0x3e1   :  { %3489 = vst [vmem:[#allocation1 + $0x6] ss:$9 sm:$0xff] %v3215_v7  ;;  %v3225_v2 = vperm.slane %v2817_v12, 0  ;;  %v3226_v49 = vperm.slane %v2817_v12, 1  ;;  %v2822_v63 = vmul.f32 %v5662_v22, %v2821_v47  ;;  %v3228_v60 = vperm.slane %v2817_v12, 3 }
 0x3e2   :  { %3490 = vst [vmem:[#allocation1 + $0x7] ss:$9 sm:$0xff] %v3216_v54  ;;  %v2430_v7 = vadd.f32 %v2339_v39, %v2338_v0  ;;  %v3227_v54 = vperm.slane %v2817_v12, 2  ;;  %v3229_v18 = vperm.slane %v2817_v12, 4  ;;  %v1983_v50 = vadd.f32 %v5629_v29, %v1894_v14 }
 0x3e3   :  { %v3230_v19 = vperm.slane %v2817_v12, 5  ;;  %v2823_v6 = vadd.f32 %v5662_v22, %v2822_v63  ;;  %v3231_v38 = vperm.slane %v2817_v12, 6  ;;  %v2830_v46 = vand.u32 2147483648, %v5655_v25 }
 0x3e4   :  { %v3232_v32 = vperm.slane %v2817_v12, 7  ;;  %v2072_v34 = vadd.f32 %v5637_v16, %v1983_v50  ;;  %v2845_v47 = vand.u32 2147483648, %v5679_v11  ;;  %v2843_v48 = vand.u32 2147483647, %v5679_v11  ;;  %v2076_v50 = vpop.f32.mrf.mxu3 }
 0x3e5   :  { %v5691_v17 = vpop.eup %4374  ;;  %v2827_v35 = vsel %vm2826_vm7, %v5662_v22, %v2823_v6  ;;  %v2831_v42 = vor.u32 1.1754944e-38, %v2830_v46 }
 0x3e6   :  { %v4377_v53 = vpop.eup %4376  ;;  %v2835_v29 = vmul.f32 %v5691_v17, %v5679_v11  ;;  %vm2139_vm9 = vcmp.gt.f32.partialorder %v2072_v34, 0.0  ;;  %vm2840_vm11 = vweird.f32 %v5691_v17  ;;  %vm2844_vm13 = vcmp.eq.f32.partialorder %v2843_v48, 8.507059e+37 }
 0x3e7   :  { %vm5725_vm1 = vmor %vm2839_vm12, %vm2840_vm11  ;;  %v5744_v8 = vpop.f32.mrf.mxu2  ;;  %vm3777_vm12 = vcmask 195712  }
 0x3e9   :  { %v5660_v20 = vld [vmem:[#allocation1] sm:$0xff]  ;;  %2431 = vadd.xlane.f32.xlu1 %v2430_v7  ;;  %3691 = vperm.xlu2 %4310, %v5532_v30   ;;  %v2828_v30 = vand.u32 2147483647, %v5655_v25  ;;  %v2836_v25 = vsub.f32 1.0, %v2835_v29  ;;  %v5742_v29 = vpop.f32.mrf.mxu1 }
 0x3ea   :  { %3492 = vst [vmem:[#allocation1] ss:$9 sm:$0xff] %v3217_v24  ;;  %v5704_v24 = vadd.f32 1.0, %v4377_v53 }
 0x3eb   :  { %3493 = vst [vmem:[#allocation1 + $0x1] ss:$9 sm:$0xff] %v3218_v43  ;;  %vm2829_vm8 = vcmp.eq.f32.partialorder %v2828_v30, 8.507059e+37  ;;  %v2837_v41 = vmul.f32 %v5691_v17, %v2836_v25 }
 0x3ec   :  { %3494 = vst [vmem:[#allocation1 + $0x2] ss:$9 sm:$0xff] %v3219_v15  ;;  %v2832_v43 = vsel %vm2829_vm8, %v2831_v42, %v2827_v35  ;;  %v2203_v15 = vmul.f32 0.2, %v2072_v34  ;;  %4378 = vrcp.f32 %v5704_v24  ;;  %vm2854_vm2 = vweird.f32 %v5704_v24 }
 0x3ed   :  { %3495 = vst [vmem:[#allocation1 + $0x3] ss:$9 sm:$0xff] %v3220_v59  ;;  %v1809_v59 = vpop.f32.mrf.mxu0  ;;  %v3233_v16 = vperm.slane %v2832_v43, 0  ;;  %v3234_v22 = vperm.slane %v2832_v43, 1  ;;  %4380 = vpow2.f32 %v4225_v28  ;;  %v3235_v1 = vperm.slane %v2832_v43, 2 }
 0x3ee   :  { %3496 = vst [vmem:[#allocation1 + $0x4] ss:$9 sm:$0xff] %v3221_v44  ;;  %v2202_v44 = vmul.f32 0.2, %v6168_v56  ;;  %v2267_v61 = vsel %vm2139_vm9, %v2072_v34, %v2203_v15  ;;  %v3236_v10 = vperm.slane %v2832_v43, 3  ;;  %v3238_v51 = vperm.slane %v2832_v43, 5 }
 0x3ef   :  { %3497 = vst [vmem:[#allocation1 + $0x5] ss:$9 sm:$0xff] %v3222_v21  ;;  %v1810_v21 = vadd.f32 %v1809_v59, %v5180_v40  ;;  %v2838_v31 = vadd.f32 %v5691_v17, %v2837_v41  ;;  %v2337_v45 = vmul.f32 %v5197_v52, %v2267_v61  ;;  %v3239_v12 = vperm.slane %v2832_v43, 6 }
 0x3f0   :  { %3498 = vst [vmem:[#allocation1 + $0x6] ss:$9 sm:$0xff] %v3223_v23  ;;  %v2266_v27 = vsel %vm2138_vm10, %v6168_v56, %v2202_v44  ;;  %v3240_v0 = vperm.slane %v2832_v43, 7  ;;  %v2405_v56 = vpop.xlane.xlu1 %2404  ;;  %v2860_v41 = vand.u32 2147483648, %v5704_v24 }
 0x3f1   :  { %3499 = vst [vmem:[#allocation1 + $0x7] ss:$9 sm:$0xff] %v3224_v4  ;;  %v3237_v4 = vperm.slane %v2832_v43, 4  ;;  %v1899_v39 = vadd.f32 %v1898_v3, %v1810_v21  ;;  %v2336_v7 = vmul.f32 %v5195_v62, %v2266_v27  ;;  %v2842_v11 = vsel %vm5725_vm1, %v5691_v17, %v2838_v31 }
 0x3f2   :  { %v5714_v36 = vpop.eup %4378 }
 0x3f3   :  { %v4381_v33 = vpop.eup %4380  ;;  %v2850_v63 = vmul.f32 %v5714_v36, %v5704_v24  ;;  %v2427_v14 = vadd.f32 %v2337_v45, %v2336_v7  ;;  %vm2855_vm0 = vweird.f32 %v5714_v36 }
 0x3f4   :  { %vm5765_vm3 = vmor %vm2854_vm2, %vm2855_vm0 }
 0x3f8   :  { %v5688_v13 = vld [vmem:[#allocation1] sm:$0xff] }
 0x3f9   :  { %3501 = vst [vmem:[#allocation1] ss:$9 sm:$0xff] %v3225_v2  ;;  %v1988_v2 = vadd.f32 %v1987_v57, %v1899_v39  ;;  %v2468_v57 = vadd.f32 %v5318_v9, %v2405_v56 }
 0x3fa   :  { %3502 = vst [vmem:[#allocation1 + $0x1] ss:$9 sm:$0xff] %v3226_v49  ;;  %v3768_v49 = vlaneseq }
 0x3fb   :  { %3503 = vst [vmem:[#allocation1 + $0x2] ss:$9 sm:$0xff] %v3227_v54  ;;  %v2467_v54 = vadd.f32 %v5318_v9, %v2402_v37  ;;  %v2077_v6 = vadd.f32 %v2076_v50, %v1988_v2  ;;  %v2861_v37 = vor.u32 1.1754944e-38, %v2860_v41  ;;  %v4227_v48 = vmul.f32 -1.442695, %v2468_v57 }
 0x3fc   :  { %3504 = vst [vmem:[#allocation1 + $0x3] ss:$9 sm:$0xff] %v3228_v60  ;;  %v2846_v60 = vor.u32 1.1754944e-38, %v2845_v47  ;;  %v1992_v47 = vpop.f32.mrf.mxu2  ;;  %v5784_v50 = vand.u32 127, %v3768_v49 }
 0x3fd   :  { %3505 = vst [vmem:[#allocation1 + $0x4] ss:$9 sm:$0xff] %v3229_v18  ;;  %v5735_v18 = vadd.f32 1.0, %v4381_v33  ;;  %v4226_v46 = vmul.f32 -1.442695, %v2467_v54  ;;  %vm2143_vm14 = vcmp.gt.f32.partialorder %v2077_v6, 0.0 }
 0x3fe   :  { %3506 = vst [vmem:[#allocation1 + $0x5] ss:$9 sm:$0xff] %v3230_v19  ;;  %v5737_v19 = vpop.f32.mrf.mxu0  ;;  %2428 = vadd.xlane.f32.xlu0 %v2427_v14  ;;  %v2847_v58 = vsel %vm2844_vm13, %v2846_v60, %v2842_v11  ;;  %v2207_v53 = vmul.f32 0.2, %v2077_v6 }
 0x3ff   :  { %3507 = vst [vmem:[#allocation1 + $0x6] ss:$9 sm:$0xff] %v3231_v38  ;;  %v2851_v38 = vsub.f32 1.0, %v2850_v63  ;;  %4382 = vrcp.f32 %v5735_v18  ;;  %v3241_v17 = vperm.slane %v2847_v58, 0  ;;  %v3243_v34 = vperm.slane %v2847_v58, 2 }
 0x400   :  { %3508 = vst [vmem:[#allocation1 + $0x7] ss:$9 sm:$0xff] %v3232_v32  ;;  %v3242_v32 = vperm.slane %v2847_v58, 1  ;;  %4384 = vpow2.f32 %v4226_v46  ;;  %v3244_v43 = vperm.slane %v2847_v58, 3  ;;  %v3245_v25 = vperm.slane %v2847_v58, 4  ;;  %v3677_v46 = vpop.permute.xlu0 %3676 }
 0x401   :  { %v2852_v30 = vmul.f32 %v5714_v36, %v2851_v38  ;;  %v3246_v15 = vperm.slane %v2847_v58, 5  ;;  %v2271_v44 = vsel %vm2143_vm14, %v2077_v6, %v2207_v53  ;;  %v3248_v61 = vperm.slane %v2847_v58, 7  ;;  %v3674_v38 = vpop.permute.xlu2 %3673 }
 0x402   :  { %3703 = vperm.xlu1 %4311, %v5635_v55   ;;  %v6171_v55 = vld [vmem:[#allocation18_spill] sm:$0xff]  ;;  %vm2869_vm7 = vweird.f32 %v5735_v18  ;;  %v2873_v56 = vand.u32 2147483647, %v5735_v18  ;;  %v1813_v57 = vadd.f32 %v5737_v19, %v5180_v40 }
 0x403   :  { %v2206_v35 = vmul.f32 0.2, %v6171_v55  ;;  %vm2142_vm15 = vcmp.gt.f32.partialorder %v6171_v55, 0.0  ;;  %v2853_v59 = vadd.f32 %v5714_v36, %v2852_v30 }
 0x404   :  { %vm2874_vm10 = vcmp.eq.f32.partialorder %v2873_v56, 8.507059e+37 }
 0x405   :  { %v5750_v28 = vpop.eup %4382  ;;  %v2270_v3 = vsel %vm2142_vm15, %v6171_v55, %v2206_v35  ;;  %v2857_v31 = vsel %vm5765_vm3, %v5714_v36, %v2853_v59  ;;  %v2875_v35 = vand.u32 2147483648, %v5735_v18 }
 0x406   :  { %v4385_v21 = vpop.eup %4384  ;;  %v2865_v27 = vmul.f32 %v5750_v28, %v5735_v18  ;;  %v2340_v39 = vmul.f32 %v5195_v62, %v2270_v3  ;;  %vm2870_vm5 = vweird.f32 %v5750_v28 }
 0x407   :  { %v5711_v23 = vld [vmem:[#allocation1] sm:$0xff]  ;;  %v5777_v45 = vadd.f32 1.0, %v4385_v21  ;;  %vm2871_vm8 = vmor %vm2869_vm7, %vm2870_vm5  ;;  %v2876_v21 = vor.u32 1.1754944e-38, %v2875_v35 }
 0x408   :  { %3510 = vst [vmem:[#allocation1] ss:$9 sm:$0xff] %v3233_v16  ;;  %v1814_v16 = vpop.f32.mrf.mxu0 }
 0x409   :  { %3511 = vst [vmem:[#allocation1 + $0x1] ss:$9 sm:$0xff] %v3234_v22  ;;  %v3247_v22 = vperm.slane %v2847_v58, 6  ;;  %4386 = vrcp.f32 %v5777_v45  ;;  %vm2884_vm13 = vweird.f32 %v5777_v45 }
 0x40a   :  { %3512 = vst [vmem:[#allocation1 + $0x2] ss:$9 sm:$0xff] %v3235_v1  ;;  %v5756_v1 = vpop.f32.mrf.mxu3  ;;  %4388 = vpow2.f32 %v4227_v48 }
 0x40b   :  { %3513 = vst [vmem:[#allocation1 + $0x3] ss:$9 sm:$0xff] %v3236_v10  ;;  %v2858_v10 = vand.u32 2147483647, %v5704_v24  ;;  %v1815_v24 = vadd.f32 %v1814_v16, %v5180_v40 }
 0x40c   :  { %3514 = vst [vmem:[#allocation1 + $0x4] ss:$9 sm:$0xff] %v3237_v4 }
 0x40d   :  { %3515 = vst [vmem:[#allocation1 + $0x5] ss:$9 sm:$0xff] %v3238_v51  ;;  %v2341_v51 = vmul.f32 %v5197_v52, %v2271_v44  ;;  %vm2859_vm4 = vcmp.eq.f32.partialorder %v2858_v10, 8.507059e+37  ;;  %v6174_v10 = vld [vmem:[#allocation20_spill] sm:$0xff] }
 0x40e   :  { %3516 = vst [vmem:[#allocation1 + $0x6] ss:$9 sm:$0xff] %v3239_v12  ;;  %v1903_v12 = vpop.f32.mrf.mxu1  ;;  %v2862_v33 = vsel %vm2859_vm4, %v2861_v37, %v2857_v31  ;;  %v2210_v18 = vmul.f32 0.2, %v6174_v10  ;;  %vm2146_vm11 = vcmp.gt.f32.partialorder %v6174_v10, 0.0 }
 0x40f   :  { %3517 = vst [vmem:[#allocation1 + $0x7] ss:$9 sm:$0xff] %v3240_v0  ;;  %v2866_v0 = vsub.f32 1.0, %v2865_v27  ;;  %v2433_v7 = vadd.f32 %v2341_v51, %v2340_v39  ;;  %v1904_v2 = vadd.f32 %v1903_v12, %v1815_v24  ;;  %v3249_v63 = vperm.slane %v2862_v33, 0  ;;  %v5791_v30 = vpop.eup %4386  ;;  %v3680_v24 = vpop.permute.xlu1 %3679 }
 0x410   :  { %v3250_v54 = vperm.slane %v2862_v33, 1  ;;  %v3251_v60 = vperm.slane %v2862_v33, 2  ;;  %v3252_v58 = vperm.slane %v2862_v33, 3  ;;  %v3253_v53 = vperm.slane %v2862_v33, 4 }
 0x411   :  { %v1993_v36 = vadd.f32 %v1992_v47, %v1904_v2  ;;  %v2867_v11 = vmul.f32 %v5750_v28, %v2866_v0  ;;  %v3255_v55 = vperm.slane %v2862_v33, 6  ;;  %v3256_v59 = vperm.slane %v2862_v33, 7 }
 0x412   :  { %2434 = vadd.xlane.f32.xlu2 %v2433_v7  ;;  %3697 = vperm.xlu0 %4309, %v5580_v5   ;;  %v2081_v14 = vpop.f32.mrf.mxu3  ;;  %v2880_v44 = vmul.f32 %v5791_v30, %v5777_v45  ;;  %v5810_v27 = vadd.s32 4294967280, %v5784_v50  ;;  %v2274_v12 = vsel %vm2146_vm11, %v6174_v10, %v2210_v18  ;;  %v1902_v7 = vadd.f32 %v5742_v29, %v1813_v57 }
 0x413   :  { %v2868_v5 = vadd.f32 %v5750_v28, %v2867_v11  ;;  %v2344_v40 = vmul.f32 %v5195_v62, %v2274_v12  ;;  %vm2885_vm1 = vweird.f32 %v5791_v30 }
 0x414   :  { %v2881_v4 = vsub.f32 1.0, %v2880_v44  ;;  %v3776_v39 = vperm.slane %v3680_v24, %v5810_v27  ;;  %vm2886_vm14 = vmor %vm2884_vm13, %vm2885_vm1  ;;  %vm3781_vm1 = vcmask 261312   ;;  %vm3785_vm13 = vcmask 326912  }
 0x416   :  { %v5747_v42 = vld [vmem:[#allocation1] sm:$0xff]  ;;  %v2882_v37 = vmul.f32 %v5791_v30, %v2881_v4 }
 0x417   :  { %3519 = vst [vmem:[#allocation1] ss:$9 sm:$0xff] %v3241_v17  ;;  %v2082_v17 = vadd.f32 %v2081_v14, %v1993_v36  ;;  %v2890_v14 = vand.u32 2147483648, %v5777_v45 }
 0x418   :  { %3520 = vst [vmem:[#allocation1 + $0x1] ss:$9 sm:$0xff] %v3242_v32  ;;  %v5789_v32 = vadd.s32 4294967288, %v5784_v50 }
 0x419   :  { %3521 = vst [vmem:[#allocation1 + $0x2] ss:$9 sm:$0xff] %v3243_v34  ;;  %v3254_v34 = vperm.slane %v2862_v33, 5  ;;  %v2211_v41 = vmul.f32 0.2, %v2082_v17  ;;  %vm2147_vm9 = vcmp.gt.f32.partialorder %v2082_v17, 0.0 }
 0x41a   :  { %3522 = vst [vmem:[#allocation1 + $0x3] ss:$9 sm:$0xff] %v3244_v43  ;;  %v3770_v43 = vperm.slane %v3674_v38, %v5784_v50  ;;  %v2888_v38 = vand.u32 2147483647, %v5777_v45 }
 0x41b   :  { %3523 = vst [vmem:[#allocation1 + $0x4] ss:$9 sm:$0xff] %v3245_v25  ;;  %v3772_v25 = vperm.slane %v3677_v46, %v5789_v32 }
 0x41c   :  { %3524 = vst [vmem:[#allocation1 + $0x5] ss:$9 sm:$0xff] %v3246_v15  ;;  %v4389_v15 = vpop.eup %4388  ;;  %vm2889_vm15 = vcmp.eq.f32.partialorder %v2888_v38, 8.507059e+37 }
 0x41d   :  { %3525 = vst [vmem:[#allocation1 + $0x6] ss:$9 sm:$0xff] %v3247_v22  ;;  %v3774_v16 = vsel %vm3773_vm6, %v3772_v25, %v3770_v43  ;;  %v2872_v22 = vsel %vm2871_vm8, %v5750_v28, %v2868_v5  ;;  %v2275_v28 = vsel %vm2147_vm9, %v2082_v17, %v2211_v41  ;;  %v2408_v25 = vpop.xlane.xlu2 %2407 }
 0x41e   :  { %3526 = vst [vmem:[#allocation1 + $0x7] ss:$9 sm:$0xff] %v3248_v61  ;;  %v5804_v61 = vadd.f32 1.0, %v4389_v15  ;;  %v2877_v3 = vsel %vm2874_vm10, %v2876_v21, %v2872_v22  ;;  %v2345_v33 = vmul.f32 %v5197_v52, %v2275_v28 }
 0x41f   :  { %v3257_v51 = vperm.slane %v2877_v3, 0  ;;  %v3258_v31 = vperm.slane %v2877_v3, 1  ;;  %v3259_v47 = vperm.slane %v2877_v3, 2  ;;  %v3260_v48 = vperm.slane %v2877_v3, 3 }
 0x420   :  { %4390 = vrcp.f32 %v5804_v61  ;;  %v3261_v2 = vperm.slane %v2877_v3, 4  ;;  %v3262_v36 = vperm.slane %v2877_v3, 5  ;;  %v3263_v11 = vperm.slane %v2877_v3, 6 }
 0x421   :  { %v2439_v29 = vadd.f32 %v2345_v33, %v2344_v40  ;;  %v2905_v10 = vand.u32 2147483648, %v5804_v61  ;;  %vm2899_vm4 = vweird.f32 %v5804_v61  ;;  %v2903_v4 = vand.u32 2147483647, %v5804_v61 }
 0x423   :  { %v2906_v24 = vor.u32 1.1754944e-38, %v2905_v10  ;;  %vm2904_vm7 = vcmp.eq.f32.partialorder %v2903_v4, 8.507059e+37 }
 0x425   :  { %v5786_v6 = vld [vmem:[#allocation1] sm:$0xff] }
 0x426   :  { %3528 = vst [vmem:[#allocation1] ss:$9 sm:$0xff] %v3249_v63  ;;  %v5822_v19 = vpop.eup %4390  ;;  %v2883_v63 = vadd.f32 %v5791_v30, %v2882_v37 }
 0x427   :  { %3529 = vst [vmem:[#allocation1 + $0x1] ss:$9 sm:$0xff] %v3250_v54  ;;  %v5827_v54 = vsel %vm3777_vm12, %v3776_v39, %v3774_v16  ;;  %v2895_v46 = vmul.f32 %v5822_v19, %v5804_v61  ;;  %vm2900_vm3 = vweird.f32 %v5822_v19 }
 0x428   :  { %3530 = vst [vmem:[#allocation1 + $0x2] ss:$9 sm:$0xff] %v3251_v60  ;;  %v1991_v60 = vadd.f32 %v5744_v8, %v1902_v7  ;;  %v2887_v17 = vsel %vm2886_vm14, %v5791_v30, %v2883_v63  ;;  %vm2901_vm5 = vmor %vm2899_vm4, %vm2900_vm3 }
 0x429   :  { %3531 = vst [vmem:[#allocation1 + $0x3] ss:$9 sm:$0xff] %v3252_v58  ;;  %v3264_v58 = vperm.slane %v2877_v3, 7  ;;  %v2896_v5 = vsub.f32 1.0, %v2895_v46 }
 0x42a   :  { %3532 = vst [vmem:[#allocation1 + $0x4] ss:$9 sm:$0xff] %v3253_v53  ;;  %3700 = vperm.xlu2 %4310, %v5604_v26   ;;  %v2891_v53 = vor.u32 1.1754944e-38, %v2890_v14  ;;  %v2080_v8 = vadd.f32 %v5756_v1, %v1991_v60  ;;  %v6175_v26 = vld [vmem:[#allocation19_spill] sm:$0xff]  ;;  %v2417_v60 = vpop.xlane.xlu2 %2416 }
 0x42b   :  { %3533 = vst [vmem:[#allocation1 + $0x5] ss:$9 sm:$0xff] %v3254_v34  ;;  %v2897_v43 = vmul.f32 %v5822_v19, %v2896_v5  ;;  %v2208_v15 = vmul.f32 0.2, %v6175_v26  ;;  %vm2144_vm2 = vcmp.gt.f32.partialorder %v6175_v26, 0.0 }
 0x42c   :  { %3534 = vst [vmem:[#allocation1 + $0x6] ss:$9 sm:$0xff] %v3255_v55  ;;  %2440 = vadd.xlane.f32.xlu1 %v2439_v29  ;;  %v2892_v34 = vsel %vm2889_vm15, %v2891_v53, %v2887_v17  ;;  %v2209_v45 = vmul.f32 0.2, %v2080_v8  ;;  %vm2145_vm0 = vcmp.gt.f32.partialorder %v2080_v8, 0.0  ;;  %v2472_v53 = vadd.f32 %v5318_v9, %v2417_v60 }
 0x42d   :  { %3535 = vst [vmem:[#allocation1 + $0x7] ss:$9 sm:$0xff] %v3256_v59  ;;  %v3265_v55 = vperm.slane %v2892_v34, 0  ;;  %v3266_v35 = vperm.slane %v2892_v34, 1  ;;  %v3267_v30 = vperm.slane %v2892_v34, 2  ;;  %v2469_v59 = vadd.f32 %v5318_v9, %v2408_v25 }
 0x42e   :  { %v3268_v56 = vperm.slane %v2892_v34, 3  ;;  %v3269_v44 = vperm.slane %v2892_v34, 4  ;;  %v2273_v22 = vsel %vm2145_vm0, %v2080_v8, %v2209_v45  ;;  %v3270_v41 = vperm.slane %v2892_v34, 5  ;;  %v2414_v8 = vpop.xlane.xlu1 %2413 }
 0x42f   :  { %v4228_v16 = vmul.f32 -1.442695, %v2469_v59  ;;  %v2898_v21 = vadd.f32 %v5822_v19, %v2897_v43  ;;  %v2272_v18 = vsel %vm2144_vm2, %v6175_v26, %v2208_v15  ;;  %v3272_v3 = vperm.slane %v2892_v34, 7 }
 0x430   :  { %v2343_v28 = vmul.f32 %v5197_v52, %v2273_v22  ;;  %v2411_v52 = vpop.xlane.xlu0 %2410  ;;  %v4231_v26 = vmul.f32 -1.442695, %v2472_v53  ;;  %v5862_v59 = vadd.s32 4294967264, %v5784_v50 }
 0x431   :  { %4392 = vpow2.f32 %v4228_v16  ;;  %v2902_v57 = vsel %vm2901_vm5, %v5822_v19, %v2898_v21  ;;  %v2470_v33 = vadd.f32 %v5318_v9, %v2411_v52  ;;  %v5865_v21 = vadd.s32 4294967272, %v5784_v50 }
 0x432   :  { %3709 = vperm.xlu2 %4310, %v5688_v13   ;;  %v3271_v13 = vperm.slane %v2892_v34, 6  ;;  %v2907_v39 = vsel %vm2904_vm7, %v2906_v24, %v2902_v57  ;;  %v3686_v22 = vpop.permute.xlu2 %3685 }
 0x433   :  { %v3273_v61 = vperm.slane %v2907_v39, 0  ;;  %v3278_v40 = vperm.slane %v2907_v39, 5  ;;  %v3280_v63 = vperm.slane %v2907_v39, 7  ;;  %v3784_v4 = vperm.slane %v3686_v22, %v5862_v59 }
 0x434   :  { %v5818_v0 = vld [vmem:[#allocation1] sm:$0xff] }
 0x435   :  { %3537 = vst [vmem:[#allocation1] ss:$9 sm:$0xff] %v3257_v51  ;;  %v2342_v51 = vmul.f32 %v5195_v62, %v2272_v18  ;;  %v3277_v62 = vperm.slane %v2907_v39, 4 }
 0x436   :  { %3538 = vst [vmem:[#allocation1 + $0x1] ss:$9 sm:$0xff] %v3258_v31 }
 0x437   :  { %3539 = vst [vmem:[#allocation1 + $0x2] ss:$9 sm:$0xff] %v3259_v47  ;;  %v2436_v31 = vadd.f32 %v2343_v28, %v2342_v51  ;;  %v4393_v37 = vpop.eup %4392  ;;  %v3274_v47 = vperm.slane %v2907_v39, 1 }
 0x438   :  { %3540 = vst [vmem:[#allocation1 + $0x3] ss:$9 sm:$0xff] %v3260_v48  ;;  %v2597_v12 = vadd.f32 1.0, %v4393_v37  ;;  %v3275_v48 = vperm.slane %v2907_v39, 2 }
 0x439   :  { %3541 = vst [vmem:[#allocation1 + $0x4] ss:$9 sm:$0xff] %v3261_v2  ;;  %v4229_v2 = vmul.f32 -1.442695, %v2470_v33 }
 0x43a   :  { %3542 = vst [vmem:[#allocation1 + $0x5] ss:$9 sm:$0xff] %v3262_v36  ;;  %3718 = vperm.xlu2 %4310, %v5786_v6   ;;  %4394 = vrcp.f32 %v2597_v12  ;;  %v3276_v6 = vperm.slane %v2907_v39, 3  ;;  %v3279_v36 = vperm.slane %v2907_v39, 6  ;;  %v2920_v29 = vand.u32 2147483648, %v2597_v12 }
 0x43b   :  { %3543 = vst [vmem:[#allocation1 + $0x6] ss:$9 sm:$0xff] %v3263_v11  ;;  %4396 = vpow2.f32 %v4229_v2  ;;  %v2918_v38 = vand.u32 2147483647, %v2597_v12  ;;  %vm2914_vm9 = vweird.f32 %v2597_v12 }
 0x43c   :  { %3544 = vst [vmem:[#allocation1 + $0x7] ss:$9 sm:$0xff] %v3264_v58  ;;  %2437 = vadd.xlane.f32.xlu0 %v2436_v31  ;;  %v2921_v34 = vor.u32 1.1754944e-38, %v2920_v29 }
 0x43d   :  { %vm2919_vm11 = vcmp.eq.f32.partialorder %v2918_v38, 8.507059e+37  ;;  %v2423_v38 = vpop.xlane.xlu1 %2422 }
 0x440   :  { %v4395_v19 = vpop.eup %4394 }
 0x441   :  { %v2910_v11 = vmul.f32 %v4395_v19, %v2597_v12  ;;  %v4397_v58 = vpop.eup %4396  ;;  %vm2915_vm8 = vweird.f32 %v4395_v19 }
 0x442   :  { %v2598_v46 = vadd.f32 1.0, %v4397_v58  ;;  %vm2916_vm10 = vmor %vm2914_vm9, %vm2915_vm8 }
 0x443   :  { %v5843_v1 = vld [vmem:[#allocation1] sm:$0xff]  ;;  %v2911_v14 = vsub.f32 1.0, %v2910_v11 }
 0x444   :  { %3546 = vst [vmem:[#allocation1] ss:$9 sm:$0xff] %v3265_v55  ;;  %4398 = vrcp.f32 %v2598_v46  ;;  %v2471_v55 = vadd.f32 %v5318_v9, %v2414_v8  ;;  %v2935_v28 = vand.u32 2147483648, %v2598_v46  ;;  %v2933_v24 = vand.u32 2147483647, %v2598_v46 }
 0x445   :  { %3547 = vst [vmem:[#allocation1 + $0x1] ss:$9 sm:$0xff] %v3266_v35  ;;  %3712 = vperm.xlu1 %4311, %v5711_v23   ;;  %v2912_v23 = vmul.f32 %v4395_v19, %v2911_v14  ;;  %4400 = vpow2.f32 %v4231_v26  ;;  %vm2929_vm15 = vweird.f32 %v2598_v46  ;;  %v2474_v8 = vadd.f32 %v5318_v9, %v2423_v38 }
 0x446   :  { %3548 = vst [vmem:[#allocation1 + $0x2] ss:$9 sm:$0xff] %v3267_v30  ;;  %vm2934_vm2 = vcmp.eq.f32.partialorder %v2933_v24, 8.507059e+37 }
 0x447   :  { %3549 = vst [vmem:[#allocation1 + $0x3] ss:$9 sm:$0xff] %v3268_v56  ;;  %v2913_v17 = vadd.f32 %v4395_v19, %v2912_v23  ;;  %v3683_v56 = vpop.permute.xlu0 %3682 }
 0x448   :  { %3550 = vst [vmem:[#allocation1 + $0x4] ss:$9 sm:$0xff] %v3269_v44  ;;  %v3780_v18 = vperm.slane %v3683_v56, %v5865_v21 }
 0x449   :  { %3551 = vst [vmem:[#allocation1 + $0x5] ss:$9 sm:$0xff] %v3270_v41  ;;  %v2917_v5 = vsel %vm2916_vm10, %v4395_v19, %v2913_v17  ;;  %v4230_v41 = vmul.f32 -1.442695, %v2471_v55 }
 0x44a   :  { %3552 = vst [vmem:[#allocation1 + $0x6] ss:$9 sm:$0xff] %v3271_v13  ;;  %v2922_v45 = vsel %vm2919_vm11, %v2921_v34, %v2917_v5  ;;  %v4399_v44 = vpop.eup %4398  ;;  %v3782_v57 = vsel %vm3781_vm1, %v3780_v18, %v5827_v54 }
 0x44b   :  { %3553 = vst [vmem:[#allocation1 + $0x7] ss:$9 sm:$0xff] %v3272_v3  ;;  %v3281_v35 = vperm.slane %v2922_v45, 0  ;;  %v3282_v43 = vperm.slane %v2922_v45, 1  ;;  %v3283_v25 = vperm.slane %v2922_v45, 2  ;;  %v3285_v30 = vperm.slane %v2922_v45, 4  ;;  %v4401_v37 = vpop.eup %4400 }
 0x44c   :  { %v3286_v16 = vperm.slane %v2922_v45, 5  ;;  %v3287_v13 = vperm.slane %v2922_v45, 6  ;;  %v2925_v10 = vmul.f32 %v4399_v44, %v2598_v46  ;;  %4402 = vpow2.f32 %v4230_v41 }
 0x44d   :  { %3721 = vperm.xlu1 %4311, %v5818_v0   ;;  %v3284_v0 = vperm.slane %v2922_v45, 3  ;;  %vm2930_vm14 = vweird.f32 %v4399_v44  ;;  %v5872_v31 = vsel %vm3785_vm13, %v3784_v4, %v3782_v57  ;;  %v5875_v33 = vadd.f32 1.0, %v4401_v37 }
 0x44e   :  { %v2926_v3 = vsub.f32 1.0, %v2925_v10  ;;  %vm2931_vm0 = vmor %vm2929_vm15, %vm2930_vm14  ;;  %vm3789_vm14 = vcmask 392512  }
 0x44f   :  { %v2420_v55 = vpop.xlane.xlu0 %2419  ;;  %vm2959_vm9 = vweird.f32 %v5875_v33 }
 0x450   :  { %3706 = vperm.xlu0 %4309, %v5660_v20   ;;  %v3288_v20 = vperm.slane %v2922_v45, 7  ;;  %v2927_v51 = vmul.f32 %v4399_v44, %v2926_v3  ;;  %v2473_v56 = vadd.f32 %v5318_v9, %v2420_v55  ;;  %v3695_v55 = vpop.permute.xlu1 %3694 }
 0x452   :  { %v3554_v7 = vld [vmem:[#allocation1] sm:$0xff]  ;;  %v2928_v39 = vadd.f32 %v4399_v44, %v2927_v51  ;;  %v4403_v12 = vpop.eup %4402  ;;  %v4232_v10 = vmul.f32 -1.442695, %v2473_v56 }
 0x453   :  { %3555 = vst [vmem:[#allocation1] ss:$9 sm:$0xff] %v3273_v61  ;;  %3727 = vperm.xlu2 %4310, %v3554_v7   ;;  %v2936_v61 = vor.u32 1.1754944e-38, %v2935_v28 }
 0x454   :  { %3556 = vst [vmem:[#allocation1 + $0x1] ss:$9 sm:$0xff] %v3274_v47  ;;  %v2932_v52 = vsel %vm2931_vm0, %v4399_v44, %v2928_v39  ;;  %v2599_v47 = vadd.f32 1.0, %v4403_v12  ;;  %vm3793_vm0 = vcmask 458112  }
 0x455   :  { %3557 = vst [vmem:[#allocation1 + $0x2] ss:$9 sm:$0xff] %v3275_v48  ;;  %v2937_v54 = vsel %vm2934_vm2, %v2936_v61, %v2932_v52 }
 0x456   :  { %3558 = vst [vmem:[#allocation1 + $0x3] ss:$9 sm:$0xff] %v3276_v6  ;;  %v3289_v48 = vperm.slane %v2937_v54, 0  ;;  %v3290_v6 = vperm.slane %v2937_v54, 1  ;;  %4404 = vrcp.f32 %v2599_v47  ;;  %v3291_v2 = vperm.slane %v2937_v54, 2 }
 0x457   :  { %3559 = vst [vmem:[#allocation1 + $0x4] ss:$9 sm:$0xff] %v3277_v62  ;;  %4406 = vrcp.f32 %v5875_v33  ;;  %v3293_v62 = vperm.slane %v2937_v54, 4  ;;  %v3295_v19 = vperm.slane %v2937_v54, 6  ;;  %v2948_v23 = vand.u32 2147483647, %v2599_v47 }
 0x458   :  { %3560 = vst [vmem:[#allocation1 + $0x5] ss:$9 sm:$0xff] %v3278_v40  ;;  %3715 = vperm.xlu0 %4309, %v5747_v42   ;;  %v3292_v42 = vperm.slane %v2937_v54, 3  ;;  %v3294_v40 = vperm.slane %v2937_v54, 5  ;;  %vm2944_vm4 = vweird.f32 %v2599_v47 }
 0x459   :  { %3561 = vst [vmem:[#allocation1 + $0x6] ss:$9 sm:$0xff] %v3279_v36  ;;  %vm2949_vm7 = vcmp.eq.f32.partialorder %v2948_v23, 8.507059e+37 }
 0x45a   :  { %3562 = vst [vmem:[#allocation1 + $0x7] ss:$9 sm:$0xff] %v3280_v63  ;;  %v3296_v63 = vperm.slane %v2937_v54, 7 }
 0x45c   :  { %v4405_v36 = vpop.eup %4404 }
 0x45d   :  { %v4407_v11 = vpop.eup %4406  ;;  %v2940_v14 = vmul.f32 %v4405_v36, %v2599_v47  ;;  %vm2945_vm3 = vweird.f32 %v4405_v36 }
 0x45e   :  { %v2955_v60 = vmul.f32 %v4407_v11, %v5875_v33  ;;  %vm2946_vm5 = vmor %vm2944_vm4, %vm2945_vm3  ;;  %vm2960_vm8 = vweird.f32 %v4407_v11 }
 0x45f   :  { %v2941_v29 = vsub.f32 1.0, %v2940_v14  ;;  %vm2961_vm10 = vmor %vm2959_vm9, %vm2960_vm8  ;;  %v3689_v14 = vpop.permute.xlu0 %3688 }
 0x460   :  { %3724 = vperm.xlu0 %4309, %v5843_v1   ;;  %v2950_v1 = vand.u32 2147483648, %v2599_v47  ;;  %v2956_v17 = vsub.f32 1.0, %v2955_v60  ;;  %v2426_v47 = vpop.xlane.xlu2 %2425 }
 0x461   :  { %v3563_v15 = vld [vmem:[#allocation1] sm:$0xff]  ;;  %v2942_v58 = vmul.f32 %v4405_v36, %v2941_v29 }
 0x462   :  { %3564 = vst [vmem:[#allocation1] ss:$9 sm:$0xff] %v3281_v35  ;;  %3730 = vperm.xlu1 %4311, %v3563_v15   ;;  %v2951_v53 = vor.u32 1.1754944e-38, %v2950_v1  ;;  %v2957_v26 = vmul.f32 %v4407_v11, %v2956_v17 }
 0x463   :  { %3565 = vst [vmem:[#allocation1 + $0x1] ss:$9 sm:$0xff] %v3282_v43  ;;  %v2943_v46 = vadd.f32 %v4405_v36, %v2942_v58 }
 0x464   :  { %3566 = vst [vmem:[#allocation1 + $0x2] ss:$9 sm:$0xff] %v3283_v25  ;;  %v2958_v22 = vadd.f32 %v4407_v11, %v2957_v26 }
 0x465   :  { %3567 = vst [vmem:[#allocation1 + $0x3] ss:$9 sm:$0xff] %v3284_v0  ;;  %v2947_v5 = vsel %vm2946_vm5, %v4405_v36, %v2943_v46  ;;  %v4233_v0 = vmul.f32 -1.442695, %v2474_v8  ;;  %vm3797_vm5 = vcmask 523712  }
 0x466   :  { %3568 = vst [vmem:[#allocation1 + $0x4] ss:$9 sm:$0xff] %v3285_v30  ;;  %v2952_v45 = vsel %vm2949_vm7, %v2951_v53, %v2947_v5  ;;  %v2962_v18 = vsel %vm2961_vm10, %v4407_v11, %v2958_v22  ;;  %v5895_v11 = vadd.s32 4294967256, %v5784_v50 }
 0x467   :  { %3569 = vst [vmem:[#allocation1 + $0x5] ss:$9 sm:$0xff] %v3286_v16  ;;  %v3297_v35 = vperm.slane %v2952_v45, 0  ;;  %v3298_v43 = vperm.slane %v2952_v45, 1  ;;  %v3299_v25 = vperm.slane %v2952_v45, 2  ;;  %v3300_v15 = vperm.slane %v2952_v45, 3 }
 0x468   :  { %3570 = vst [vmem:[#allocation1 + $0x6] ss:$9 sm:$0xff] %v3287_v13  ;;  %v3301_v30 = vperm.slane %v2952_v45, 4  ;;  %v3302_v44 = vperm.slane %v2952_v45, 5  ;;  %v3303_v16 = vperm.slane %v2952_v45, 6  ;;  %v3304_v41 = vperm.slane %v2952_v45, 7 }
 0x469   :  { %3571 = vst [vmem:[#allocation1 + $0x7] ss:$9 sm:$0xff] %v3288_v20  ;;  %4408 = vpow2.f32 %v4233_v0  ;;  %v2965_v13 = vand.u32 2147483648, %v5875_v33  ;;  %v2963_v20 = vand.u32 2147483647, %v5875_v33  ;;  %v2475_v33 = vadd.f32 %v5318_v9, %v2426_v47 }
 0x46a   :  { %4410 = vpow2.f32 %v4232_v10  ;;  %v3788_v23 = vperm.slane %v3689_v14, %v5895_v11  ;;  %v5906_v45 = vadd.s32 4294967240, %v5784_v50 }
 0x46b   :  { %v2966_v3 = vor.u32 1.1754944e-38, %v2965_v13  ;;  %vm2964_vm11 = vcmp.eq.f32.partialorder %v2963_v20, 8.507059e+37 }
 0x46c   :  { %v3790_v8 = vsel %vm3789_vm14, %v3788_v23, %v5872_v31  ;;  %v3796_v56 = vperm.slane %v3695_v55, %v5906_v45 }
 0x46d   :  { %v2967_v28 = vsel %vm2964_vm11, %v2966_v3, %v2962_v18  ;;  %v2432_v3 = vpop.xlane.xlu1 %2431 }
 0x46e   :  { %v3305_v24 = vperm.slane %v2967_v28, 0  ;;  %v3306_v39 = vperm.slane %v2967_v28, 1  ;;  %v3307_v61 = vperm.slane %v2967_v28, 2  ;;  %v3308_v52 = vperm.slane %v2967_v28, 3 }
 0x46f   :  { %v4409_v4 = vpop.eup %4408  ;;  %v3309_v54 = vperm.slane %v2967_v28, 4 }
 0x470   :  { %v3572_v7 = vld [vmem:[#allocation1] sm:$0xff]  ;;  %v4411_v57 = vpop.eup %4410  ;;  %v5885_v51 = vadd.f32 1.0, %v4409_v4 }
 0x471   :  { %3573 = vst [vmem:[#allocation1] ss:$9 sm:$0xff] %v3289_v48  ;;  %3733 = vperm.xlu0 %4309, %v3572_v7   ;;  %v2601_v37 = vadd.f32 1.0, %v4411_v57  ;;  %v3310_v48 = vperm.slane %v2967_v28, 5  ;;  %v3311_v7 = vperm.slane %v2967_v28, 6  ;;  %v2429_v57 = vpop.xlane.xlu0 %2428 }
 0x472   :  { %3574 = vst [vmem:[#allocation1 + $0x1] ss:$9 sm:$0xff] %v3290_v6  ;;  %v4234_v6 = vmul.f32 -1.442695, %v2475_v33  ;;  %v2995_v4 = vand.u32 2147483648, %v5885_v51  ;;  %vm2989_vm8 = vweird.f32 %v5885_v51 }
 0x473   :  { %3575 = vst [vmem:[#allocation1 + $0x2] ss:$9 sm:$0xff] %v3291_v2  ;;  %4412 = vrcp.f32 %v2601_v37  ;;  %v3312_v2 = vperm.slane %v2967_v28, 7  ;;  %v2978_v60 = vand.u32 2147483647, %v2601_v37  ;;  %v2980_v1 = vand.u32 2147483648, %v2601_v37 }
 0x474   :  { %3576 = vst [vmem:[#allocation1 + $0x3] ss:$9 sm:$0xff] %v3292_v42  ;;  %4414 = vrcp.f32 %v5885_v51  ;;  %vm2974_vm2 = vweird.f32 %v2601_v37  ;;  %v2993_v28 = vand.u32 2147483647, %v5885_v51 }
 0x475   :  { %3577 = vst [vmem:[#allocation1 + $0x4] ss:$9 sm:$0xff] %v3293_v62  ;;  %4416 = vpow2.f32 %v4234_v6  ;;  %vm2979_vm4 = vcmp.eq.f32.partialorder %v2978_v60, 8.507059e+37 }
 0x476   :  { %3578 = vst [vmem:[#allocation1 + $0x5] ss:$9 sm:$0xff] %v3294_v40  ;;  %vm2994_vm10 = vcmp.eq.f32.partialorder %v2993_v28, 8.507059e+37 }
 0x477   :  { %3579 = vst [vmem:[#allocation1 + $0x6] ss:$9 sm:$0xff] %v3295_v19  ;;  %v5892_v19 = vadd.s32 4294967248, %v5784_v50 }
 0x478   :  { %3580 = vst [vmem:[#allocation1 + $0x7] ss:$9 sm:$0xff] %v3296_v63  ;;  %v3692_v63 = vpop.permute.xlu2 %3691 }
 0x479   :  { %v4413_v42 = vpop.eup %4412  ;;  %v3792_v46 = vperm.slane %v3692_v63, %v5892_v19 }
 0x47a   :  { %v5889_v62 = vpop.eup %4414  ;;  %v2970_v40 = vmul.f32 %v4413_v42, %v2601_v37  ;;  %vm2975_vm15 = vweird.f32 %v4413_v42  ;;  %v2477_v37 = vadd.f32 %v5318_v9, %v2432_v3 }
 0x47b   :  { %v2985_v29 = vmul.f32 %v5889_v62, %v5885_v51  ;;  %v4417_v38 = vpop.eup %4416  ;;  %vm2976_vm3 = vmor %vm2974_vm2, %vm2975_vm15  ;;  %vm2990_vm7 = vweird.f32 %v5889_v62 }
 0x47c   :  { %v2971_v36 = vsub.f32 1.0, %v2970_v40  ;;  %v5901_v53 = vadd.f32 1.0, %v4417_v38  ;;  %vm2991_vm9 = vmor %vm2989_vm8, %vm2990_vm7  ;;  %v4236_v51 = vmul.f32 -1.442695, %v2477_v37 }
 0x47d   :  { %v2986_v5 = vsub.f32 1.0, %v2985_v29 }
 0x47e   :  { %v2972_v58 = vmul.f32 %v4413_v42, %v2971_v36  ;;  %4418 = vrcp.f32 %v5901_v53  ;;  %v3010_v60 = vand.u32 2147483648, %v5901_v53  ;;  %vm3004_vm15 = vweird.f32 %v5901_v53 }
 0x47f   :  { %v3581_v34 = vld [vmem:[#allocation1] sm:$0xff]  ;;  %v2987_v31 = vmul.f32 %v5889_v62, %v2986_v5  ;;  %v3008_v23 = vand.u32 2147483647, %v5901_v53 }
 0x480   :  { %3736 = vperm.xlu2 %4310, %v3581_v34   ;;  %3582 = vst [vmem:[#allocation1] ss:$9 sm:$0xff] %v3297_v35  ;;  %v2973_v17 = vadd.f32 %v4413_v42, %v2972_v58  ;;  %v2981_v35 = vor.u32 1.1754944e-38, %v2980_v1  ;;  %v3011_v5 = vor.u32 1.1754944e-38, %v3010_v60 }
 0x481   :  { %3583 = vst [vmem:[#allocation1 + $0x1] ss:$9 sm:$0xff] %v3298_v43  ;;  %v3794_v43 = vsel %vm3793_vm0, %v3792_v46, %v3790_v8  ;;  %v2988_v20 = vadd.f32 %v5889_v62, %v2987_v31  ;;  %v5936_v8 = vadd.s32 4294967232, %v5784_v50 }
 0x482   :  { %3584 = vst [vmem:[#allocation1 + $0x2] ss:$9 sm:$0xff] %v3299_v25  ;;  %v2977_v25 = vsel %vm2976_vm3, %v4413_v42, %v2973_v17  ;;  %vm3009_vm3 = vcmp.eq.f32.partialorder %v3008_v23, 8.507059e+37  ;;  %v5958_v23 = vadd.s32 4294967224, %v5784_v50 }
 0x483   :  { %3585 = vst [vmem:[#allocation1 + $0x3] ss:$9 sm:$0xff] %v3300_v15  ;;  %v2982_v26 = vsel %vm2979_vm4, %v2981_v35, %v2977_v25  ;;  %vm3801_vm4 = vcmask 589312  }
 0x484   :  { %3586 = vst [vmem:[#allocation1 + $0x4] ss:$9 sm:$0xff] %v3301_v30  ;;  %v3313_v15 = vperm.slane %v2982_v26, 0  ;;  %v3314_v0 = vperm.slane %v2982_v26, 1  ;;  %v3315_v30 = vperm.slane %v2982_v26, 2  ;;  %v3318_v22 = vperm.slane %v2982_v26, 5  ;;  %v5915_v10 = vpop.eup %4418 }
 0x485   :  { %3587 = vst [vmem:[#allocation1 + $0x5] ss:$9 sm:$0xff] %v3302_v44  ;;  %v3316_v44 = vperm.slane %v2982_v26, 3  ;;  %v3319_v13 = vperm.slane %v2982_v26, 6  ;;  %v3320_v18 = vperm.slane %v2982_v26, 7  ;;  %vm3005_vm11 = vweird.f32 %v5915_v10  ;;  %v2435_v38 = vpop.xlane.xlu2 %2434 }
 0x486   :  { %3588 = vst [vmem:[#allocation1 + $0x6] ss:$9 sm:$0xff] %v3303_v16  ;;  %v3317_v16 = vperm.slane %v2982_v26, 4  ;;  %vm3006_vm2 = vmor %vm3004_vm15, %vm3005_vm11  ;;  %v2478_v46 = vadd.f32 %v5318_v9, %v2435_v38 }
 0x487   :  { %3589 = vst [vmem:[#allocation1 + $0x7] ss:$9 sm:$0xff] %v3304_v41  ;;  %v5913_v41 = vsel %vm3797_vm5, %v3796_v56, %v3794_v43 }
 0x488   :  { %v4237_v43 = vmul.f32 -1.442695, %v2478_v46 }
 0x48d   :  { %v3701_v38 = vpop.permute.xlu2 %3700 }
 0x48e   :  { %v3590_v12 = vld [vmem:[#allocation1] sm:$0xff] }
 0x48f   :  { %3591 = vst [vmem:[#allocation1] ss:$9 sm:$0xff] %v3305_v24  ;;  %3739 = vperm.xlu1 %4311, %v3590_v12   ;;  %v3000_v24 = vmul.f32 %v5915_v10, %v5901_v53  ;;  %v2476_v12 = vadd.f32 %v5318_v9, %v2429_v57 }
 0x490   :  { %3592 = vst [vmem:[#allocation1 + $0x1] ss:$9 sm:$0xff] %v3306_v39  ;;  %v2992_v39 = vsel %vm2991_vm9, %v5889_v62, %v2988_v20 }
 0x491   :  { %3593 = vst [vmem:[#allocation1 + $0x2] ss:$9 sm:$0xff] %v3307_v61  ;;  %v2996_v61 = vor.u32 1.1754944e-38, %v2995_v4 }
 0x492   :  { %3594 = vst [vmem:[#allocation1 + $0x3] ss:$9 sm:$0xff] %v3308_v52  ;;  %v4235_v52 = vmul.f32 -1.442695, %v2476_v12 }
 0x493   :  { %3595 = vst [vmem:[#allocation1 + $0x4] ss:$9 sm:$0xff] %v3309_v54  ;;  %v2997_v47 = vsel %vm2994_vm10, %v2996_v61, %v2992_v39  ;;  %v3001_v54 = vsub.f32 1.0, %v3000_v24 }
 0x494   :  { %3596 = vst [vmem:[#allocation1 + $0x5] ss:$9 sm:$0xff] %v3310_v48  ;;  %4420 = vpow2.f32 %v4235_v52  ;;  %v3321_v33 = vperm.slane %v2997_v47, 0  ;;  %v3322_v48 = vperm.slane %v2997_v47, 1  ;;  %v3324_v42 = vperm.slane %v2997_v47, 3 }
 0x495   :  { %3597 = vst [vmem:[#allocation1 + $0x6] ss:$9 sm:$0xff] %v3311_v7  ;;  %v3002_v6 = vmul.f32 %v5915_v10, %v3001_v54  ;;  %4422 = vpow2.f32 %v4236_v51  ;;  %v3325_v40 = vperm.slane %v2997_v47, 4  ;;  %v3326_v36 = vperm.slane %v2997_v47, 5 }
 0x496   :  { %3598 = vst [vmem:[#allocation1 + $0x7] ss:$9 sm:$0xff] %v3312_v2  ;;  %v3323_v2 = vperm.slane %v2997_v47, 2  ;;  %v3327_v29 = vperm.slane %v2997_v47, 6  ;;  %v3328_v58 = vperm.slane %v2997_v47, 7 }
 0x497   :  { %v3003_v63 = vadd.f32 %v5915_v10, %v3002_v6 }
 0x499   :  { %v3007_v17 = vsel %vm3006_vm2, %v5915_v10, %v3003_v63 }
 0x49a   :  { %v4421_v62 = vpop.eup %4420  ;;  %v3012_v35 = vsel %vm3009_vm3, %v3011_v5, %v3007_v17  ;;  %v3804_v5 = vperm.slane %v3701_v38, %v5958_v23 }
 0x49b   :  { %v2604_v14 = vadd.f32 1.0, %v4421_v62  ;;  %v4423_v1 = vpop.eup %4422  ;;  %v3335_v4 = vperm.slane %v3012_v35, 6  ;;  %v3336_v57 = vperm.slane %v3012_v35, 7 }
 0x49c   :  { %v5938_v55 = vadd.f32 1.0, %v4423_v1 }
 0x49d   :  { %v3599_v34 = vld [vmem:[#allocation1] sm:$0xff]  ;;  %4424 = vrcp.f32 %v2604_v14  ;;  %v3025_v10 = vand.u32 2147483648, %v2604_v14  ;;  %vm3019_vm8 = vweird.f32 %v2604_v14  ;;  %v3023_v3 = vand.u32 2147483647, %v2604_v14 }
 0x49e   :  { %3742 = vperm.xlu0 %4309, %v3599_v34   ;;  %3600 = vst [vmem:[#allocation1] ss:$9 sm:$0xff] %v3313_v15  ;;  %v3698_v34 = vpop.permute.xlu0 %3697  ;;  %4426 = vrcp.f32 %v5938_v55  ;;  %v3040_v63 = vand.u32 2147483648, %v5938_v55  ;;  %vm3034_vm15 = vweird.f32 %v5938_v55 }
 0x49f   :  { %3601 = vst [vmem:[#allocation1 + $0x1] ss:$9 sm:$0xff] %v3314_v0  ;;  %v3800_v53 = vperm.slane %v3698_v34, %v5936_v8  ;;  %v3329_v0 = vperm.slane %v3012_v35, 0  ;;  %4428 = vpow2.f32 %v4237_v43  ;;  %v3026_v39 = vor.u32 1.1754944e-38, %v3025_v10 }
 0x4a0   :  { %3602 = vst [vmem:[#allocation1 + $0x2] ss:$9 sm:$0xff] %v3315_v30  ;;  %v3330_v30 = vperm.slane %v3012_v35, 1  ;;  %vm3024_vm10 = vcmp.eq.f32.partialorder %v3023_v3, 8.507059e+37  ;;  %v5961_v34 = vadd.s32 4294967216, %v5784_v50 }
 0x4a1   :  { %3603 = vst [vmem:[#allocation1 + $0x3] ss:$9 sm:$0xff] %v3316_v44  ;;  %v5944_v15 = vsel %vm3801_vm4, %v3800_v53, %v5913_v41  ;;  %v3331_v44 = vperm.slane %v3012_v35, 2 }
 0x4a2   :  { %3604 = vst [vmem:[#allocation1 + $0x4] ss:$9 sm:$0xff] %v3317_v16  ;;  %v3332_v16 = vperm.slane %v3012_v35, 3 }
 0x4a3   :  { %3605 = vst [vmem:[#allocation1 + $0x5] ss:$9 sm:$0xff] %v3318_v22  ;;  %v4425_v25 = vpop.eup %4424 }
 0x4a4   :  { %3606 = vst [vmem:[#allocation1 + $0x6] ss:$9 sm:$0xff] %v3319_v13  ;;  %v3015_v26 = vmul.f32 %v4425_v25, %v2604_v14  ;;  %vm3020_vm7 = vweird.f32 %v4425_v25  ;;  %v3333_v13 = vperm.slane %v3012_v35, 4  ;;  %v4427_v20 = vpop.eup %4426  ;;  %v3704_v14 = vpop.permute.xlu1 %3703 }
 0x4a5   :  { %3607 = vst [vmem:[#allocation1 + $0x7] ss:$9 sm:$0xff] %v3320_v18  ;;  %v3334_v18 = vperm.slane %v3012_v35, 5  ;;  %vm3021_vm9 = vmor %vm3019_vm8, %vm3020_vm7  ;;  %v4429_v28 = vpop.eup %4428  ;;  %v3030_v37 = vmul.f32 %v4427_v20, %v5938_v55  ;;  %vm3035_vm11 = vweird.f32 %v4427_v20  ;;  %vm3805_vm7 = vcmask 654912  }
 0x4a6   :  { %v3016_v56 = vsub.f32 1.0, %v3015_v26  ;;  %v5947_v61 = vadd.f32 1.0, %v4429_v28  ;;  %vm3036_vm2 = vmor %vm3034_vm15, %vm3035_vm11  ;;  %v3806_v26 = vsel %vm3805_vm7, %v3804_v5, %v5944_v15  ;;  %vm3809_vm8 = vcmask 720512  }
 0x4a7   :  { %v3031_v52 = vsub.f32 1.0, %v3030_v37 }
 0x4a8   :  { %v3017_v22 = vmul.f32 %v4425_v25, %v3016_v56  ;;  %4430 = vrcp.f32 %v5947_v61 }
 0x4aa   :  { %v3018_v41 = vadd.f32 %v4425_v25, %v3017_v22 }
 0x4ac   :  { %v3608_v7 = vld [vmem:[#allocation1] sm:$0xff]  ;;  %v3022_v24 = vsel %vm3021_vm9, %v4425_v25, %v3018_v41  ;;  %v3055_v41 = vand.u32 2147483648, %v5947_v61 }
 0x4ad   :  { %3609 = vst [vmem:[#allocation1] ss:$9 sm:$0xff] %v3321_v33  ;;  %3745 = vperm.xlu2 %4310, %v3608_v7   ;;  %v3027_v12 = vsel %vm3024_vm10, %v3026_v39, %v3022_v24  ;;  %v3032_v33 = vmul.f32 %v4427_v20, %v3031_v52  ;;  %vm3049_vm10 = vweird.f32 %v5947_v61 }
 0x4ae   :  { %3610 = vst [vmem:[#allocation1 + $0x1] ss:$9 sm:$0xff] %v3322_v48  ;;  %v3337_v47 = vperm.slane %v3027_v12, 0  ;;  %v3338_v54 = vperm.slane %v3027_v12, 1  ;;  %v3339_v51 = vperm.slane %v3027_v12, 2  ;;  %v3340_v48 = vperm.slane %v3027_v12, 3  ;;  %v5950_v62 = vpop.eup %4430 }
 0x4af   :  { %3611 = vst [vmem:[#allocation1 + $0x2] ss:$9 sm:$0xff] %v3323_v2  ;;  %v3341_v6 = vperm.slane %v3027_v12, 4  ;;  %v3342_v2 = vperm.slane %v3027_v12, 5  ;;  %v3045_v60 = vmul.f32 %v5950_v62, %v5947_v61  ;;  %v2438_v35 = vpop.xlane.xlu0 %2437  ;;  %vm3050_vm9 = vweird.f32 %v5950_v62 }
 0x4b0   :  { %3612 = vst [vmem:[#allocation1 + $0x3] ss:$9 sm:$0xff] %v3324_v42  ;;  %v3343_v42 = vperm.slane %v3027_v12, 6  ;;  %vm3051_vm11 = vmor %vm3049_vm10, %vm3050_vm9 }
 0x4b1   :  { %3613 = vst [vmem:[#allocation1 + $0x4] ss:$9 sm:$0xff] %v3325_v40  ;;  %v3033_v40 = vadd.f32 %v4427_v20, %v3032_v33  ;;  %v3046_v17 = vsub.f32 1.0, %v3045_v60 }
 0x4b2   :  { %3614 = vst [vmem:[#allocation1 + $0x5] ss:$9 sm:$0xff] %v3326_v36  ;;  %v3344_v36 = vperm.slane %v3027_v12, 7 }
 0x4b3   :  { %3615 = vst [vmem:[#allocation1 + $0x6] ss:$9 sm:$0xff] %v3327_v29  ;;  %v3038_v29 = vand.u32 2147483647, %v5938_v55  ;;  %v3037_v1 = vsel %vm3036_vm2, %v4427_v20, %v3033_v40  ;;  %v2441_v55 = vpop.xlane.xlu1 %2440  ;;  %v3047_v25 = vmul.f32 %v5950_v62, %v3046_v17 }
 0x4b4   :  { %3616 = vst [vmem:[#allocation1 + $0x7] ss:$9 sm:$0xff] %v3328_v58  ;;  %v3041_v58 = vor.u32 1.1754944e-38, %v3040_v63  ;;  %v2480_v56 = vadd.f32 %v5318_v9, %v2441_v55 }
 0x4b5   :  { %vm3039_vm3 = vcmp.eq.f32.partialorder %v3038_v29, 8.507059e+37  ;;  %v3048_v15 = vadd.f32 %v5950_v62, %v3047_v25 }
 0x4b6   :  { %v3042_v46 = vsel %vm3039_vm3, %v3041_v58, %v3037_v1  ;;  %v4239_v3 = vmul.f32 -1.442695, %v2480_v56 }
 0x4b7   :  { %v3345_v53 = vperm.slane %v3042_v46, 0  ;;  %v3346_v43 = vperm.slane %v3042_v46, 1  ;;  %v3349_v22 = vperm.slane %v3042_v46, 4  ;;  %v3350_v10 = vperm.slane %v3042_v46, 5 }
 0x4b8   :  { %v3052_v28 = vsel %vm3051_vm11, %v5950_v62, %v3048_v15 }
 0x4bb   :  { %v3617_v31 = vld [vmem:[#allocation1] sm:$0xff] }
 0x4bc   :  { %3748 = vperm.xlu1 %4311, %v3617_v31   ;;  %3618 = vst [vmem:[#allocation1] ss:$9 sm:$0xff] %v3329_v0  ;;  %v3808_v31 = vperm.slane %v3704_v14, %v5961_v34 }
 0x4bd   :  { %3619 = vst [vmem:[#allocation1 + $0x1] ss:$9 sm:$0xff] %v3330_v30  ;;  %v3347_v30 = vperm.slane %v3042_v46, 2 }
 0x4be   :  { %3620 = vst [vmem:[#allocation1 + $0x2] ss:$9 sm:$0xff] %v3331_v44  ;;  %v3348_v44 = vperm.slane %v3042_v46, 3 }
 0x4bf   :  { %3621 = vst [vmem:[#allocation1 + $0x3] ss:$9 sm:$0xff] %v3332_v16  ;;  %v2479_v16 = vadd.f32 %v5318_v9, %v2438_v35  ;;  %v3053_v9 = vand.u32 2147483647, %v5947_v61 }
 0x4c0   :  { %3622 = vst [vmem:[#allocation1 + $0x4] ss:$9 sm:$0xff] %v3333_v13  ;;  %v5971_v13 = vsel %vm3809_vm8, %v3808_v31, %v3806_v26 }
 0x4c1   :  { %3623 = vst [vmem:[#allocation1 + $0x5] ss:$9 sm:$0xff] %v3334_v18  ;;  %v4238_v20 = vmul.f32 -1.442695, %v2479_v16  ;;  %v3351_v18 = vperm.slane %v3042_v46, 6  ;;  %vm3054_vm15 = vcmp.eq.f32.partialorder %v3053_v9, 8.507059e+37 }
 0x4c2   :  { %3624 = vst [vmem:[#allocation1 + $0x6] ss:$9 sm:$0xff] %v3335_v4  ;;  %v3352_v4 = vperm.slane %v3042_v46, 7 }
 0x4c3   :  { %3625 = vst [vmem:[#allocation1 + $0x7] ss:$9 sm:$0xff] %v3336_v57  ;;  %4432 = vpow2.f32 %v4238_v20  ;;  %v3056_v57 = vor.u32 1.1754944e-38, %v3055_v41 }
 0x4c4   :  { %4434 = vpow2.f32 %v4239_v3 }
 0x4c5   :  { %v3057_v24 = vsel %vm3054_vm15, %v3056_v57, %v3052_v28 }
 0x4c6   :  { %v3353_v12 = vperm.slane %v3057_v24, 0  ;;  %v3356_v61 = vperm.slane %v3057_v24, 3  ;;  %v3357_v33 = vperm.slane %v3057_v24, 4 }
 0x4c9   :  { %v4433_v37 = vpop.eup %4432 }
 0x4ca   :  { %v3626_v7 = vld [vmem:[#allocation1] sm:$0xff]  ;;  %v2607_v39 = vadd.f32 1.0, %v4433_v37  ;;  %v4435_v52 = vpop.eup %4434 }
 0x4cb   :  { %3751 = vperm.xlu0 %4309, %v3626_v7   ;;  %3627 = vst [vmem:[#allocation1] ss:$9 sm:$0xff] %v3337_v47  ;;  %v3354_v47 = vperm.slane %v3057_v24, 1  ;;  %v3358_v7 = vperm.slane %v3057_v24, 5 }
 0x4cc   :  { %3628 = vst [vmem:[#allocation1 + $0x1] ss:$9 sm:$0xff] %v3338_v54  ;;  %4436 = vrcp.f32 %v2607_v39  ;;  %v3068_v14 = vand.u32 2147483647, %v2607_v39  ;;  %vm3064_vm3 = vweird.f32 %v2607_v39 }
 0x4cd   :  { %3629 = vst [vmem:[#allocation1 + $0x2] ss:$9 sm:$0xff] %v3339_v51  ;;  %v3355_v51 = vperm.slane %v3057_v24, 2 }
 0x4ce   :  { %3630 = vst [vmem:[#allocation1 + $0x3] ss:$9 sm:$0xff] %v3340_v48  ;;  %v2608_v48 = vadd.f32 1.0, %v4435_v52  ;;  %vm3069_vm10 = vcmp.eq.f32.partialorder %v3068_v14, 8.507059e+37  ;;  %v5979_v52 = vpop.permute.xlu1 %3712 }
 0x4cf   :  { %3631 = vst [vmem:[#allocation1 + $0x4] ss:$9 sm:$0xff] %v3341_v6  ;;  %v3359_v6 = vperm.slane %v3057_v24, 6 }
 0x4d0   :  { %3632 = vst [vmem:[#allocation1 + $0x5] ss:$9 sm:$0xff] %v3342_v2  ;;  %4438 = vrcp.f32 %v2608_v48  ;;  %vm3079_vm15 = vweird.f32 %v2608_v48  ;;  %v3083_v16 = vand.u32 2147483647, %v2608_v48 }
 0x4d1   :  { %3633 = vst [vmem:[#allocation1 + $0x6] ss:$9 sm:$0xff] %v3343_v42  ;;  %v3360_v42 = vperm.slane %v3057_v24, 7 }
 0x4d2   :  { %3634 = vst [vmem:[#allocation1 + $0x7] ss:$9 sm:$0xff] %v3344_v36  ;;  %v4437_v2 = vpop.eup %4436  ;;  %v3070_v36 = vand.u32 2147483648, %v2607_v39 }
 0x4d3   :  { %v3060_v62 = vmul.f32 %v4437_v2, %v2607_v39  ;;  %vm3065_vm2 = vweird.f32 %v4437_v2  ;;  %v3707_v39 = vpop.permute.xlu0 %3706 }
 0x4d4   :  { %vm3066_vm9 = vmor %vm3064_vm3, %vm3065_vm2  ;;  %v3071_v1 = vor.u32 1.1754944e-38, %v3070_v36  ;;  %vm3084_vm3 = vcmp.eq.f32.partialorder %v3083_v16, 8.507059e+37 }
 0x4d5   :  { %v3061_v40 = vsub.f32 1.0, %v3060_v62 }
 0x4d6   :  { %v4439_v29 = vpop.eup %4438 }
 0x4d7   :  { %v3062_v63 = vmul.f32 %v4437_v2, %v3061_v40  ;;  %v3075_v46 = vmul.f32 %v4439_v29, %v2608_v48  ;;  %vm3080_vm11 = vweird.f32 %v4439_v29 }
 0x4d8   :  { %vm3081_vm2 = vmor %vm3079_vm15, %vm3080_vm11 }
 0x4d9   :  { %v3635_v0 = vld [vmem:[#allocation1] sm:$0xff]  ;;  %v3063_v60 = vadd.f32 %v4437_v2, %v3062_v63  ;;  %v3076_v25 = vsub.f32 1.0, %v3075_v46 }
 0x4da   :  { %3754 = vperm.xlu2 %4310, %v3635_v0   ;;  %3636 = vst [vmem:[#allocation1] ss:$9 sm:$0xff] %v3345_v53 }
 0x4db   :  { %3637 = vst [vmem:[#allocation1 + $0x1] ss:$9 sm:$0xff] %v3346_v43  ;;  %v3067_v38 = vsel %vm3066_vm9, %v4437_v2, %v3063_v60  ;;  %v3077_v31 = vmul.f32 %v4439_v29, %v3076_v25  ;;  %v3815_v25 = vadd.s32 4294967200, %v5784_v50 }
 0x4dc   :  { %3638 = vst [vmem:[#allocation1 + $0x2] ss:$9 sm:$0xff] %v3347_v30  ;;  %v3072_v17 = vsel %vm3069_vm10, %v3071_v1, %v3067_v38 }
 0x4dd   :  { %3639 = vst [vmem:[#allocation1 + $0x3] ss:$9 sm:$0xff] %v3348_v44  ;;  %v3361_v5 = vperm.slane %v3072_v17, 0  ;;  %v3362_v55 = vperm.slane %v3072_v17, 1  ;;  %v3363_v53 = vperm.slane %v3072_v17, 2  ;;  %v3364_v35 = vperm.slane %v3072_v17, 3 }
 0x4de   :  { %3640 = vst [vmem:[#allocation1 + $0x4] ss:$9 sm:$0xff] %v3349_v22  ;;  %v3365_v43 = vperm.slane %v3072_v17, 4  ;;  %v3366_v26 = vperm.slane %v3072_v17, 5  ;;  %v3367_v0 = vperm.slane %v3072_v17, 6  ;;  %v3368_v30 = vperm.slane %v3072_v17, 7 }
 0x4df   :  { %3641 = vst [vmem:[#allocation1 + $0x5] ss:$9 sm:$0xff] %v3350_v10  ;;  %v3078_v56 = vadd.f32 %v4439_v29, %v3077_v31  ;;  %v3085_v44 = vand.u32 2147483648, %v2608_v48 }
 0x4e0   :  { %3642 = vst [vmem:[#allocation1 + $0x6] ss:$9 sm:$0xff] %v3351_v18 }
 0x4e1   :  { %3643 = vst [vmem:[#allocation1 + $0x7] ss:$9 sm:$0xff] %v3352_v4  ;;  %v3082_v22 = vsel %vm3081_vm2, %v4439_v29, %v3078_v56  ;;  %v3086_v10 = vor.u32 1.1754944e-38, %v3085_v44 }
 0x4e3   :  { %v3087_v15 = vsel %vm3084_vm3, %v3086_v10, %v3082_v22 }
 0x4e4   :  { %v3369_v20 = vperm.slane %v3087_v15, 0  ;;  %v3370_v18 = vperm.slane %v3087_v15, 1  ;;  %v3371_v3 = vperm.slane %v3087_v15, 2  ;;  %v3372_v4 = vperm.slane %v3087_v15, 3 }
 0x4e5   :  { %v3373_v9 = vperm.slane %v3087_v15, 4  ;;  %v3374_v28 = vperm.slane %v3087_v15, 5  ;;  %v3375_v57 = vperm.slane %v3087_v15, 6  ;;  %v3376_v24 = vperm.slane %v3087_v15, 7 }
 0x4e8   :  { %v3644_v54 = vld [vmem:[#allocation1] sm:$0xff] }
 0x4e9   :  { %3757 = vperm.xlu1 %4311, %v3644_v54   ;;  %3645 = vst [vmem:[#allocation1] ss:$9 sm:$0xff] %v3353_v12  ;;  %v3710_v12 = vpop.permute.xlu2 %3709 }
 0x4ea   :  { %3646 = vst [vmem:[#allocation1 + $0x1] ss:$9 sm:$0xff] %v3354_v47  ;;  %v5981_v47 = vpop.permute.xlu0 %3715 }
 0x4eb   :  { %3647 = vst [vmem:[#allocation1 + $0x2] ss:$9 sm:$0xff] %v3355_v51  ;;  %v3722_v51 = vpop.permute.xlu1 %3721 }
 0x4ec   :  { %3648 = vst [vmem:[#allocation1 + $0x3] ss:$9 sm:$0xff] %v3356_v61 }
 0x4ed   :  { %3649 = vst [vmem:[#allocation1 + $0x4] ss:$9 sm:$0xff] %v3357_v33 }
 0x4ee   :  { %3650 = vst [vmem:[#allocation1 + $0x5] ss:$9 sm:$0xff] %v3358_v7 }
 0x4ef   :  { %3651 = vst [vmem:[#allocation1 + $0x6] ss:$9 sm:$0xff] %v3359_v6 }
 0x4f0   :  { %3652 = vst [vmem:[#allocation1 + $0x7] ss:$9 sm:$0xff] %v3360_v42  ;;  %v3831_v42 = vperm.slane %v3722_v51, %v5784_v50 }
 0x4f1   :  { %v5983_v54 = vpop.permute.xlu2 %3718 }
 0x4f2   :  { %v3725_v61 = vpop.permute.xlu0 %3724 }
 0x4f3   :  { %v3731_v48 = vpop.permute.xlu1 %3730  ;;  %v3832_v2 = vperm.slane %v3725_v61, %v5789_v32 }
 0x4f4   :  { %v3836_v1 = vperm.slane %v3731_v48, %v5865_v21 }
 0x4f5   :  { %v3833_v36 = vsel %vm3773_vm6, %v3832_v2, %v3831_v42  ;;  %vm3813_vm6 = vcmask 786112  }
 0x4f7   :  { %v3653_v58 = vld [vmem:[#allocation1] sm:$0xff] }
 0x4f8   :  { %3760 = vperm.xlu0 %4309, %v3653_v58   ;;  %3654 = vst [vmem:[#allocation1] ss:$9 sm:$0xff] %v3361_v5  ;;  %v3811_v5 = vadd.s32 4294967208, %v5784_v50 }
 0x4f9   :  { %3655 = vst [vmem:[#allocation1 + $0x1] ss:$9 sm:$0xff] %v3362_v55  ;;  %v3728_v33 = vpop.permute.xlu2 %3727 }
 0x4fa   :  { %3656 = vst [vmem:[#allocation1 + $0x2] ss:$9 sm:$0xff] %v3363_v53  ;;  %v3734_v7 = vpop.permute.xlu0 %3733  ;;  %v3834_v63 = vperm.slane %v3728_v33, %v5810_v27  ;;  %v3812_v21 = vperm.slane %v3707_v39, %v3811_v5 }
 0x4fb   :  { %3657 = vst [vmem:[#allocation1 + $0x3] ss:$9 sm:$0xff] %v3364_v35  ;;  %v3838_v60 = vperm.slane %v3734_v7, %v5862_v59 }
 0x4fc   :  { %3658 = vst [vmem:[#allocation1 + $0x4] ss:$9 sm:$0xff] %v3365_v43  ;;  %v3835_v29 = vsel %vm3777_vm12, %v3834_v63, %v3833_v36  ;;  %vm3817_vm12 = vcmask 851712   ;;  %v3814_v56 = vsel %vm3813_vm6, %v3812_v21, %v5971_v13 }
 0x4fd   :  { %3659 = vst [vmem:[#allocation1 + $0x5] ss:$9 sm:$0xff] %v3366_v26  ;;  %v3837_v58 = vsel %vm3781_vm1, %v3836_v1, %v3835_v29  ;;  %vm3821_vm1 = vcmask 917312  }
 0x4fe   :  { %3660 = vst [vmem:[#allocation1 + $0x6] ss:$9 sm:$0xff] %v3367_v0  ;;  %v3839_v32 = vsel %vm3785_vm13, %v3838_v60, %v3837_v58  ;;  %v3819_v0 = vadd.s32 4294967192, %v5784_v50  ;;  %vm3825_vm13 = vcmask 982912  }
 0x4ff   :  { %3661 = vst [vmem:[#allocation1 + $0x7] ss:$9 sm:$0xff] %v3368_v30  ;;  %v3823_v30 = vadd.s32 4294967184, %v5784_v50 }
 0x500   :  { %v3820_v13 = vperm.slane %v5979_v52, %v3819_v0 }
 0x501   :  { %v3737_v6 = vpop.permute.xlu2 %3736  ;;  %v3740_v62 = vpop.permute.xlu1 %3739 }
 0x502   :  { %v3840_v46 = vperm.slane %v3737_v6, %v5895_v11  ;;  %v3842_v35 = vperm.slane %v3740_v62, %v5892_v19 }
 0x504   :  { %v3841_v55 = vsel %vm3789_vm14, %v3840_v46, %v3839_v32  ;;  %vm3829_vm14 = vcmask 1048512  }
 0x505   :  { %v3843_v59 = vsel %vm3793_vm0, %v3842_v35, %v3841_v55  ;;  %vm3863_vm0 = vcmask 1040384  }
 0x506   :  { %v3662_v41 = vld [vmem:[#allocation1] sm:$0xff] }
 0x507   :  { %3763 = vperm.xlu2 %4310, %v3662_v41   ;;  %3663 = vst [vmem:[#allocation1] ss:$9 sm:$0xff] %v3369_v20  ;;  %v3824_v41 = vperm.slane %v5981_v47, %v3823_v30 }
 0x508   :  { %3664 = vst [vmem:[#allocation1 + $0x1] ss:$9 sm:$0xff] %v3370_v18 }
 0x509   :  { %3665 = vst [vmem:[#allocation1 + $0x2] ss:$9 sm:$0xff] %v3371_v3  ;;  %v3746_v14 = vpop.permute.xlu2 %3745 }
 0x50a   :  { %3666 = vst [vmem:[#allocation1 + $0x3] ss:$9 sm:$0xff] %v3372_v4  ;;  %v3846_v26 = vperm.slane %v3746_v14, %v5936_v8  ;;  %v3816_v8 = vperm.slane %v3710_v12, %v3815_v25  ;;  %v3827_v4 = vadd.s32 4294967176, %v5784_v50 }
 0x50b   :  { %3667 = vst [vmem:[#allocation1 + $0x4] ss:$9 sm:$0xff] %v3373_v9 }
 0x50c   :  { %3668 = vst [vmem:[#allocation1 + $0x5] ss:$9 sm:$0xff] %v3374_v28  ;;  %v3818_v18 = vsel %vm3817_vm12, %v3816_v8, %v3814_v56  ;;  %v3828_v50 = vperm.slane %v5983_v54, %v3827_v4 }
 0x50d   :  { %3669 = vst [vmem:[#allocation1 + $0x6] ss:$9 sm:$0xff] %v3375_v57  ;;  %v3822_v57 = vsel %vm3821_vm1, %v3820_v13, %v3818_v18 }
 0x50e   :  { %3670 = vst [vmem:[#allocation1 + $0x7] ss:$9 sm:$0xff] %v3376_v24  ;;  %v3826_v39 = vsel %vm3825_vm13, %v3824_v41, %v3822_v57 }
 0x50f   :  { %v3830_v51 = vsel %vm3829_vm14, %v3828_v50, %v3826_v39 }
 0x510   :  { %v3743_v40 = vpop.permute.xlu0 %3742 }
 0x511   :  { %v3844_v27 = vperm.slane %v3743_v40, %v5906_v45 }
 0x513   :  { %v3845_v43 = vsel %vm3797_vm5, %v3844_v27, %v3843_v59  ;;  %vm3868_vm5 = vcmp.lt.s32.totalorder %v3768_v49, 256 }
 0x514   :  { %v3847_v45 = vsel %vm3801_vm4, %v3846_v26, %v3845_v43 }
 0x515   :  { %v3671_v37 = vld [vmem:[#allocation1] sm:$0xff] }
 0x516   :  { %3766 = vperm.xlu1 %4311, %v3671_v37  }
 0x52e   :  { %v3749_v38 = vpop.permute.xlu1 %3748 }
 0x52f   :  { %v3848_v44 = vperm.slane %v3749_v38, %v5958_v23 }
 0x531   :  { %v3849_v15 = vsel %vm3805_vm7, %v3848_v44, %v3847_v45 }
 0x534   :  { %v3755_v53 = vpop.permute.xlu2 %3754 }
 0x535   :  { %v3852_v16 = vperm.slane %v3755_v53, %v3811_v5 }
 0x53d   :  { %v3752_v17 = vpop.permute.xlu0 %3751 }
 0x53e   :  { %v3850_v31 = vperm.slane %v3752_v17, %v5961_v34 }
 0x540   :  { %v3851_v34 = vsel %vm3809_vm8, %v3850_v31, %v3849_v15 }
 0x541   :  { %v3853_v23 = vsel %vm3813_vm6, %v3852_v16, %v3851_v34 }
 0x55b   :  { %v3758_v11 = vpop.permute.xlu1 %3757 }
 0x55c   :  { %v3854_v10 = vperm.slane %v3758_v11, %v3815_v25 }
 0x55e   :  { %v3855_v9 = vsel %vm3817_vm12, %v3854_v10, %v3853_v23 }
 0x561   :  { %v3764_v22 = vpop.permute.xlu2 %3763 }
 0x562   :  { %v3858_v3 = vperm.slane %v3764_v22, %v3823_v30 }
 0x56a   :  { %v3761_v19 = vpop.permute.xlu0 %3760 }
 0x56b   :  { %v3856_v20 = vperm.slane %v3761_v19, %v3819_v0 }
 0x56d   :  { %v3857_v24 = vsel %vm3821_vm1, %v3856_v20, %v3855_v9 }
 0x56e   :  { %v3859_v12 = vsel %vm3825_vm13, %v3858_v3, %v3857_v24 }
 0x588   :  { %v3767_v28 = vpop.permute.xlu1 %3766 }
 0x589   :  { %v3860_v37 = vperm.slane %v3767_v28, %v3827_v4 }
 0x58b   :  { %v3861_v52 = vsel %vm3829_vm14, %v3860_v37, %v3859_v12 }
 0x58c   :  { %v3862_v47 = vrot.slane %v3861_v52, 7 }
 0x58e   :  { %v3864_v61 = vsel %vm3863_vm0, %v3830_v51, %v3862_v47 }
 0x58f   :  { %3870 = vst.msk [vmem:[#allocation6] sm:$0x3] %vm3868_vm5, %v3864_v61 }
 0x590   :  { %3881 = dma.vmem_to_hbm [thread:$0]  %s3877_s25, 32, %s3879_s28, [#allocation5]  }
 0x591   :  { %4490 = dma.done.wait [#allocation5], 32  }
 0x592   :  { %4491 = vsyncadd [#allocation5], 4294967264 }
 0x593   :  { %3886 = vsyncpa [#allocation4], 1 }
 0x594   :  { %3887 = vsyncpa [#allocation5], 1 }

</bundles_post_ra>
